<compile_context>
chip_gen: v7x
topology: tpu7x:2x2x1
jax: 0.10.0
libtpu: 0.0.40
codegen_flags: <defaults>
</compile_context>

<pallas_src>
import functools

import jax
import jax.numpy as jnp
from jax import lax
from jax.experimental import pallas as pl
from jax.experimental.pallas import tpu as pltpu

BN_EPS = 1e-5

_VMEM_LIMIT = 32 * 1024 * 1024          # safe on v5e/v6e/v7x
_CONV_VMEM_BUDGET = 6 * 1024 * 1024     # soft per-step target for conv tiles
_EPI_VMEM_BUDGET = 6 * 1024 * 1024      # soft per-step target for the epilogue


# --------------------------------------------------------------------------- #
# Small static helpers (trace-time Python)
# --------------------------------------------------------------------------- #
def _largest_divisor_leq(n, cap):
    cap = max(1, min(n, cap))
    for d in range(cap, 0, -1):
        if n % d == 0:
            return d
    return 1


def _pick_block_rows(H, W, C, matmul_bytes):
    # Rough per-output-row VMEM estimate: double-buffered f32 src + y out,
    # the (., W, 3C) staging scratch, and f32 accumulator / transients.
    per_row = W * C * (4 * 2 + matmul_bytes * 2 + 3 * matmul_bytes + 16)
    cap = max(1, min(256, _CONV_VMEM_BUDGET // max(per_row, 1)))
    return _largest_divisor_leq(H, cap)


def _epilogue_block_rows(rows, cap):
    if rows <= cap:
        return rows
    for d in range(min(rows, cap), 0, -1):
        if rows % d == 0 and d % 8 == 0:     # keep the sublane dim aligned
            return d
    return rows                              # correctness over budget


def _band_groups(C, max_mxu_k):
    """Group the 3 W-taps so each MXU pass has K = group*C <= max_mxu_k."""
    per = max(1, min(3, max_mxu_k // max(C, 1)))
    groups, b = [], 0
    while b < 3:
        n = min(per, 3 - b)
        groups.append((b, n))
        b += n
    return tuple(groups)


# --------------------------------------------------------------------------- #
# Kernels
# --------------------------------------------------------------------------- #
def _conv3x3_kernel(*refs, fuse_bn_relu, band_groups):
    """3x3 conv (stride=1, pad=1) over one (1, TH, W, C) row-block tile.

    Optionally applies a folded BatchNorm affine + ReLU to the *input* tile
    (fusing bn1+ReLU into the conv2 pass).  Emits per-tile per-channel
    [sum, centered-M2] of the raw f32 conv output for the two-level BN
    reduction done between pallas_calls.

    refs (in order):
      srcc  : (1, TH, W, C)  center rows of the input
      srct  : (1, 1,  W, C)  row above the block (clamped at the top edge)
      srcb  : (1, 1,  W, C)  row below the block (clamped at the bottom edge)
      w_ref : (3, 3*C, C)    weights, per-ky rows ordered [kx=1, kx=0, kx=2]
      scale_ref, shift_ref : (1, C)   only if fuse_bn_relu
      y_ref : (1, TH, W, C)  conv output (matmul_dtype)
      st_ref: (1, 1, 2, C)   [sum, centered-M2] over this tile, f32
      pad3  : (TH+2, W, 3*C) VMEM staging scratch (lane bands = W-taps)
    """
    if fuse_bn_relu:
        (srcc, srct, srcb, w_ref, scale_ref, shift_ref,
         y_ref, st_ref, pad3) = refs
    else:
        (srcc, srct, srcb, w_ref, y_ref, st_ref, pad3) = refs
        scale_ref = shift_ref = None

    _, TH, W, C = srcc.shape
    pdt = pad3.dtype
    hb = pl.program_id(1)
    hb_last = pl.num_programs(1) - 1

    def prep(v):                            # f32 compute, optional bn1+ReLU
        v = v.astype(jnp.float32)
        if fuse_bn_relu:
            v = jnp.maximum(v * scale_ref[0] + shift_ref[0], 0.0)
        return v

    # Halo rows: real neighbor rows in the interior, literal zeros at the
    # image border (the BlockSpec clamps the fetched row; mask it here).
    tmask = jnp.where(hb == 0, 0.0, 1.0)
    bmask = jnp.where(hb == hb_last, 0.0, 1.0)
    top = (prep(srct[0]) * tmask).astype(pdt)
    bot = (prep(srcb[0]) * bmask).astype(pdt)
    mid = prep(srcc[0]).astype(pdt)

    # Stage the kx=1 (center) band at lane offset 0: all W-aligned stores,
    # no sublane-rotated interior write.
    pad3[0:1, :, 0:C] = top
    pad3[1:TH + 1, :, 0:C] = mid
    pad3[TH + 1:TH + 2, :, 0:C] = bot

    # Build the kx=0 / kx=2 bands ONCE per tile from the staged center band
    # (zero-shift along W) instead of 6 misaligned slices + 3 per-ky concat
    # temps.  TODO(synk): pltpu.roll(axis=1) + column mask -> XLU.
    hmid = pad3[:, :, 0:C]                              # (TH+2, W, C), aligned
    zcol = jnp.zeros((TH + 2, 1, C), pdt)
    pad3[:, 0:1, C:2 * C] = zcol                        # kx=0 band: in[w-1]
    pad3[:, 1:W, C:2 * C] = hmid[:, 0:W - 1, :]
    pad3[:, 0:W - 1, 2 * C:3 * C] = hmid[:, 1:W, :]     # kx=2 band: in[w+1]
    pad3[:, W - 1:W, 2 * C:3 * C] = zcol

    # 3x3 conv: K=3C MXU matmuls per ky (split into K<=max_mxu_k groups when
    # asked, e.g. v5e).  Every LHS read is a leading-axis (aligned) slice of
    # the staging scratch.  NOTE: the reshape is a clean sublane merge when
    # W % 8 == 0 (true for ResNet stage-1/2 resolutions and the demo).
    acc = jnp.zeros((TH * W, C), jnp.float32)
    for ky in range(3):
        lhs = pad3[ky:ky + TH].reshape(TH * W, 3 * C)
        for b0, nb in band_groups:
            if nb == 3:
                acc += jnp.dot(lhs, w_ref[ky],
                               preferred_element_type=jnp.float32)
            else:
                acc += jnp.dot(lhs[:, b0 * C:(b0 + nb) * C],
                               w_ref[ky, b0 * C:(b0 + nb) * C, :],
                               preferred_element_type=jnp.float32)

    y_ref[0] = acc.reshape(TH, W, C).astype(y_ref.dtype)

    # Per-tile centered statistics (compensated two-level BN reduction).
    s = jnp.sum(acc, axis=0)
    mu = s * (1.0 / (TH * W))
    d = acc - mu
    m2 = jnp.sum(d * d, axis=0)
    st_ref[0, 0, 0:1, :] = s[None, :]
    st_ref[0, 0, 1:2, :] = m2[None, :]


def _bn_add_relu_kernel(y_ref, x_ref, scale_ref, shift_ref, o_ref):
    """Lane-dense epilogue: folded bn2 + residual add + ReLU on a 2-D slab."""
    o_ref[...] = jnp.maximum(
        y_ref[...].astype(jnp.float32) * scale_ref[...] + shift_ref[...]
        + x_ref[...], 0.0)


# --------------------------------------------------------------------------- #
# pallas_call wrappers
# --------------------------------------------------------------------------- #
def _conv3x3_call(src, w_packed, scale, shift, *, out_dtype, block_rows,
                  band_groups, matmul_dtype):
    """One conv pass over a (N, H_blocks) grid. Returns (y, per-tile stats)."""
    N, H, W, C = src.shape
    TH = block_rows
    HB = H // TH
    fuse = scale is not None

    def cmap(n, hb):
        return (n, hb, 0, 0)

    def tmap(n, hb):                       # row above the block, edge-clamped
        return (n, jnp.maximum(hb * TH - 1, 0), 0, 0)

    def bmap(n, hb):                       # row below the block, edge-clamped
        return (n, jnp.minimum(hb * TH + TH, H - 1), 0, 0)

    in_specs = [
        pl.BlockSpec((1, TH, W, C), cmap),
        pl.BlockSpec((1, 1, W, C), tmap),
        pl.BlockSpec((1, 1, W, C), bmap),
        # Constant block index -> weights stay VMEM-resident across the grid.
        pl.BlockSpec((3, 3 * C, C), lambda n, hb: (0, 0, 0)),
    ]
    inputs = [src, src, src, w_packed]
    if fuse:
        in_specs.append(pl.BlockSpec((1, C), lambda n, hb: (0, 0)))
        in_specs.append(pl.BlockSpec((1, C), lambda n, hb: (0, 0)))
        inputs += [scale, shift]

    y, stats = pl.pallas_call(
        functools.partial(_conv3x3_kernel, fuse_bn_relu=fuse,
                          band_groups=band_groups),
        grid=(N, HB),
        in_specs=in_specs,
        out_specs=(pl.BlockSpec((1, TH, W, C), cmap),
                   pl.BlockSpec((1, 1, 2, C), cmap)),
        out_shape=(jax.ShapeDtypeStruct((N, H, W, C), out_dtype),
                   jax.ShapeDtypeStruct((N, HB, 2, C), jnp.float32)),
        scratch_shapes=[pltpu.VMEM((TH + 2, W, 3 * C), matmul_dtype)],
        compiler_params=pltpu.CompilerParams(
            dimension_semantics=("parallel", "parallel"),
            vmem_limit_bytes=_VMEM_LIMIT),
    )(*inputs)
    return y, stats


def _pack_conv_weights(w_oihw, dtype):
    """OIHW -> (ky, 3*Cin, Cout), per-ky row order [kx=1, kx=0, kx=2] to match
    the in-kernel band layout [center, left, right]."""
    co, ci, kh, kw = w_oihw.shape
    w = jnp.transpose(w_oihw, (2, 3, 1, 0)).astype(jnp.float32)  # (kh,kw,ci,co)
    w = w[:, jnp.array([1, 0, 2]), :, :]
    return w.reshape(kh, kw * ci, co).astype(dtype)


def _bn_fold(stats, gamma, beta, tile_count, total_count):
    """Merge per-tile [sum, centered-M2] -> folded (scale, shift), f32."""
    sums = stats[:, :, 0, :]                                  # (N, HB, C)
    m2s = stats[:, :, 1, :]
    mean_t = sums / tile_count
    mean = jnp.sum(sums, axis=(0, 1)) / total_count
    m2 = jnp.sum(m2s, axis=(0, 1)) + tile_count * jnp.sum(
        (mean_t - mean) ** 2, axis=(0, 1))
    var = jnp.maximum(m2 / total_count, 0.0)                  # biased variance
    scale = gamma.astype(jnp.float32) * lax.rsqrt(var + BN_EPS)
    shift = beta.astype(jnp.float32) - mean * scale
    return scale.reshape(1, -1), shift.reshape(1, -1)


@functools.partial(jax.jit,
                   static_argnames=("matmul_dtype", "block_rows", "max_mxu_k"))
def straight_basic_block(x_nchw, w1_oihw, w2_oihw, g1, b1, g2, b2,
                         matmul_dtype=jnp.bfloat16, block_rows=None,
                         max_mxu_k=256):
    """StraightBasicBlock forward (training-mode BN). x_nchw: (N, C, H, W) f32.

    matmul_dtype: MXU input dtype (bf16 default; f32 accumulation always).
    block_rows:   H row-block size for the conv passes (None = auto).
    max_mxu_k:    per-matmul K cap (set 128 on v5e; 256 on v6e/v7x).
    """
    N, C, H, W = x_nchw.shape

    # NCHW -> NHWC (channels on the lane axis). In a full NHWC network these
    # transposes disappear; they exist only because the module API is NCHW.
    x = jnp.transpose(x_nchw, (0, 2, 3, 1)).astype(jnp.float32)

    mb = jnp.dtype(matmul_dtype).itemsize
    TH = block_rows if block_rows is not None else _pick_block_rows(H, W, C, mb)
    if H % TH != 0:
        raise ValueError(f"block_rows={TH} must divide H={H}")
    groups = _band_groups(C, max_mxu_k)

    w1k = _pack_conv_weights(w1_oihw, matmul_dtype)
    w2k = _pack_conv_weights(w2_oihw, matmul_dtype)

    tile_count = float(TH * W)
    total_count = float(N * H * W)

    # Pass 1: conv1 (+ per-tile channel stats for bn1). y1 stored in
    # matmul_dtype (bf16 on the fast path) to halve inter-pass HBM traffic.
    y1, st1 = _conv3x3_call(x, w1k, None, None, out_dtype=matmul_dtype,
                            block_rows=TH, band_groups=groups,
                            matmul_dtype=matmul_dtype)
    scale1, shift1 = _bn_fold(st1, g1, b1, tile_count, total_count)

    # Pass 2: bn1 + ReLU fused into conv2's input (+ per-tile stats for bn2).
    y2, st2 = _conv3x3_call(y1, w2k, scale1, shift1, out_dtype=matmul_dtype,
                            block_rows=TH, band_groups=groups,
                            matmul_dtype=matmul_dtype)
    scale2, shift2 = _bn_fold(st2, g2, b2, tile_count, total_count)

    # Pass 3: lane-dense epilogue -- folded bn2 + residual add + ReLU over a
    # (rows, lastdim) 2-D view (identical HBM bytes, no transpose), with
    # lastdim a multiple of C and >= 128 lanes where possible.
    total_elems = N * H * W * C
    if W * C >= 128:
        lastdim = W * C
    elif H * W * C >= 128:
        lastdim = H * W * C
    else:
        lastdim = total_elems
    rows = total_elems // lastdim
    reps = lastdim // C

    y2_2d = y2.reshape(rows, lastdim)
    x_2d = x.reshape(rows, lastdim)
    scale_row = jnp.tile(scale2, (1, reps))
    shift_row = jnp.tile(shift2, (1, reps))

    yb = jnp.dtype(y2.dtype).itemsize
    cap = max(1, _EPI_VMEM_BUDGET // max(1, lastdim * (8 + yb) * 2))
    TR = _epilogue_block_rows(rows, cap)

    out2d = pl.pallas_call(
        _bn_add_relu_kernel,
        grid=(rows // TR,),
        in_specs=[pl.BlockSpec((TR, lastdim), lambda r: (r, 0)),
                  pl.BlockSpec((TR, lastdim), lambda r: (r, 0)),
                  pl.BlockSpec((1, lastdim), lambda r: (0, 0)),
                  pl.BlockSpec((1, lastdim), lambda r: (0, 0))],
        out_specs=pl.BlockSpec((TR, lastdim), lambda r: (r, 0)),
        out_shape=jax.ShapeDtypeStruct((rows, lastdim), jnp.float32),
        compiler_params=pltpu.CompilerParams(
            dimension_semantics=("parallel",),
            vmem_limit_bytes=_VMEM_LIMIT),
    )(y2_2d, x_2d, scale_row, shift_row)

    out = out2d.reshape(N, H, W, C)
    return jnp.transpose(out, (0, 3, 1, 2))   # NHWC -> NCHW


# --------------------------------------------------------------------------- #
# Pure-JAX reference (mirrors the PyTorch forward, training-mode BN)
# --------------------------------------------------------------------------- #
def reference_basic_block(x, w1, w2, g1, b1, g2, b2):
    def conv(y, w):
        return lax.conv_general_dilated(
            y, w, window_strides=(1, 1), padding=[(1, 1), (1, 1)],
            dimension_numbers=("NCHW", "OIHW", "NCHW"))

    def bn(y, g, b):
        mean = jnp.mean(y, axis=(0, 2, 3), keepdims=True)
        var = jnp.mean((y - mean) ** 2, axis=(0, 2, 3), keepdims=True)
        return ((y - mean) * lax.rsqrt(var + BN_EPS) * g.reshape(1, -1, 1, 1)
                + b.reshape(1, -1, 1, 1))

    out = jnp.maximum(bn(conv(x, w1), g1, b1), 0.0)
    out = bn(conv(out, w2), g2, b2)
    return jnp.maximum(out + x, 0.0)


if __name__ == "__main__":
    N, C, H, W = 2, 4, 16, 16   # inplanes == planes, stride=1, downsample=None

    key = jax.random.PRNGKey(0)
    kx, kw1, kw2, kg1, kb1, kg2, kb2 = jax.random.split(key, 7)

    x = jax.random.normal(kx, (N, C, H, W), dtype=jnp.float32)
    w1 = 0.2 * jax.random.normal(kw1, (C, C, 3, 3), dtype=jnp.float32)   # OIHW
    w2 = 0.2 * jax.random.normal(kw2, (C, C, 3, 3), dtype=jnp.float32)   # OIHW
    g1 = 1.0 + 0.1 * jax.random.normal(kg1, (C,), dtype=jnp.float32)
    b1 = 0.1 * jax.random.normal(kb1, (C,), dtype=jnp.float32)
    g2 = 1.0 + 0.1 * jax.random.normal(kg2, (C,), dtype=jnp.float32)
    b2 = 0.1 * jax.random.normal(kb2, (C,), dtype=jnp.float32)

    ref = reference_basic_block(x, w1, w2, g1, b1, g2, b2)

    # f32 matmul path, single H block (halo rows fully clamped/zeroed).
    out_f32 = jax.block_until_ready(
        straight_basic_block(x, w1, w2, g1, b1, g2, b2,
                             matmul_dtype=jnp.float32))
    assert out_f32.shape == (N, C, H, W)
    err = jnp.max(jnp.abs(out_f32 - ref))
    assert err < 1e-3, f"f32 max abs err = {err}"

    # f32 matmul path, 2 H row-blocks: exercises the real-halo code path.
    out_f32_hb = jax.block_until_ready(
        straight_basic_block(x, w1, w2, g1, b1, g2, b2,
                             matmul_dtype=jnp.float32, block_rows=8))
    err_hb = jnp.max(jnp.abs(out_f32_hb - ref))
    assert err_hb < 1e-3, f"f32 row-block max abs err = {err_hb}"

    # Default fast path: bf16 matmuls + bf16 intermediates, f32 accumulation.
    out_bf16 = jax.block_until_ready(
        straight_basic_block(x, w1, w2, g1, b1, g2, b2))
    assert jnp.all(jnp.isfinite(out_bf16))
    err_bf16 = jnp.max(jnp.abs(out_bf16 - ref))
    assert err_bf16 < 0.3, f"bf16 max abs err = {err_bf16}"

    print("KERNEL_OK")
</pallas_src>

<mosaic_0001>
module attributes {stable_mosaic.version = 11 : i64} {
  func.func @_conv3x3_kernel(%arg0: i32, %arg1: i32, %arg2: memref<1x16x16x4xf32, #tpu.memory_space<vmem>>, %arg3: memref<1x1x16x4xf32, #tpu.memory_space<vmem>>, %arg4: memref<1x1x16x4xf32, #tpu.memory_space<vmem>>, %arg5: memref<3x12x4xf32, #tpu.memory_space<vmem>>, %arg6: memref<1x16x16x4xf32, #tpu.memory_space<vmem>>, %arg7: memref<1x1x2x4xf32, #tpu.memory_space<vmem>>, %arg8: memref<18x16x12xf32, #tpu.memory_space<vmem>>) attributes {dimension_semantics = [#tpu.dimension_semantics<parallel>, #tpu.dimension_semantics<parallel>], iteration_bounds = array<i64: 2, 1>, scalar_prefetch = 0 : i64, scratch_operands = 1 : i64, tpu.core_type = #tpu.core_type<tc>, window_params = [{transform_indices = @transform_0, window_bounds = array<i64: 1, 16, 16, 4>}, {transform_indices = @transform_1, window_bounds = array<i64: 1, 1, 16, 4>}, {transform_indices = @transform_2, window_bounds = array<i64: 1, 1, 16, 4>}, {pipeline_mode = #tpu.pipeline_mode<synchronous>, transform_indices = @transform_3, window_bounds = array<i64: 3, 12, 4>}, {transform_indices = @transform_4, window_bounds = array<i64: 1, 16, 16, 4>}, {transform_indices = @transform_5, window_bounds = array<i64: 1, 1, 2, 4>}]} {
    %c0_i32 = arith.constant 0 : i32
    %0 = arith.cmpi eq, %arg1, %c0_i32 : i32
    %cst = arith.constant 0.000000e+00 : f32
    %cst_0 = arith.constant 1.000000e+00 : f32
    %1 = arith.select %0, %cst, %cst_0 : f32
    %c0_i32_1 = arith.constant 0 : i32
    %2 = arith.cmpi eq, %arg1, %c0_i32_1 : i32
    %cst_2 = arith.constant 0.000000e+00 : f32
    %cst_3 = arith.constant 1.000000e+00 : f32
    %3 = arith.select %2, %cst_2, %cst_3 : f32
    %c0 = arith.constant 0 : index
    %c0_4 = arith.constant 0 : index
    %c0_5 = arith.constant 0 : index
    %c0_6 = arith.constant 0 : index
    %4 = vector.load %arg3[%c0, %c0_4, %c0_5, %c0_6] : memref<1x1x16x4xf32, #tpu.memory_space<vmem>>, vector<1x1x16x4xf32>
    %5 = vector.shape_cast %4 : vector<1x1x16x4xf32> to vector<1x16x4xf32>
    %6 = vector.broadcast %1 : f32 to vector<1x16x4xf32>
    %7 = arith.mulf %5, %6 : vector<1x16x4xf32>
    %c0_7 = arith.constant 0 : index
    %c0_8 = arith.constant 0 : index
    %c0_9 = arith.constant 0 : index
    %c0_10 = arith.constant 0 : index
    %8 = vector.load %arg4[%c0_7, %c0_8, %c0_9, %c0_10] : memref<1x1x16x4xf32, #tpu.memory_space<vmem>>, vector<1x1x16x4xf32>
    %9 = vector.shape_cast %8 : vector<1x1x16x4xf32> to vector<1x16x4xf32>
    %10 = vector.broadcast %3 : f32 to vector<1x16x4xf32>
    %11 = arith.mulf %9, %10 : vector<1x16x4xf32>
    %c0_11 = arith.constant 0 : index
    %c0_12 = arith.constant 0 : index
    %c0_13 = arith.constant 0 : index
    %c0_14 = arith.constant 0 : index
    %12 = vector.load %arg2[%c0_11, %c0_12, %c0_13, %c0_14] : memref<1x16x16x4xf32, #tpu.memory_space<vmem>>, vector<1x16x16x4xf32>
    %13 = vector.shape_cast %12 : vector<1x16x16x4xf32> to vector<16x16x4xf32>
    %c0_15 = arith.constant 0 : index
    %c0_16 = arith.constant 0 : index
    %c0_17 = arith.constant 0 : index
    %14 = vector.load %arg8[%c0_15, %c0_16, %c0_17] : memref<18x16x12xf32, #tpu.memory_space<vmem>>, vector<1x16x4xf32>
    tpu.vector_store %arg8[%c0_15, %c0_16, %c0_17], %7 {strides = array<i32>} : memref<18x16x12xf32, #tpu.memory_space<vmem>>, vector<1x16x4xf32>,
    %c1 = arith.constant 1 : index
    %c0_18 = arith.constant 0 : index
    %c0_19 = arith.constant 0 : index
    %15 = vector.load %arg8[%c1, %c0_18, %c0_19] : memref<18x16x12xf32, #tpu.memory_space<vmem>>, vector<16x16x4xf32>
    tpu.vector_store %arg8[%c1, %c0_18, %c0_19], %13 {strides = array<i32>} : memref<18x16x12xf32, #tpu.memory_space<vmem>>, vector<16x16x4xf32>,
    %c17 = arith.constant 17 : index
    %c0_20 = arith.constant 0 : index
    %c0_21 = arith.constant 0 : index
    %16 = vector.load %arg8[%c17, %c0_20, %c0_21] : memref<18x16x12xf32, #tpu.memory_space<vmem>>, vector<1x16x4xf32>
    tpu.vector_store %arg8[%c17, %c0_20, %c0_21], %11 {strides = array<i32>} : memref<18x16x12xf32, #tpu.memory_space<vmem>>, vector<1x16x4xf32>,
    %c0_22 = arith.constant 0 : index
    %c0_23 = arith.constant 0 : index
    %c0_24 = arith.constant 0 : index
    %17 = vector.load %arg8[%c0_22, %c0_23, %c0_24] : memref<18x16x12xf32, #tpu.memory_space<vmem>>, vector<18x16x4xf32>
    %cst_25 = arith.constant 0.000000e+00 : f32
    %18 = vector.broadcast %cst_25 : f32 to vector<18x1x4xf32>
    %c0_26 = arith.constant 0 : index
    %c0_27 = arith.constant 0 : index
    %c4 = arith.constant 4 : index
    %19 = vector.load %arg8[%c0_26, %c0_27, %c4] : memref<18x16x12xf32, #tpu.memory_space<vmem>>, vector<18x1x4xf32>
    tpu.vector_store %arg8[%c0_26, %c0_27, %c4], %18 {strides = array<i32>} : memref<18x16x12xf32, #tpu.memory_space<vmem>>, vector<18x1x4xf32>,
    %20 = vector.extract_strided_slice %17 {offsets = [0, 0, 0], sizes = [18, 15, 4], strides = [1, 1, 1]} : vector<18x16x4xf32> to vector<18x15x4xf32>
    %c0_28 = arith.constant 0 : index
    %c1_29 = arith.constant 1 : index
    %c4_30 = arith.constant 4 : index
    %21 = vector.load %arg8[%c0_28, %c1_29, %c4_30] : memref<18x16x12xf32, #tpu.memory_space<vmem>>, vector<18x15x4xf32>
    tpu.vector_store %arg8[%c0_28, %c1_29, %c4_30], %20 {strides = array<i32>} : memref<18x16x12xf32, #tpu.memory_space<vmem>>, vector<18x15x4xf32>,
    %22 = vector.extract_strided_slice %17 {offsets = [0, 1, 0], sizes = [18, 15, 4], strides = [1, 1, 1]} : vector<18x16x4xf32> to vector<18x15x4xf32>
    %c0_31 = arith.constant 0 : index
    %c0_32 = arith.constant 0 : index
    %c8 = arith.constant 8 : index
    %23 = vector.load %arg8[%c0_31, %c0_32, %c8] : memref<18x16x12xf32, #tpu.memory_space<vmem>>, vector<18x15x4xf32>
    tpu.vector_store %arg8[%c0_31, %c0_32, %c8], %22 {strides = array<i32>} : memref<18x16x12xf32, #tpu.memory_space<vmem>>, vector<18x15x4xf32>,
    %c0_33 = arith.constant 0 : index
    %c15 = arith.constant 15 : index
    %c8_34 = arith.constant 8 : index
    %24 = vector.load %arg8[%c0_33, %c15, %c8_34] : memref<18x16x12xf32, #tpu.memory_space<vmem>>, vector<18x1x4xf32>
    tpu.vector_store %arg8[%c0_33, %c15, %c8_34], %18 {strides = array<i32>} : memref<18x16x12xf32, #tpu.memory_space<vmem>>, vector<18x1x4xf32>,
    %cst_35 = arith.constant 0.000000e+00 : f32
    %25 = vector.broadcast %cst_35 : f32 to vector<256x4xf32>
    %c0_36 = arith.constant 0 : index
    %c0_37 = arith.constant 0 : index
    %c0_38 = arith.constant 0 : index
    %26 = vector.load %arg8[%c0_36, %c0_37, %c0_38] : memref<18x16x12xf32, #tpu.memory_space<vmem>>, vector<16x16x12xf32>
    %27 = vector.shape_cast %26 : vector<16x16x12xf32> to vector<256x12xf32>
    %c0_39 = arith.constant 0 : index
    %c0_40 = arith.constant 0 : index
    %c0_41 = arith.constant 0 : index
    %28 = vector.load %arg5[%c0_39, %c0_40, %c0_41] : memref<3x12x4xf32, #tpu.memory_space<vmem>>, vector<1x12x4xf32>
    %29 = vector.shape_cast %28 : vector<1x12x4xf32> to vector<12x4xf32>
    %cst_42 = arith.constant dense<0.000000e+00> : vector<256x4xf32>
    %30 = tpu.matmul %27, %29, %cst_42 {dimension_numbers = #tpu.dot_dimension_numbers<[1], [0], [0], [1], [0, 0, 1, 1], [], []>} : vector<256x12xf32>, vector<12x4xf32>, vector<256x4xf32> -> vector<256x4xf32>
    %31 = arith.addf %25, %30 : vector<256x4xf32>
    %c1_43 = arith.constant 1 : index
    %c0_44 = arith.constant 0 : index
    %c0_45 = arith.constant 0 : index
    %32 = vector.load %arg8[%c1_43, %c0_44, %c0_45] : memref<18x16x12xf32, #tpu.memory_space<vmem>>, vector<16x16x12xf32>
    %33 = vector.shape_cast %32 : vector<16x16x12xf32> to vector<256x12xf32>
    %c1_46 = arith.constant 1 : index
    %c0_47 = arith.constant 0 : index
    %c0_48 = arith.constant 0 : index
    %34 = vector.load %arg5[%c1_46, %c0_47, %c0_48] : memref<3x12x4xf32, #tpu.memory_space<vmem>>, vector<1x12x4xf32>
    %35 = vector.shape_cast %34 : vector<1x12x4xf32> to vector<12x4xf32>
    %cst_49 = arith.constant dense<0.000000e+00> : vector<256x4xf32>
    %36 = tpu.matmul %33, %35, %cst_49 {dimension_numbers = #tpu.dot_dimension_numbers<[1], [0], [0], [1], [0, 0, 1, 1], [], []>} : vector<256x12xf32>, vector<12x4xf32>, vector<256x4xf32> -> vector<256x4xf32>
    %37 = arith.addf %31, %36 : vector<256x4xf32>
    %c2 = arith.constant 2 : index
    %c0_50 = arith.constant 0 : index
    %c0_51 = arith.constant 0 : index
    %38 = vector.load %arg8[%c2, %c0_50, %c0_51] : memref<18x16x12xf32, #tpu.memory_space<vmem>>, vector<16x16x12xf32>
    %39 = vector.shape_cast %38 : vector<16x16x12xf32> to vector<256x12xf32>
    %c2_52 = arith.constant 2 : index
    %c0_53 = arith.constant 0 : index
    %c0_54 = arith.constant 0 : index
    %40 = vector.load %arg5[%c2_52, %c0_53, %c0_54] : memref<3x12x4xf32, #tpu.memory_space<vmem>>, vector<1x12x4xf32>
    %41 = vector.shape_cast %40 : vector<1x12x4xf32> to vector<12x4xf32>
    %cst_55 = arith.constant dense<0.000000e+00> : vector<256x4xf32>
    %42 = tpu.matmul %39, %41, %cst_55 {dimension_numbers = #tpu.dot_dimension_numbers<[1], [0], [0], [1], [0, 0, 1, 1], [], []>} : vector<256x12xf32>, vector<12x4xf32>, vector<256x4xf32> -> vector<256x4xf32>
    %43 = arith.addf %37, %42 : vector<256x4xf32>
    %44 = vector.shape_cast %43 : vector<256x4xf32> to vector<16x16x4xf32>
    %c0_56 = arith.constant 0 : index
    %c0_57 = arith.constant 0 : index
    %c0_58 = arith.constant 0 : index
    %c0_59 = arith.constant 0 : index
    %45 = vector.load %arg6[%c0_56, %c0_57, %c0_58, %c0_59] : memref<1x16x16x4xf32, #tpu.memory_space<vmem>>, vector<1x16x16x4xf32>
    %46 = vector.shape_cast %45 : vector<1x16x16x4xf32> to vector<16x16x4xf32>
    %47 = vector.shape_cast %44 : vector<16x16x4xf32> to vector<1x16x16x4xf32>
    tpu.vector_store %arg6[%c0_56, %c0_57, %c0_58, %c0_59], %47 {strides = array<i32>} : memref<1x16x16x4xf32, #tpu.memory_space<vmem>>, vector<1x16x16x4xf32>,
    %cst_60 = arith.constant dense<0.000000e+00> : vector<4xf32>
    %48 = vector.multi_reduction <add>, %43, %cst_60 [0] : vector<256x4xf32> to vector<4xf32>
    %cst_61 = arith.constant 3.906250e-03 : f32
    %49 = vector.broadcast %cst_61 : f32 to vector<4xf32>
    %50 = arith.mulf %48, %49 : vector<4xf32>
    %51 = vector.shape_cast %50 : vector<4xf32> to vector<1x4xf32>
    %52 = vector.broadcast %51 : vector<1x4xf32> to vector<256x4xf32>
    %53 = arith.subf %43, %52 : vector<256x4xf32>
    %54 = arith.mulf %53, %53 : vector<256x4xf32>
    %cst_62 = arith.constant dense<0.000000e+00> : vector<4xf32>
    %55 = vector.multi_reduction <add>, %54, %cst_62 [0] : vector<256x4xf32> to vector<4xf32>
    %56 = vector.shape_cast %48 : vector<4xf32> to vector<1x4xf32>
    %c0_63 = arith.constant 0 : index
    %c0_64 = arith.constant 0 : index
    %c0_65 = arith.constant 0 : index
    %c0_66 = arith.constant 0 : index
    %57 = vector.load %arg7[%c0_63, %c0_64, %c0_65, %c0_66] : memref<1x1x2x4xf32, #tpu.memory_space<vmem>>, vector<1x1x1x4xf32>
    %58 = vector.shape_cast %57 : vector<1x1x1x4xf32> to vector<1x4xf32>
    %59 = vector.shape_cast %56 : vector<1x4xf32> to vector<1x1x1x4xf32>
    tpu.vector_store %arg7[%c0_63, %c0_64, %c0_65, %c0_66], %59 {strides = array<i32>} : memref<1x1x2x4xf32, #tpu.memory_space<vmem>>, vector<1x1x1x4xf32>,
    %60 = vector.shape_cast %55 : vector<4xf32> to vector<1x4xf32>
    %c0_67 = arith.constant 0 : index
    %c0_68 = arith.constant 0 : index
    %c1_69 = arith.constant 1 : index
    %c0_70 = arith.constant 0 : index
    %61 = vector.load %arg7[%c0_67, %c0_68, %c1_69, %c0_70] : memref<1x1x2x4xf32, #tpu.memory_space<vmem>>, vector<1x1x1x4xf32>
    %62 = vector.shape_cast %61 : vector<1x1x1x4xf32> to vector<1x4xf32>
    %63 = vector.shape_cast %60 : vector<1x4xf32> to vector<1x1x1x4xf32>
    tpu.vector_store %arg7[%c0_67, %c0_68, %c1_69, %c0_70], %63 {strides = array<i32>} : memref<1x1x2x4xf32, #tpu.memory_space<vmem>>, vector<1x1x1x4xf32>,
    return
  }
  func.func @transform_0(%arg0: i32, %arg1: i32) -> (i32, i32, i32, i32) {
    %c0_i32 = arith.constant 0 : i32
    %c0_i32_0 = arith.constant 0 : i32
    %c0_i32_1 = arith.constant 0 : i32
    return %arg0, %arg1, %c0_i32, %c0_i32_0 : i32, i32, i32, i32
  }
  func.func @transform_1(%arg0: i32, %arg1: i32) -> (i32, i32, i32, i32) {
    %c16_i32 = arith.constant 16 : i32
    %0 = arith.muli %arg1, %c16_i32 : i32
    %c1_i32 = arith.constant 1 : i32
    %1 = arith.subi %0, %c1_i32 : i32
    %c0_i32 = arith.constant 0 : i32
    %2 = arith.maxsi %1, %c0_i32 : i32
    %c0_i32_0 = arith.constant 0 : i32
    %c0_i32_1 = arith.constant 0 : i32
    %c0_i32_2 = arith.constant 0 : i32
    return %arg0, %2, %c0_i32_0, %c0_i32_1 : i32, i32, i32, i32
  }
  func.func @transform_2(%arg0: i32, %arg1: i32) -> (i32, i32, i32, i32) {
    %c16_i32 = arith.constant 16 : i32
    %0 = arith.muli %arg1, %c16_i32 : i32
    %c16_i32_0 = arith.constant 16 : i32
    %1 = arith.addi %0, %c16_i32_0 : i32
    %c15_i32 = arith.constant 15 : i32
    %2 = arith.minsi %1, %c15_i32 : i32
    %c0_i32 = arith.constant 0 : i32
    %c0_i32_1 = arith.constant 0 : i32
    %c0_i32_2 = arith.constant 0 : i32
    return %arg0, %2, %c0_i32, %c0_i32_1 : i32, i32, i32, i32
  }
  func.func @transform_3(%arg0: i32, %arg1: i32) -> (i32, i32, i32) {
    %c0_i32 = arith.constant 0 : i32
    %c0_i32_0 = arith.constant 0 : i32
    %c0_i32_1 = arith.constant 0 : i32
    %c0_i32_2 = arith.constant 0 : i32
    return %c0_i32, %c0_i32_0, %c0_i32_1 : i32, i32, i32
  }
  func.func @transform_4(%arg0: i32, %arg1: i32) -> (i32, i32, i32, i32) {
    %c0_i32 = arith.constant 0 : i32
    %c0_i32_0 = arith.constant 0 : i32
    %c0_i32_1 = arith.constant 0 : i32
    return %arg0, %arg1, %c0_i32, %c0_i32_0 : i32, i32, i32, i32
  }
  func.func @transform_5(%arg0: i32, %arg1: i32) -> (i32, i32, i32, i32) {
    %c0_i32 = arith.constant 0 : i32
    %c0_i32_0 = arith.constant 0 : i32
    %c0_i32_1 = arith.constant 0 : i32
    return %arg0, %arg1, %c0_i32, %c0_i32_0 : i32, i32, i32, i32
  }
}

module attributes {stable_mosaic.version = 11 : i64} {
  func.func @_conv3x3_kernel(%arg0: i32, %arg1: i32, %arg2: memref<1x16x16x4xf32, #tpu.memory_space<vmem>>, %arg3: memref<1x1x16x4xf32, #tpu.memory_space<vmem>>, %arg4: memref<1x1x16x4xf32, #tpu.memory_space<vmem>>, %arg5: memref<3x12x4xf32, #tpu.memory_space<vmem>>, %arg6: memref<1x4xf32, #tpu.memory_space<vmem>>, %arg7: memref<1x4xf32, #tpu.memory_space<vmem>>, %arg8: memref<1x16x16x4xf32, #tpu.memory_space<vmem>>, %arg9: memref<1x1x2x4xf32, #tpu.memory_space<vmem>>, %arg10: memref<18x16x12xf32, #tpu.memory_space<vmem>>) attributes {dimension_semantics = [#tpu.dimension_semantics<parallel>, #tpu.dimension_semantics<parallel>], iteration_bounds = array<i64: 2, 1>, scalar_prefetch = 0 : i64, scratch_operands = 1 : i64, tpu.core_type = #tpu.core_type<tc>, window_params = [{transform_indices = @transform_0, window_bounds = array<i64: 1, 16, 16, 4>}, {transform_indices = @transform_1, window_bounds = array<i64: 1, 1, 16, 4>}, {transform_indices = @transform_2, window_bounds = array<i64: 1, 1, 16, 4>}, {pipeline_mode = #tpu.pipeline_mode<synchronous>, transform_indices = @transform_3, window_bounds = array<i64: 3, 12, 4>}, {pipeline_mode = #tpu.pipeline_mode<synchronous>, transform_indices = @transform_4, window_bounds = array<i64: 1, 4>}, {pipeline_mode = #tpu.pipeline_mode<synchronous>, transform_indices = @transform_5, window_bounds = array<i64: 1, 4>}, {transform_indices = @transform_6, window_bounds = array<i64: 1, 16, 16, 4>}, {transform_indices = @transform_7, window_bounds = array<i64: 1, 1, 2, 4>}]} {
    %c0_i32 = arith.constant 0 : i32
    %0 = arith.cmpi eq, %arg1, %c0_i32 : i32
    %cst = arith.constant 0.000000e+00 : f32
    %cst_0 = arith.constant 1.000000e+00 : f32
    %1 = arith.select %0, %cst, %cst_0 : f32
    %c0_i32_1 = arith.constant 0 : i32
    %2 = arith.cmpi eq, %arg1, %c0_i32_1 : i32
    %cst_2 = arith.constant 0.000000e+00 : f32
    %cst_3 = arith.constant 1.000000e+00 : f32
    %3 = arith.select %2, %cst_2, %cst_3 : f32
    %c0 = arith.constant 0 : index
    %c0_4 = arith.constant 0 : index
    %c0_5 = arith.constant 0 : index
    %c0_6 = arith.constant 0 : index
    %4 = vector.load %arg3[%c0, %c0_4, %c0_5, %c0_6] : memref<1x1x16x4xf32, #tpu.memory_space<vmem>>, vector<1x1x16x4xf32>
    %5 = vector.shape_cast %4 : vector<1x1x16x4xf32> to vector<1x16x4xf32>
    %c0_7 = arith.constant 0 : index
    %c0_8 = arith.constant 0 : index
    %6 = vector.load %arg6[%c0_7, %c0_8] : memref<1x4xf32, #tpu.memory_space<vmem>>, vector<1x4xf32>
    %7 = vector.shape_cast %6 : vector<1x4xf32> to vector<4xf32>
    %8 = vector.shape_cast %7 : vector<4xf32> to vector<1x1x4xf32>
    %9 = vector.broadcast %8 : vector<1x1x4xf32> to vector<1x16x4xf32>
    %10 = arith.mulf %5, %9 : vector<1x16x4xf32>
    %c0_9 = arith.constant 0 : index
    %c0_10 = arith.constant 0 : index
    %11 = vector.load %arg7[%c0_9, %c0_10] : memref<1x4xf32, #tpu.memory_space<vmem>>, vector<1x4xf32>
    %12 = vector.shape_cast %11 : vector<1x4xf32> to vector<4xf32>
    %13 = vector.shape_cast %12 : vector<4xf32> to vector<1x1x4xf32>
    %14 = vector.broadcast %13 : vector<1x1x4xf32> to vector<1x16x4xf32>
    %15 = arith.addf %10, %14 : vector<1x16x4xf32>
    %cst_11 = arith.constant 0.000000e+00 : f32
    %16 = vector.broadcast %cst_11 : f32 to vector<1x16x4xf32>
    %17 = arith.maximumf %15, %16 : vector<1x16x4xf32>
    %18 = vector.broadcast %1 : f32 to vector<1x16x4xf32>
    %19 = arith.mulf %17, %18 : vector<1x16x4xf32>
    %c0_12 = arith.constant 0 : index
    %c0_13 = arith.constant 0 : index
    %c0_14 = arith.constant 0 : index
    %c0_15 = arith.constant 0 : index
    %20 = vector.load %arg4[%c0_12, %c0_13, %c0_14, %c0_15] : memref<1x1x16x4xf32, #tpu.memory_space<vmem>>, vector<1x1x16x4xf32>
    %21 = vector.shape_cast %20 : vector<1x1x16x4xf32> to vector<1x16x4xf32>
    %c0_16 = arith.constant 0 : index
    %c0_17 = arith.constant 0 : index
    %22 = vector.load %arg6[%c0_16, %c0_17] : memref<1x4xf32, #tpu.memory_space<vmem>>, vector<1x4xf32>
    %23 = vector.shape_cast %22 : vector<1x4xf32> to vector<4xf32>
    %24 = vector.shape_cast %23 : vector<4xf32> to vector<1x1x4xf32>
    %25 = vector.broadcast %24 : vector<1x1x4xf32> to vector<1x16x4xf32>
    %26 = arith.mulf %21, %25 : vector<1x16x4xf32>
    %c0_18 = arith.constant 0 : index
    %c0_19 = arith.constant 0 : index
    %27 = vector.load %arg7[%c0_18, %c0_19] : memref<1x4xf32, #tpu.memory_space<vmem>>, vector<1x4xf32>
    %28 = vector.shape_cast %27 : vector<1x4xf32> to vector<4xf32>
    %29 = vector.shape_cast %28 : vector<4xf32> to vector<1x1x4xf32>
    %30 = vector.broadcast %29 : vector<1x1x4xf32> to vector<1x16x4xf32>
    %31 = arith.addf %26, %30 : vector<1x16x4xf32>
    %cst_20 = arith.constant 0.000000e+00 : f32
    %32 = vector.broadcast %cst_20 : f32 to vector<1x16x4xf32>
    %33 = arith.maximumf %31, %32 : vector<1x16x4xf32>
    %34 = vector.broadcast %3 : f32 to vector<1x16x4xf32>
    %35 = arith.mulf %33, %34 : vector<1x16x4xf32>
    %c0_21 = arith.constant 0 : index
    %c0_22 = arith.constant 0 : index
    %c0_23 = arith.constant 0 : index
    %c0_24 = arith.constant 0 : index
    %36 = vector.load %arg2[%c0_21, %c0_22, %c0_23, %c0_24] : memref<1x16x16x4xf32, #tpu.memory_space<vmem>>, vector<1x16x16x4xf32>
    %37 = vector.shape_cast %36 : vector<1x16x16x4xf32> to vector<16x16x4xf32>
    %c0_25 = arith.constant 0 : index
    %c0_26 = arith.constant 0 : index
    %38 = vector.load %arg6[%c0_25, %c0_26] : memref<1x4xf32, #tpu.memory_space<vmem>>, vector<1x4xf32>
    %39 = vector.shape_cast %38 : vector<1x4xf32> to vector<4xf32>
    %40 = vector.shape_cast %39 : vector<4xf32> to vector<1x1x4xf32>
    %41 = vector.broadcast %40 : vector<1x1x4xf32> to vector<16x16x4xf32>
    %42 = arith.mulf %37, %41 : vector<16x16x4xf32>
    %c0_27 = arith.constant 0 : index
    %c0_28 = arith.constant 0 : index
    %43 = vector.load %arg7[%c0_27, %c0_28] : memref<1x4xf32, #tpu.memory_space<vmem>>, vector<1x4xf32>
    %44 = vector.shape_cast %43 : vector<1x4xf32> to vector<4xf32>
    %45 = vector.shape_cast %44 : vector<4xf32> to vector<1x1x4xf32>
    %46 = vector.broadcast %45 : vector<1x1x4xf32> to vector<16x16x4xf32>
    %47 = arith.addf %42, %46 : vector<16x16x4xf32>
    %cst_29 = arith.constant 0.000000e+00 : f32
    %48 = vector.broadcast %cst_29 : f32 to vector<16x16x4xf32>
    %49 = arith.maximumf %47, %48 : vector<16x16x4xf32>
    %c0_30 = arith.constant 0 : index
    %c0_31 = arith.constant 0 : index
    %c0_32 = arith.constant 0 : index
    %50 = vector.load %arg10[%c0_30, %c0_31, %c0_32] : memref<18x16x12xf32, #tpu.memory_space<vmem>>, vector<1x16x4xf32>
    tpu.vector_store %arg10[%c0_30, %c0_31, %c0_32], %19 {strides = array<i32>} : memref<18x16x12xf32, #tpu.memory_space<vmem>>, vector<1x16x4xf32>,
    %c1 = arith.constant 1 : index
    %c0_33 = arith.constant 0 : index
    %c0_34 = arith.constant 0 : index
    %51 = vector.load %arg10[%c1, %c0_33, %c0_34] : memref<18x16x12xf32, #tpu.memory_space<vmem>>, vector<16x16x4xf32>
    tpu.vector_store %arg10[%c1, %c0_33, %c0_34], %49 {strides = array<i32>} : memref<18x16x12xf32, #tpu.memory_space<vmem>>, vector<16x16x4xf32>,
    %c17 = arith.constant 17 : index
    %c0_35 = arith.constant 0 : index
    %c0_36 = arith.constant 0 : index
    %52 = vector.load %arg10[%c17, %c0_35, %c0_36] : memref<18x16x12xf32, #tpu.memory_space<vmem>>, vector<1x16x4xf32>
    tpu.vector_store %arg10[%c17, %c0_35, %c0_36], %35 {strides = array<i32>} : memref<18x16x12xf32, #tpu.memory_space<vmem>>, vector<1x16x4xf32>,
    %c0_37 = arith.constant 0 : index
    %c0_38 = arith.constant 0 : index
    %c0_39 = arith.constant 0 : index
    %53 = vector.load %arg10[%c0_37, %c0_38, %c0_39] : memref<18x16x12xf32, #tpu.memory_space<vmem>>, vector<18x16x4xf32>
    %cst_40 = arith.constant 0.000000e+00 : f32
    %54 = vector.broadcast %cst_40 : f32 to vector<18x1x4xf32>
    %c0_41 = arith.constant 0 : index
    %c0_42 = arith.constant 0 : index
    %c4 = arith.constant 4 : index
    %55 = vector.load %arg10[%c0_41, %c0_42, %c4] : memref<18x16x12xf32, #tpu.memory_space<vmem>>, vector<18x1x4xf32>
    tpu.vector_store %arg10[%c0_41, %c0_42, %c4], %54 {strides = array<i32>} : memref<18x16x12xf32, #tpu.memory_space<vmem>>, vector<18x1x4xf32>,
    %56 = vector.extract_strided_slice %53 {offsets = [0, 0, 0], sizes = [18, 15, 4], strides = [1, 1, 1]} : vector<18x16x4xf32> to vector<18x15x4xf32>
    %c0_43 = arith.constant 0 : index
    %c1_44 = arith.constant 1 : index
    %c4_45 = arith.constant 4 : index
    %57 = vector.load %arg10[%c0_43, %c1_44, %c4_45] : memref<18x16x12xf32, #tpu.memory_space<vmem>>, vector<18x15x4xf32>
    tpu.vector_store %arg10[%c0_43, %c1_44, %c4_45], %56 {strides = array<i32>} : memref<18x16x12xf32, #tpu.memory_space<vmem>>, vector<18x15x4xf32>,
    %58 = vector.extract_strided_slice %53 {offsets = [0, 1, 0], sizes = [18, 15, 4], strides = [1, 1, 1]} : vector<18x16x4xf32> to vector<18x15x4xf32>
    %c0_46 = arith.constant 0 : index
    %c0_47 = arith.constant 0 : index
    %c8 = arith.constant 8 : index
    %59 = vector.load %arg10[%c0_46, %c0_47, %c8] : memref<18x16x12xf32, #tpu.memory_space<vmem>>, vector<18x15x4xf32>
    tpu.vector_store %arg10[%c0_46, %c0_47, %c8], %58 {strides = array<i32>} : memref<18x16x12xf32, #tpu.memory_space<vmem>>, vector<18x15x4xf32>,
    %c0_48 = arith.constant 0 : index
    %c15 = arith.constant 15 : index
    %c8_49 = arith.constant 8 : index
    %60 = vector.load %arg10[%c0_48, %c15, %c8_49] : memref<18x16x12xf32, #tpu.memory_space<vmem>>, vector<18x1x4xf32>
    tpu.vector_store %arg10[%c0_48, %c15, %c8_49], %54 {strides = array<i32>} : memref<18x16x12xf32, #tpu.memory_space<vmem>>, vector<18x1x4xf32>,
    %cst_50 = arith.constant 0.000000e+00 : f32
    %61 = vector.broadcast %cst_50 : f32 to vector<256x4xf32>
    %c0_51 = arith.constant 0 : index
    %c0_52 = arith.constant 0 : index
    %c0_53 = arith.constant 0 : index
    %62 = vector.load %arg10[%c0_51, %c0_52, %c0_53] : memref<18x16x12xf32, #tpu.memory_space<vmem>>, vector<16x16x12xf32>
    %63 = vector.shape_cast %62 : vector<16x16x12xf32> to vector<256x12xf32>
    %c0_54 = arith.constant 0 : index
    %c0_55 = arith.constant 0 : index
    %c0_56 = arith.constant 0 : index
    %64 = vector.load %arg5[%c0_54, %c0_55, %c0_56] : memref<3x12x4xf32, #tpu.memory_space<vmem>>, vector<1x12x4xf32>
    %65 = vector.shape_cast %64 : vector<1x12x4xf32> to vector<12x4xf32>
    %cst_57 = arith.constant dense<0.000000e+00> : vector<256x4xf32>
    %66 = tpu.matmul %63, %65, %cst_57 {dimension_numbers = #tpu.dot_dimension_numbers<[1], [0], [0], [1], [0, 0, 1, 1], [], []>} : vector<256x12xf32>, vector<12x4xf32>, vector<256x4xf32> -> vector<256x4xf32>
    %67 = arith.addf %61, %66 : vector<256x4xf32>
    %c1_58 = arith.constant 1 : index
    %c0_59 = arith.constant 0 : index
    %c0_60 = arith.constant 0 : index
    %68 = vector.load %arg10[%c1_58, %c0_59, %c0_60] : memref<18x16x12xf32, #tpu.memory_space<vmem>>, vector<16x16x12xf32>
    %69 = vector.shape_cast %68 : vector<16x16x12xf32> to vector<256x12xf32>
    %c1_61 = arith.constant 1 : index
    %c0_62 = arith.constant 0 : index
    %c0_63 = arith.constant 0 : index
    %70 = vector.load %arg5[%c1_61, %c0_62, %c0_63] : memref<3x12x4xf32, #tpu.memory_space<vmem>>, vector<1x12x4xf32>
    %71 = vector.shape_cast %70 : vector<1x12x4xf32> to vector<12x4xf32>
    %cst_64 = arith.constant dense<0.000000e+00> : vector<256x4xf32>
    %72 = tpu.matmul %69, %71, %cst_64 {dimension_numbers = #tpu.dot_dimension_numbers<[1], [0], [0], [1], [0, 0, 1, 1], [], []>} : vector<256x12xf32>, vector<12x4xf32>, vector<256x4xf32> -> vector<256x4xf32>
    %73 = arith.addf %67, %72 : vector<256x4xf32>
    %c2 = arith.constant 2 : index
    %c0_65 = arith.constant 0 : index
    %c0_66 = arith.constant 0 : index
    %74 = vector.load %arg10[%c2, %c0_65, %c0_66] : memref<18x16x12xf32, #tpu.memory_space<vmem>>, vector<16x16x12xf32>
    %75 = vector.shape_cast %74 : vector<16x16x12xf32> to vector<256x12xf32>
    %c2_67 = arith.constant 2 : index
    %c0_68 = arith.constant 0 : index
    %c0_69 = arith.constant 0 : index
    %76 = vector.load %arg5[%c2_67, %c0_68, %c0_69] : memref<3x12x4xf32, #tpu.memory_space<vmem>>, vector<1x12x4xf32>
    %77 = vector.shape_cast %76 : vector<1x12x4xf32> to vector<12x4xf32>
    %cst_70 = arith.constant dense<0.000000e+00> : vector<256x4xf32>
    %78 = tpu.matmul %75, %77, %cst_70 {dimension_numbers = #tpu.dot_dimension_numbers<[1], [0], [0], [1], [0, 0, 1, 1], [], []>} : vector<256x12xf32>, vector<12x4xf32>, vector<256x4xf32> -> vector<256x4xf32>
    %79 = arith.addf %73, %78 : vector<256x4xf32>
    %80 = vector.shape_cast %79 : vector<256x4xf32> to vector<16x16x4xf32>
    %c0_71 = arith.constant 0 : index
    %c0_72 = arith.constant 0 : index
    %c0_73 = arith.constant 0 : index
    %c0_74 = arith.constant 0 : index
    %81 = vector.load %arg8[%c0_71, %c0_72, %c0_73, %c0_74] : memref<1x16x16x4xf32, #tpu.memory_space<vmem>>, vector<1x16x16x4xf32>
    %82 = vector.shape_cast %81 : vector<1x16x16x4xf32> to vector<16x16x4xf32>
    %83 = vector.shape_cast %80 : vector<16x16x4xf32> to vector<1x16x16x4xf32>
    tpu.vector_store %arg8[%c0_71, %c0_72, %c0_73, %c0_74], %83 {strides = array<i32>} : memref<1x16x16x4xf32, #tpu.memory_space<vmem>>, vector<1x16x16x4xf32>,
    %cst_75 = arith.constant dense<0.000000e+00> : vector<4xf32>
    %84 = vector.multi_reduction <add>, %79, %cst_75 [0] : vector<256x4xf32> to vector<4xf32>
    %cst_76 = arith.constant 3.906250e-03 : f32
    %85 = vector.broadcast %cst_76 : f32 to vector<4xf32>
    %86 = arith.mulf %84, %85 : vector<4xf32>
    %87 = vector.shape_cast %86 : vector<4xf32> to vector<1x4xf32>
    %88 = vector.broadcast %87 : vector<1x4xf32> to vector<256x4xf32>
    %89 = arith.subf %79, %88 : vector<256x4xf32>
    %90 = arith.mulf %89, %89 : vector<256x4xf32>
    %cst_77 = arith.constant dense<0.000000e+00> : vector<4xf32>
    %91 = vector.multi_reduction <add>, %90, %cst_77 [0] : vector<256x4xf32> to vector<4xf32>
    %92 = vector.shape_cast %84 : vector<4xf32> to vector<1x4xf32>
    %c0_78 = arith.constant 0 : index
    %c0_79 = arith.constant 0 : index
    %c0_80 = arith.constant 0 : index
    %c0_81 = arith.constant 0 : index
    %93 = vector.load %arg9[%c0_78, %c0_79, %c0_80, %c0_81] : memref<1x1x2x4xf32, #tpu.memory_space<vmem>>, vector<1x1x1x4xf32>
    %94 = vector.shape_cast %93 : vector<1x1x1x4xf32> to vector<1x4xf32>
    %95 = vector.shape_cast %92 : vector<1x4xf32> to vector<1x1x1x4xf32>
    tpu.vector_store %arg9[%c0_78, %c0_79, %c0_80, %c0_81], %95 {strides = array<i32>} : memref<1x1x2x4xf32, #tpu.memory_space<vmem>>, vector<1x1x1x4xf32>,
    %96 = vector.shape_cast %91 : vector<4xf32> to vector<1x4xf32>
    %c0_82 = arith.constant 0 : index
    %c0_83 = arith.constant 0 : index
    %c1_84 = arith.constant 1 : index
    %c0_85 = arith.constant 0 : index
    %97 = vector.load %arg9[%c0_82, %c0_83, %c1_84, %c0_85] : memref<1x1x2x4xf32, #tpu.memory_space<vmem>>, vector<1x1x1x4xf32>
    %98 = vector.shape_cast %97 : vector<1x1x1x4xf32> to vector<1x4xf32>
    %99 = vector.shape_cast %96 : vector<1x4xf32> to vector<1x1x1x4xf32>
    tpu.vector_store %arg9[%c0_82, %c0_83, %c1_84, %c0_85], %99 {strides = array<i32>} : memref<1x1x2x4xf32, #tpu.memory_space<vmem>>, vector<1x1x1x4xf32>,
    return
  }
  func.func @transform_0(%arg0: i32, %arg1: i32) -> (i32, i32, i32, i32) {
    %c0_i32 = arith.constant 0 : i32
    %c0_i32_0 = arith.constant 0 : i32
    %c0_i32_1 = arith.constant 0 : i32
    return %arg0, %arg1, %c0_i32, %c0_i32_0 : i32, i32, i32, i32
  }
  func.func @transform_1(%arg0: i32, %arg1: i32) -> (i32, i32, i32, i32) {
    %c16_i32 = arith.constant 16 : i32
    %0 = arith.muli %arg1, %c16_i32 : i32
    %c1_i32 = arith.constant 1 : i32
    %1 = arith.subi %0, %c1_i32 : i32
    %c0_i32 = arith.constant 0 : i32
    %2 = arith.maxsi %1, %c0_i32 : i32
    %c0_i32_0 = arith.constant 0 : i32
    %c0_i32_1 = arith.constant 0 : i32
    %c0_i32_2 = arith.constant 0 : i32
    return %arg0, %2, %c0_i32_0, %c0_i32_1 : i32, i32, i32, i32
  }
  func.func @transform_2(%arg0: i32, %arg1: i32) -> (i32, i32, i32, i32) {
    %c16_i32 = arith.constant 16 : i32
    %0 = arith.muli %arg1, %c16_i32 : i32
    %c16_i32_0 = arith.constant 16 : i32
    %1 = arith.addi %0, %c16_i32_0 : i32
    %c15_i32 = arith.constant 15 : i32
    %2 = arith.minsi %1, %c15_i32 : i32
    %c0_i32 = arith.constant 0 : i32
    %c0_i32_1 = arith.constant 0 : i32
    %c0_i32_2 = arith.constant 0 : i32
    return %arg0, %2, %c0_i32, %c0_i32_1 : i32, i32, i32, i32
  }
  func.func @transform_3(%arg0: i32, %arg1: i32) -> (i32, i32, i32) {
    %c0_i32 = arith.constant 0 : i32
    %c0_i32_0 = arith.constant 0 : i32
    %c0_i32_1 = arith.constant 0 : i32
    %c0_i32_2 = arith.constant 0 : i32
    return %c0_i32, %c0_i32_0, %c0_i32_1 : i32, i32, i32
  }
  func.func @transform_4(%arg0: i32, %arg1: i32) -> (i32, i32) {
    %c0_i32 = arith.constant 0 : i32
    %c0_i32_0 = arith.constant 0 : i32
    %c0_i32_1 = arith.constant 0 : i32
    return %c0_i32, %c0_i32_0 : i32, i32
  }
  func.func @transform_5(%arg0: i32, %arg1: i32) -> (i32, i32) {
    %c0_i32 = arith.constant 0 : i32
    %c0_i32_0 = arith.constant 0 : i32
    %c0_i32_1 = arith.constant 0 : i32
    return %c0_i32, %c0_i32_0 : i32, i32
  }
  func.func @transform_6(%arg0: i32, %arg1: i32) -> (i32, i32, i32, i32) {
    %c0_i32 = arith.constant 0 : i32
    %c0_i32_0 = arith.constant 0 : i32
    %c0_i32_1 = arith.constant 0 : i32
    return %arg0, %arg1, %c0_i32, %c0_i32_0 : i32, i32, i32, i32
  }
  func.func @transform_7(%arg0: i32, %arg1: i32) -> (i32, i32, i32, i32) {
    %c0_i32 = arith.constant 0 : i32
    %c0_i32_0 = arith.constant 0 : i32
    %c0_i32_1 = arith.constant 0 : i32
    return %arg0, %arg1, %c0_i32, %c0_i32_0 : i32, i32, i32, i32
  }
}

module attributes {stable_mosaic.version = 11 : i64} {
  func.func @_bn_add_relu_kernel(%arg0: i32, %arg1: memref<2x1024xf32, #tpu.memory_space<vmem>>, %arg2: memref<2x1024xf32, #tpu.memory_space<vmem>>, %arg3: memref<1x1024xf32, #tpu.memory_space<vmem>>, %arg4: memref<1x1024xf32, #tpu.memory_space<vmem>>, %arg5: memref<2x1024xf32, #tpu.memory_space<vmem>>) attributes {dimension_semantics = [#tpu.dimension_semantics<parallel>], iteration_bounds = array<i64: 1>, scalar_prefetch = 0 : i64, scratch_operands = 0 : i64, tpu.core_type = #tpu.core_type<tc>, window_params = [{transform_indices = @transform_0, window_bounds = array<i64: 2, 1024>}, {transform_indices = @transform_1, window_bounds = array<i64: 2, 1024>}, {pipeline_mode = #tpu.pipeline_mode<synchronous>, transform_indices = @transform_2, window_bounds = array<i64: 1, 1024>}, {pipeline_mode = #tpu.pipeline_mode<synchronous>, transform_indices = @transform_3, window_bounds = array<i64: 1, 1024>}, {transform_indices = @transform_4, window_bounds = array<i64: 2, 1024>}]} {
    %c0 = arith.constant 0 : index
    %c0_0 = arith.constant 0 : index
    %0 = vector.load %arg1[%c0, %c0_0] : memref<2x1024xf32, #tpu.memory_space<vmem>>, vector<2x1024xf32>
    %c0_1 = arith.constant 0 : index
    %c0_2 = arith.constant 0 : index
    %1 = vector.load %arg3[%c0_1, %c0_2] : memref<1x1024xf32, #tpu.memory_space<vmem>>, vector<1x1024xf32>
    %2 = vector.broadcast %1 : vector<1x1024xf32> to vector<2x1024xf32>
    %3 = arith.mulf %0, %2 : vector<2x1024xf32>
    %c0_3 = arith.constant 0 : index
    %c0_4 = arith.constant 0 : index
    %4 = vector.load %arg4[%c0_3, %c0_4] : memref<1x1024xf32, #tpu.memory_space<vmem>>, vector<1x1024xf32>
    %5 = vector.broadcast %4 : vector<1x1024xf32> to vector<2x1024xf32>
    %6 = arith.addf %3, %5 : vector<2x1024xf32>
    %c0_5 = arith.constant 0 : index
    %c0_6 = arith.constant 0 : index
    %7 = vector.load %arg2[%c0_5, %c0_6] : memref<2x1024xf32, #tpu.memory_space<vmem>>, vector<2x1024xf32>
    %8 = arith.addf %6, %7 : vector<2x1024xf32>
    %cst = arith.constant 0.000000e+00 : f32
    %9 = vector.broadcast %cst : f32 to vector<2x1024xf32>
    %10 = arith.maximumf %8, %9 : vector<2x1024xf32>
    %c0_7 = arith.constant 0 : index
    %c0_8 = arith.constant 0 : index
    %11 = vector.load %arg5[%c0_7, %c0_8] : memref<2x1024xf32, #tpu.memory_space<vmem>>, vector<2x1024xf32>
    tpu.vector_store %arg5[%c0_7, %c0_8], %10 {strides = array<i32>} : memref<2x1024xf32, #tpu.memory_space<vmem>>, vector<2x1024xf32>,
    return
  }
  func.func @transform_0(%arg0: i32) -> (i32, i32) {
    %c0_i32 = arith.constant 0 : i32
    %c0_i32_0 = arith.constant 0 : i32
    return %arg0, %c0_i32 : i32, i32
  }
  func.func @transform_1(%arg0: i32) -> (i32, i32) {
    %c0_i32 = arith.constant 0 : i32
    %c0_i32_0 = arith.constant 0 : i32
    return %arg0, %c0_i32 : i32, i32
  }
  func.func @transform_2(%arg0: i32) -> (i32, i32) {
    %c0_i32 = arith.constant 0 : i32
    %c0_i32_0 = arith.constant 0 : i32
    %c0_i32_1 = arith.constant 0 : i32
    return %c0_i32, %c0_i32_0 : i32, i32
  }
  func.func @transform_3(%arg0: i32) -> (i32, i32) {
    %c0_i32 = arith.constant 0 : i32
    %c0_i32_0 = arith.constant 0 : i32
    %c0_i32_1 = arith.constant 0 : i32
    return %c0_i32, %c0_i32_0 : i32, i32
  }
  func.func @transform_4(%arg0: i32) -> (i32, i32) {
    %c0_i32 = arith.constant 0 : i32
    %c0_i32_0 = arith.constant 0 : i32
    return %arg0, %c0_i32 : i32, i32
  }
}

</mosaic_0001>

<bundles_post_ra>
// kernel: straight_basic_block.5
= control target key start
LH: loop header
LB: loop body
LE: loop exit
PB: predicated region body
PF: predicated region fallthrough
CT: control target
= control target key end

     0   :  { %v21_v0 = vlaneseq  ;;  %v176_v1 = vmov 1983009808   ;;  %s226_s2 = inlined_call_operand.vmem [shape: f32[1,1024], index: 2, kind: input, shape index: {}]   ;;  %s227_s3 = inlined_call_operand.vmem [shape: f32[1,1024], index: 3, kind: input, shape index: {}]   ;;  %s228_s0 = inlined_call_operand.vmem [shape: f32[2,1024], index: 0, kind: input, shape index: {}]   ;;  %s229_s1 = inlined_call_operand.vmem [shape: f32[2,1024], index: 1, kind: input, shape index: {}]   ;;  %s230_s4 = inlined_call_operand.vmem [shape: f32[2,1024], index: 4, kind: output, shape index: {}]  }
   0x1   :  { %v56_v2 = vunpack.c.l.s4 %v176_v1  ;;  %v19_v4 = vld [vmem:[%s226_s2] sm:$0xff]  ;;  %v18_v53 = vld [vmem:[%s228_s0 + $0x8] sm:$0xff] }
   0x2   :  { %v22_v3 = vshrl.u32 %v21_v0, 7  ;;  %v91_v10 = vld [vmem:[%s227_s3] sm:$0xff]  ;;  %v164_v60 = vld [vmem:[%s229_s1 + $0x8] sm:$0xff] }
   0x3   :  { %v57_v5 = vunpack.c.0.s8 %v56_v2  ;;  %v17_v35 = vld [vmem:[%s228_s0] sm:$0xff] }
   0x4   :  { %v23_v6 = vsub.s32 0, %v22_v3  ;;  %v27_v7 = vsub.s32 1, %v22_v3  ;;  %v31_v8 = vsub.s32 2, %v22_v3  ;;  %v35_v9 = vsub.s32 3, %v22_v3  ;;  %v163_v49 = vld [vmem:[%s229_s1] sm:$0xff] }
   0x5   :  { %v60_v11 = vsub.s32 %v57_v5, %v22_v3  ;;  %v39_v12 = vsub.s32 4, %v22_v3  ;;  %v43_v13 = vsub.s32 5, %v22_v3  ;;  %v47_v14 = vsub.s32 6, %v22_v3 }
   0x6   :  { %v24_v15 = vrot.slane %v19_v4, %v23_v6  ;;  %v28_v16 = vrot.slane %v19_v4, %v27_v7  ;;  %v32_v17 = vrot.slane %v19_v4, %v31_v8  ;;  %v36_v18 = vrot.slane %v19_v4, %v35_v9 }
   0x7   :  { %v96_v19 = vrot.slane %v91_v10, %v23_v6  ;;  %v100_v20 = vrot.slane %v91_v10, %v27_v7  ;;  %v104_v21 = vrot.slane %v91_v10, %v31_v8  ;;  %v108_v22 = vrot.slane %v91_v10, %v35_v9 }
   0x8   :  { %v53_v23 = vcombine.low %v24_v15, %v28_v16  ;;  %v54_v24 = vcombine.low %v32_v17, %v36_v18  ;;  %v40_v25 = vrot.slane %v19_v4, %v39_v12  ;;  %v44_v26 = vrot.slane %v19_v4, %v43_v13 }
   0x9   :  { %v125_v27 = vcombine.low %v96_v19, %v100_v20  ;;  %v126_v28 = vcombine.low %v104_v21, %v108_v22  ;;  %v48_v29 = vrot.slane %v19_v4, %v47_v14  ;;  %v51_v30 = vsub.s32 7, %v22_v3 }
   0xa   :  { %v61_v31 = vrot.slane %v53_v23, %v60_v11  ;;  %v68_v32 = vrot.slane %v54_v24, %v60_v11  ;;  %v70_v33 = vcombine.low %v40_v25, %v44_v26  ;;  %v112_v34 = vrot.slane %v91_v10, %v39_v12 }
   0xb   :  { %v133_v36 = vrot.slane %v125_v27, %v60_v11  ;;  %v140_v37 = vrot.slane %v126_v28, %v60_v11  ;;  %v52_v38 = vrot.slane %v19_v4, %v51_v30  ;;  %v116_v39 = vrot.slane %v91_v10, %v43_v13 }
   0xc   :  { %v69_v40 = vcombine.low %v61_v31, %v68_v32  ;;  %v120_v41 = vrot.slane %v91_v10, %v47_v14  ;;  %v124_v42 = vrot.slane %v91_v10, %v51_v30  ;;  %v78_v45 = vrot.slane %v70_v33, %v60_v11 }
   0xd   :  { %v141_v43 = vcombine.low %v133_v36, %v140_v37  ;;  %v71_v44 = vcombine.low %v48_v29, %v52_v38  ;;  %v142_v46 = vcombine.low %v112_v34, %v116_v39 }
   0xe   :  { %v89_v47 = vmul.f32 %v69_v40, %v17_v35  ;;  %v143_v48 = vcombine.low %v120_v41, %v124_v42 }
   0xf   :  { %v85_v50 = vrot.slane %v71_v44, %v60_v11  ;;  %v150_v51 = vrot.slane %v142_v46, %v60_v11 }
  0x10   :  { %v161_v52 = vadd.f32 %v141_v43, %v89_v47  ;;  %v157_v54 = vrot.slane %v143_v48, %v60_v11 }
  0x11   :  { %v86_v55 = vcombine.low %v78_v45, %v85_v50 }
  0x12   :  { %v165_v56 = vadd.f32 %v163_v49, %v161_v52  ;;  %v158_v57 = vcombine.low %v150_v51, %v157_v54 }
  0x13   :  { %v90_v58 = vmul.f32 %v86_v55, %v18_v53 }
  0x14   :  { %v167_v59 = vmax.f32 %v165_v56, 0.0 }
  0x15   :  { %v162_v61 = vadd.f32 %v158_v57, %v90_v58 }
  0x16   :  { %169 = vst [vmem:[%s230_s4] sm:$0xff] %v167_v59 }
  0x17   :  { %v166_v62 = vadd.f32 %v164_v60, %v162_v61 }
  0x19   :  { %v168_v63 = vmax.f32 %v166_v62, 0.0 }
  0x1b   :  { %170 = vst [vmem:[%s230_s4 + $0x8] sm:$0xff] %v168_v63 }

// kernel: straight_basic_block.3
= control target key start
LH: loop header
LB: loop body
LE: loop exit
PB: predicated region body
PF: predicated region fallthrough
CT: control target
= control target key end

     0   :  { %s2977_s18 = smov 0   ;;  %s2979_s19 = smov 0   ;;  %s3982_s0 = inlined_call_operand.vmem [shape: f32[2,16,16,4], index: 0, kind: input, shape index: {}, may-alias: {0,1,2}]   ;;  %s3983_s1 = inlined_call_operand.vmem [shape: f32[2,16,16,4], index: 1, kind: input, shape index: {}, may-alias: {0,1,2}]   ;;  %s3984_s2 = inlined_call_operand.vmem [shape: f32[2,16,16,4], index: 2, kind: input, shape index: {}, may-alias: {0,1,2}]   ;;  %s3985_s3 = inlined_call_operand.vmem [shape: f32[3,12,4], index: 3, kind: input, shape index: {}]   ;;  %s3986_s4 = inlined_call_operand.vmem [shape: f32[2,16,16,4], index: 4, kind: output, shape index: {0}]   ;;  %s3987_s5 = inlined_call_operand.vmem [shape: f32[2,1,2,4], index: 5, kind: output, shape index: {1}]  }
   0x1   :  { %s2981_s20 = smov 0  }
   0x2 LB: > { %s28_s21 = sadd.s32 1, %s2937_s19  ;;  %p2428_p0 = scmp.ge.s32.totalorder %s2941_s20, 1  ;;  %s2941_s20 = sphi %s2981_s20, %s16_s20   ;;  %s2937_s19 = sphi %s2979_s19, %s3991_s19   ;;  %s2933_s18 = sphi %s2977_s18, %s3990_s18  }
   0x3   : > { %p30_p1 = scmp.ge.s32.totalorder %s28_s21, 2  ;;  %p278_p2 = scmp.lt.s32.totalorder %s2941_s20, 3 }
   0x5   : > { %s3993_s21 = smov (%p30_p1, %s28_s21), 0  ;;  %p279_p3 = pnand %p2428_p0, %p278_p2 }
   0x6   : > { %p350_p4 = scmp.lt.s32.totalorder (!%p279_p3), %s2933_s18, 1  ;;  %vm455_vm0 = vcmask (!%p279_p3), 31744   ;;  %vm530_vm1 = vcmask (!%p279_p3), 57376   ;;  %s2943_s29 = smov (!%p279_p3), 8   ;;  %v2944_v28 = vmov (!%p279_p3), 0.0   ;;  %vm1062_vm2 = vcmask (!%p279_p3), 1043456  }
   0x7   : > { %282 = sbr.rel (%p279_p3) target bundleno = 636 (0x27c), region = 36  ;;  %s2945_s30 = smov (!%p279_p3), 4   ;;  %v2438_v51 = vld [vmem:[%s3985_s3 + $0x10] sm:$0xff] (!%p279_p3)  ;;  %v2439_v52 = vld [vmem:[%s3985_s3 + $0x18] sm:$0xf] (!%p279_p3)  ;;  %vm2946_vm3 = vmmov (!%p279_p3), 1  }
   0x8   : > { %v2807_v53 = vpack.c.bf16 (!%p279_p3), %v2439_v52, %v2438_v51  ;;  %vm3134_vm4 = vmpackc.low (!%p279_p3), %vm1062_vm2, %vm2946_vm3  ;;  %v928_v57 = vld [vmem:[%s3985_s3] sm:$0xff] (!%p279_p3)  ;;  %v929_v58 = vld [vmem:[%s3985_s3 + $0x8] sm:$0xf] (!%p279_p3)  ;;  %vm693_vm5 = vcmask (!%p279_p3), 64544   ;;  %vm839_vm6 = vcmask (!%p279_p3), 97345   ;;  %vm695_vm7 = vcmask (!%p279_p3), 63520  }
   0x9   : > { %v3152_v59 = vpack.c.bf16 (!%p279_p3), %v929_v58, %v928_v57  ;;  %vm877_vm8 = vcmask (!%p279_p3), 90176   ;;  %vm841_vm9 = vcmask (!%p279_p3), 97344   ;;  %vm965_vm10 = vcmask (!%p279_p3), 97280  }
   0xa   : > { %2809 = vmatprep.subr.msk.bf16.mxu1 (!%p279_p3), %vm3134_vm4, %v2807_v53  ;;  %vm2242_vm11 = vcmask (!%p279_p3), 24576  }
   0xb   : > { %2812 = vmatpush3.bf16.msk.msra.mxu1 (!%p279_p3), %vm3134_vm4, %v2807_v53  ;;  %2815 = vmatprep.subr.msk.bf16.mxu0 (!%p279_p3), %vm3134_vm4, %v3152_v59 }
   0xc   : > { %2825 = vmatprep.subr.msk.bf16.mxu1 (!%p279_p3), %vm3134_vm4, %v3152_v59  ;;  %2818 = vmatpush3.bf16.msk.msra.mxu0 (!%p279_p3), %vm3134_vm4, %v3152_v59 }
   0xe   : > { %s3995_s18 = smov (!%p350_p4, %s2933_s18), 1 }
   0xf   : > { %s2998_s22 = sshll.u32 %s3995_s18, 8 }
  0x10   : > { %s3004_s25 = scalar_lea.vmem %s3982_s0, %s2998_s22  ;;  %s372_s28 = scalar_lea.vmem %s3983_s1, %s2998_s22 }
  0x11   : > { %v423_v0 = vld [vmem:[%s3004_s25] sm:$0xff]  ;;  %v425_v1 = vld [vmem:[%s3004_s25 + $0x10] sm:$0xff]  ;;  %v424_v2 = vld [vmem:[%s3004_s25 + $0x8] sm:$0xff]  ;;  %s2546_s14 = sadd.s32 240, %s2998_s22 }
  0x12   : > { %459 = vst.msk [vmem:[#allocation2 + $0x10] sm:$0xff] %vm455_vm0, %v423_v0  ;;  %461 = vst.msk [vmem:[#allocation2 + $0x20] sm:$0xff] %vm455_vm0, %v425_v1  ;;  %v414_v3 = vld [vmem:[%s372_s28] sm:$0xff]  ;;  %v415_v4 = vld [vmem:[%s372_s28 + $0x8] sm:$0xff]  ;;  %s389_s17 = scalar_lea.vmem %s3984_s2, %s2546_s14 }
  0x13   : > { %460 = vst.msk [vmem:[#allocation2 + $0x18] sm:$0xff] %vm455_vm0, %v424_v2  ;;  %v426_v5 = vld [vmem:[%s3004_s25 + $0x18] sm:$0xff]  ;;  %v417_v6 = vmul.f32 0.0, %v414_v3  ;;  %v418_v7 = vmul.f32 0.0, %v415_v4  ;;  %v427_v8 = vld [vmem:[%s3004_s25 + $0x20] sm:$0xff]  ;;  %v428_v9 = vld [vmem:[%s3004_s25 + $0x28] sm:$0xff] }
  0x14   : > { %462 = vst.msk [vmem:[#allocation2 + $0x28] sm:$0xff] %vm455_vm0, %v426_v5  ;;  %v429_v10 = vld [vmem:[%s3004_s25 + $0x30] sm:$0xff]  ;;  %463 = vst.msk [vmem:[#allocation2 + $0x30] sm:$0xff] %vm455_vm0, %v427_v8  ;;  %v430_v11 = vld [vmem:[%s3004_s25 + $0x38] sm:$0xff] }
  0x15   : > { %464 = vst.msk [vmem:[#allocation2 + $0x38] sm:$0xff] %vm455_vm0, %v428_v9  ;;  %465 = vst.msk [vmem:[#allocation2 + $0x40] sm:$0xff] %vm455_vm0, %v429_v10  ;;  %v431_v12 = vld [vmem:[%s3004_s25 + $0x40] sm:$0xff]  ;;  %v432_v13 = vld [vmem:[%s3004_s25 + $0x48] sm:$0xff] }
  0x16   : > { %456 = vst.msk [vmem:[#allocation2] sm:$0xff] %vm455_vm0, %v417_v6  ;;  %457 = vst.msk [vmem:[#allocation2 + $0x8] sm:$0xff] %vm455_vm0, %v418_v7  ;;  %v433_v14 = vld [vmem:[%s3004_s25 + $0x50] sm:$0xff]  ;;  %v434_v15 = vld [vmem:[%s3004_s25 + $0x58] sm:$0xff] }
  0x17   : > { %466 = vst.msk [vmem:[#allocation2 + $0x48] sm:$0xff] %vm455_vm0, %v430_v11  ;;  %467 = vst.msk [vmem:[#allocation2 + $0x50] sm:$0xff] %vm455_vm0, %v431_v12  ;;  %v435_v16 = vld [vmem:[%s3004_s25 + $0x60] sm:$0xff]  ;;  %v436_v17 = vld [vmem:[%s3004_s25 + $0x68] sm:$0xff] }
  0x18   : > { %468 = vst.msk [vmem:[#allocation2 + $0x58] sm:$0xff] %vm455_vm0, %v432_v13  ;;  %469 = vst.msk [vmem:[#allocation2 + $0x60] sm:$0xff] %vm455_vm0, %v433_v14  ;;  %v437_v18 = vld [vmem:[%s3004_s25 + $0x70] sm:$0xff]  ;;  %v438_v19 = vld [vmem:[%s3004_s25 + $0x78] sm:$0xff] }
  0x19   : > { %470 = vst.msk [vmem:[#allocation2 + $0x68] sm:$0xff] %vm455_vm0, %v434_v15  ;;  %471 = vst.msk [vmem:[#allocation2 + $0x70] sm:$0xff] %vm455_vm0, %v435_v16  ;;  %v439_v20 = vld [vmem:[%s3004_s25 + $0x80] sm:$0xff]  ;;  %v440_v21 = vld [vmem:[%s3004_s25 + $0x88] sm:$0xff] }
  0x1a   : > { %472 = vst.msk [vmem:[#allocation2 + $0x78] sm:$0xff] %vm455_vm0, %v436_v17  ;;  %473 = vst.msk [vmem:[#allocation2 + $0x80] sm:$0xff] %vm455_vm0, %v437_v18  ;;  %v441_v22 = vld [vmem:[%s3004_s25 + $0x90] sm:$0xff]  ;;  %v442_v23 = vld [vmem:[%s3004_s25 + $0x98] sm:$0xff] }
  0x1b   : > { %474 = vst.msk [vmem:[#allocation2 + $0x88] sm:$0xff] %vm455_vm0, %v438_v19  ;;  %475 = vst.msk [vmem:[#allocation2 + $0x90] sm:$0xff] %vm455_vm0, %v439_v20  ;;  %v443_v24 = vld [vmem:[%s3004_s25 + $0xa0] sm:$0xff]  ;;  %v444_v25 = vld [vmem:[%s3004_s25 + $0xa8] sm:$0xff] }
  0x1c   : > { %476 = vst.msk [vmem:[#allocation2 + $0x98] sm:$0xff] %vm455_vm0, %v440_v21  ;;  %477 = vst.msk [vmem:[#allocation2 + $0xa0] sm:$0xff] %vm455_vm0, %v441_v22  ;;  %v496_v26 = vld [vmem:[#allocation2 + $0x10] sm:$0xff]  ;;  %v3053_v27 = vld [vmem:[#allocation2 + $0x20] sm:$0xff] }
  0x1d   : > { %478 = vst.msk [vmem:[#allocation2 + $0xa8] sm:$0xff] %vm455_vm0, %v442_v23  ;;  %479 = vst.msk [vmem:[#allocation2 + $0xb0] sm:$0xff] %vm455_vm0, %v443_v24  ;;  %735 = vrot.lane.b32.xlu0 %v496_v26, %s2943_s29  ;;  %589 = vrot.lane.b32.xlu1 %v496_v26, %s2945_s30  ;;  %v445_v29 = vld [vmem:[%s3004_s25 + $0xb0] sm:$0xff]  ;;  %v446_v30 = vld [vmem:[%s3004_s25 + $0xb8] sm:$0xff] }
  0x1e   : > { %480 = vst.msk [vmem:[#allocation2 + $0xb8] sm:$0xff] %vm455_vm0, %v444_v25  ;;  %v497_v31 = vld [vmem:[#allocation2 + $0x18] sm:$0xff]  ;;  %v3066_v32 = vld [vmem:[#allocation2 + $0x30] sm:$0xff]  ;;  %v3068_v33 = vld [vmem:[#allocation2 + $0x40] sm:$0xff] }
  0x1f   : > { %532 = vst.msk [vmem:[#allocation2 + $0x10] sm:$0x1] %vm530_vm1, %v2944_v28  ;;  %533 = vst.msk [vmem:[#allocation2 + $0x20] sm:$0x1] %vm530_vm1, %v2944_v28  ;;  %v494_v34 = vld [vmem:[#allocation2] sm:$0xff]  ;;  %v3078_v35 = vld [vmem:[#allocation2 + $0x50] sm:$0xff] }
  0x20   : > { %481 = vst.msk [vmem:[#allocation2 + $0xc0] sm:$0xff] %vm455_vm0, %v445_v29  ;;  %482 = vst.msk [vmem:[#allocation2 + $0xc8] sm:$0xff] %vm455_vm0, %v446_v30  ;;  %v3080_v36 = vld [vmem:[#allocation2 + $0x60] sm:$0xff]  ;;  %v3089_v37 = vld [vmem:[#allocation2 + $0x70] sm:$0xff] }
  0x21   : > { %534 = vst.msk [vmem:[#allocation2 + $0x30] sm:$0x1] %vm530_vm1, %v2944_v28  ;;  %535 = vst.msk [vmem:[#allocation2 + $0x40] sm:$0x1] %vm530_vm1, %v2944_v28  ;;  %593 = vrot.lane.b32.xlu0 %v3053_v27, %s2945_s30  ;;  %591 = vrot.lane.b32.xlu1 %v497_v31, %s2945_s30  ;;  %v3093_v38 = vld [vmem:[#allocation2 + $0x80] sm:$0xff]  ;;  %v499_v41 = vld [vmem:[#allocation2 + $0x28] sm:$0xff] }
  0x22   : > { %531 = vst.msk [vmem:[#allocation2] sm:$0x1] %vm530_vm1, %v2944_v28  ;;  %536 = vst.msk [vmem:[#allocation2 + $0x50] sm:$0x1] %vm530_vm1, %v2944_v28  ;;  %v3095_v39 = vld [vmem:[#allocation2 + $0x90] sm:$0xff]  ;;  %v447_v43 = vld [vmem:[%s3004_s25 + $0xc0] sm:$0xff] }
  0x23   : > { %537 = vst.msk [vmem:[#allocation2 + $0x60] sm:$0x1] %vm530_vm1, %v2944_v28  ;;  %538 = vst.msk [vmem:[#allocation2 + $0x70] sm:$0x1] %vm530_vm1, %v2944_v28  ;;  %v3101_v40 = vld [vmem:[#allocation2 + $0xa0] sm:$0xff]  ;;  %v495_v44 = vld [vmem:[#allocation2 + $0x8] sm:$0xff] }
  0x24   : > { %539 = vst.msk [vmem:[#allocation2 + $0x80] sm:$0x1] %vm530_vm1, %v2944_v28  ;;  %540 = vst.msk [vmem:[#allocation2 + $0x90] sm:$0x1] %vm530_vm1, %v2944_v28  ;;  %v3105_v42 = vld [vmem:[#allocation2 + $0xb0] sm:$0xff]  ;;  %v448_v46 = vld [vmem:[%s3004_s25 + $0xc8] sm:$0xff] }
  0x25   : > { %541 = vst.msk [vmem:[#allocation2 + $0xa0] sm:$0x1] %vm530_vm1, %v2944_v28  ;;  %585 = vrot.lane.b32.xlu0 %v494_v34, %s2945_s30  ;;  %737 = vrot.lane.b32.xlu1 %v497_v31, %s2943_s29  ;;  %542 = vst.msk [vmem:[#allocation2 + $0xb0] sm:$0x1] %vm530_vm1, %v2944_v28  ;;  %v449_v47 = vld [vmem:[%s3004_s25 + $0xd0] sm:$0xff]  ;;  %v450_v48 = vld [vmem:[%s3004_s25 + $0xd8] sm:$0xff] }
  0x26   : > { %483 = vst.msk [vmem:[#allocation2 + $0xd0] sm:$0xff] %vm455_vm0, %v447_v43  ;;  %484 = vst.msk [vmem:[#allocation2 + $0xd8] sm:$0xff] %vm455_vm0, %v448_v46  ;;  %v451_v49 = vld [vmem:[%s3004_s25 + $0xe0] sm:$0xff]  ;;  %v452_v50 = vld [vmem:[%s3004_s25 + $0xe8] sm:$0xff] }
  0x27   : > { %v3112_v45 = vld [vmem:[#allocation2 + $0xc0] sm:$0xff]  ;;  %485 = vst.msk [vmem:[#allocation2 + $0xe0] sm:$0xff] %vm455_vm0, %v449_v47  ;;  %486 = vst.msk [vmem:[#allocation2 + $0xe8] sm:$0xff] %vm455_vm0, %v450_v48  ;;  %v453_v55 = vld [vmem:[%s3004_s25 + $0xf0] sm:$0xff] }
  0x28   : > { %543 = vst.msk [vmem:[#allocation2 + $0xc0] sm:$0x1] %vm530_vm1, %v2944_v28  ;;  %v454_v56 = vld [vmem:[%s3004_s25 + $0xf8] sm:$0xff]  ;;  %v419_v0 = vld [vmem:[%s389_s17] sm:$0xff]  ;;  %v420_v1 = vld [vmem:[%s389_s17 + $0x8] sm:$0xff] }
  0x29   : > { %487 = vst.msk [vmem:[#allocation2 + $0xf0] sm:$0xff] %vm455_vm0, %v451_v49  ;;  %488 = vst.msk [vmem:[#allocation2 + $0xf8] sm:$0xff] %vm455_vm0, %v452_v50  ;;  %587 = vrot.lane.b32.xlu0 %v495_v44, %s2945_s30  ;;  %595 = vrot.lane.b32.xlu1 %v499_v41, %s2945_s30  ;;  %v501_v2 = vld [vmem:[#allocation2 + $0x38] sm:$0xff]  ;;  %v421_v3 = vmul.f32 0.0, %v419_v0  ;;  %v422_v4 = vmul.f32 0.0, %v420_v1  ;;  %v503_v5 = vld [vmem:[#allocation2 + $0x48] sm:$0xff] }
  0x2a   : > { %489 = vst.msk [vmem:[#allocation2 + $0x100] sm:$0xff] %vm455_vm0, %v453_v55  ;;  %490 = vst.msk [vmem:[#allocation2 + $0x108] sm:$0xff] %vm455_vm0, %v454_v56  ;;  %v505_v7 = vld [vmem:[#allocation2 + $0x58] sm:$0xff]  ;;  %v507_v8 = vld [vmem:[#allocation2 + $0x68] sm:$0xff] }
  0x2b   : > { %492 = vst.msk [vmem:[#allocation2 + $0x110] sm:$0xff] %vm455_vm0, %v421_v3  ;;  %493 = vst.msk [vmem:[#allocation2 + $0x118] sm:$0xff] %vm455_vm0, %v422_v4  ;;  %v509_v9 = vld [vmem:[#allocation2 + $0x78] sm:$0xff]  ;;  %v2506_v10 = vld [vmem:[%s3985_s3 + $0x20] sm:$0xff] }
  0x2c   : > { %v2507_v11 = vld [vmem:[%s3985_s3 + $0x28] sm:$0xf]  ;;  %v513_v14 = vld [vmem:[#allocation2 + $0x98] sm:$0xff] }
  0x2d   : > { %v3156_v60 = vld [vmem:[#allocation2 + $0xd0] sm:$0xff]  ;;  %731 = vrot.lane.b32.xlu0 %v494_v34, %s2943_s29  ;;  %733 = vrot.lane.b32.xlu1 %v495_v44, %s2943_s29  ;;  %v3226_v12 = vpack.c.bf16 %v2507_v11, %v2506_v10  ;;  %v511_v13 = vld [vmem:[#allocation2 + $0x88] sm:$0xff]  ;;  %v517_v16 = vld [vmem:[#allocation2 + $0xb8] sm:$0xff] }
  0x2e   : > { %544 = vst.msk [vmem:[#allocation2 + $0xd0] sm:$0x1] %vm530_vm1, %v2944_v28  ;;  %v3168_v61 = vld [vmem:[#allocation2 + $0xe0] sm:$0xff]  ;;  %v515_v15 = vld [vmem:[#allocation2 + $0xa8] sm:$0xff]  ;;  %v521_v18 = vld [vmem:[#allocation2 + $0xd8] sm:$0xff] }
  0x2f   : > { %545 = vst.msk [vmem:[#allocation2 + $0xe0] sm:$0x1] %vm530_vm1, %v2944_v28  ;;  %2821 = vmatprep.subr.msk.bf16.mxu0 %vm3134_vm4, %v3226_v12  ;;  %v519_v17 = vld [vmem:[#allocation2 + $0xc8] sm:$0xff] }
  0x30   : > { %v3170_v62 = vld [vmem:[#allocation2 + $0xf0] sm:$0xff]  ;;  %v523_v19 = vld [vmem:[#allocation2 + $0xe8] sm:$0xff]  ;;  %v525_v22 = vld [vmem:[#allocation2 + $0xf8] sm:$0xff] }
  0x31   : > { %546 = vst.msk [vmem:[#allocation2 + $0xf0] sm:$0x1] %vm530_vm1, %v2944_v28  ;;  %v3180_v63 = vld [vmem:[#allocation2 + $0x100] sm:$0xff]  ;;  %739 = vrot.lane.b32.xlu0 %v3053_v27, %s2943_s29  ;;  %741 = vrot.lane.b32.xlu1 %v499_v41, %s2943_s29  ;;  %v527_v27 = vld [vmem:[#allocation2 + $0x108] sm:$0xff] }
  0x32   : > { %547 = vst.msk [vmem:[#allocation2 + $0x100] sm:$0x1] %vm530_vm1, %v2944_v28  ;;  %v3198_v6 = vld [vmem:[#allocation2 + $0x110] sm:$0xff] }
  0x33   : > { %548 = vst.msk [vmem:[#allocation2 + $0x110] sm:$0x1] %vm530_vm1, %v2944_v28 }
  0x35   : > { %597 = vrot.lane.b32.xlu0 %v3066_v32, %s2945_s30  ;;  %599 = vrot.lane.b32.xlu1 %v501_v2, %s2945_s30 }
  0x39   : > { %743 = vrot.lane.b32.xlu0 %v3066_v32, %s2943_s29  ;;  %745 = vrot.lane.b32.xlu1 %v501_v2, %s2943_s29 }
  0x3d   : > { %601 = vrot.lane.b32.xlu0 %v3068_v33, %s2945_s30  ;;  %603 = vrot.lane.b32.xlu1 %v503_v5, %s2945_s30 }
  0x41   : > { %747 = vrot.lane.b32.xlu0 %v3068_v33, %s2943_s29  ;;  %749 = vrot.lane.b32.xlu1 %v503_v5, %s2943_s29 }
  0x45   : > { %605 = vrot.lane.b32.xlu0 %v3078_v35, %s2945_s30  ;;  %607 = vrot.lane.b32.xlu1 %v505_v7, %s2945_s30 }
  0x49   : > { %751 = vrot.lane.b32.xlu0 %v3078_v35, %s2943_s29  ;;  %753 = vrot.lane.b32.xlu1 %v505_v7, %s2943_s29  ;;  %v529_v35 = vld [vmem:[#allocation2 + $0x118] sm:$0xff] }
  0x4d   : > { %609 = vrot.lane.b32.xlu0 %v3080_v36, %s2945_s30  ;;  %611 = vrot.lane.b32.xlu1 %v507_v8, %s2945_s30 }
  0x51   : > { %755 = vrot.lane.b32.xlu0 %v3080_v36, %s2943_s29  ;;  %757 = vrot.lane.b32.xlu1 %v507_v8, %s2943_s29 }
  0x55   : > { %613 = vrot.lane.b32.xlu0 %v3089_v37, %s2945_s30  ;;  %615 = vrot.lane.b32.xlu1 %v509_v9, %s2945_s30 }
  0x59   : > { %759 = vrot.lane.b32.xlu0 %v3089_v37, %s2943_s29  ;;  %761 = vrot.lane.b32.xlu1 %v509_v9, %s2943_s29 }
  0x5d   : > { %617 = vrot.lane.b32.xlu0 %v3093_v38, %s2945_s30  ;;  %619 = vrot.lane.b32.xlu1 %v511_v13, %s2945_s30 }
  0x61   : > { %763 = vrot.lane.b32.xlu0 %v3093_v38, %s2943_s29  ;;  %765 = vrot.lane.b32.xlu1 %v511_v13, %s2943_s29 }
  0x65   : > { %621 = vrot.lane.b32.xlu0 %v3095_v39, %s2945_s30  ;;  %623 = vrot.lane.b32.xlu1 %v513_v14, %s2945_s30 }
  0x69   : > { %767 = vrot.lane.b32.xlu0 %v3095_v39, %s2943_s29  ;;  %769 = vrot.lane.b32.xlu1 %v513_v14, %s2943_s29 }
  0x6d   : > { %625 = vrot.lane.b32.xlu0 %v3101_v40, %s2945_s30  ;;  %627 = vrot.lane.b32.xlu1 %v515_v15, %s2945_s30 }
  0x71   : > { %771 = vrot.lane.b32.xlu0 %v3101_v40, %s2943_s29  ;;  %773 = vrot.lane.b32.xlu1 %v515_v15, %s2943_s29 }
  0x75   : > { %629 = vrot.lane.b32.xlu0 %v3105_v42, %s2945_s30  ;;  %631 = vrot.lane.b32.xlu1 %v517_v16, %s2945_s30 }
  0x79   : > { %775 = vrot.lane.b32.xlu0 %v3105_v42, %s2943_s29  ;;  %777 = vrot.lane.b32.xlu1 %v517_v16, %s2943_s29 }
  0x7d   : > { %633 = vrot.lane.b32.xlu0 %v3112_v45, %s2945_s30  ;;  %635 = vrot.lane.b32.xlu1 %v519_v17, %s2945_s30 }
  0x81   : > { %779 = vrot.lane.b32.xlu0 %v3112_v45, %s2943_s29  ;;  %781 = vrot.lane.b32.xlu1 %v519_v17, %s2943_s29 }
  0x85   : > { %637 = vrot.lane.b32.xlu0 %v3156_v60, %s2945_s30  ;;  %639 = vrot.lane.b32.xlu1 %v521_v18, %s2945_s30 }
  0x89   : > { %783 = vrot.lane.b32.xlu0 %v3156_v60, %s2943_s29  ;;  %785 = vrot.lane.b32.xlu1 %v521_v18, %s2943_s29 }
  0x8d   : > { %641 = vrot.lane.b32.xlu0 %v3168_v61, %s2945_s30  ;;  %643 = vrot.lane.b32.xlu1 %v523_v19, %s2945_s30 }
  0x8f   : > { %v736_v20 = vpop.permute.xlu0 %735  ;;  %v590_v21 = vpop.permute.xlu1 %589 }
  0x90   : > { %697 = vst.msk [vmem:[#allocation2 + $0x11] sm:$0xff] %vm693_vm5, %v590_v21 }
  0x91   : > { %843 = vst.msk [vmem:[#allocation2 + $0xf] sm:$0xfe] %vm839_vm6, %v736_v20  ;;  %787 = vrot.lane.b32.xlu0 %v3168_v61, %s2943_s29  ;;  %789 = vrot.lane.b32.xlu1 %v523_v19, %s2943_s29 }
  0x93   : > { %v594_v23 = vpop.permute.xlu0 %593  ;;  %v592_v24 = vpop.permute.xlu1 %591 }
  0x94   : > { %699 = vst.msk [vmem:[#allocation2 + $0x21] sm:$0xff] %vm693_vm5, %v594_v23 }
  0x95   : > { %698 = vst.msk [vmem:[#allocation2 + $0x19] sm:$0x7f] %vm695_vm7, %v592_v24  ;;  %645 = vrot.lane.b32.xlu0 %v3170_v62, %s2945_s30  ;;  %647 = vrot.lane.b32.xlu1 %v525_v22, %s2945_s30 }
  0x96   : > { %879 = vst.msk [vmem:[#allocation2 + $0x1f] sm:$0x1] %vm877_vm8, %v2944_v28 }
  0x97   : > { %v586_v25 = vpop.permute.xlu0 %585  ;;  %v738_v26 = vpop.permute.xlu1 %737 }
  0x98   : > { %694 = vst.msk [vmem:[#allocation2 + $0x1] sm:$0xff] %vm693_vm5, %v586_v25 }
  0x99   : > { %844 = vst.msk [vmem:[#allocation2 + $0x17] sm:$0xff] %vm841_vm9, %v738_v26  ;;  %791 = vrot.lane.b32.xlu0 %v3170_v62, %s2943_s29  ;;  %793 = vrot.lane.b32.xlu1 %v525_v22, %s2943_s29 }
  0x9b   : > { %v588_v29 = vpop.permute.xlu0 %587  ;;  %v596_v30 = vpop.permute.xlu1 %595 }
  0x9c   : > { %696 = vst.msk [vmem:[#allocation2 + $0x9] sm:$0x7f] %vm695_vm7, %v588_v29  ;;  %700 = vst.msk [vmem:[#allocation2 + $0x29] sm:$0x7f] %vm695_vm7, %v596_v30 }
  0x9d   : > { %878 = vst.msk [vmem:[#allocation2 + $0xf] sm:$0x1] %vm877_vm8, %v2944_v28  ;;  %880 = vst.msk [vmem:[#allocation2 + $0x2f] sm:$0x1] %vm877_vm8, %v2944_v28  ;;  %649 = vrot.lane.b32.xlu0 %v3180_v63, %s2945_s30  ;;  %651 = vrot.lane.b32.xlu1 %v527_v27, %s2945_s30 }
  0x9f   : > { %v732_v31 = vpop.permute.xlu0 %731  ;;  %v734_v32 = vpop.permute.xlu1 %733 }
  0xa0   : > { %v930_v33 = vld [vmem:[#allocation2 + $0x10] sm:$0xff]  ;;  %v931_v34 = vld [vmem:[#allocation2 + $0x18] sm:$0xff]  ;;  %840 = vst.msk [vmem:[#allocation2 - $0x1] sm:$0xfe] %vm839_vm6, %v732_v31 }
  0xa1   : > { %842 = vst.msk [vmem:[#allocation2 + $0x7] sm:$0xff] %vm841_vm9, %v734_v32  ;;  %2655 = vmatprep.mubr.msk.f32.mxu1 %vm965_vm10, %v930_v33  ;;  %795 = vrot.lane.b32.xlu0 %v3180_v63, %s2943_s29 }
  0xa2   : > { %797 = vrot.lane.b32.xlu1 %v527_v27, %s2943_s29  ;;  %2656 = vmatmul.mubr.msk.f32.vlgmr.msra.gmra.mrb[0].mxu1 %vm965_vm10, %v931_v34 }
  0xa3   : > { %v740_v36 = vpop.permute.xlu0 %739  ;;  %v742_v37 = vpop.permute.xlu1 %741  ;;  %2826 = vmatpush3.bf16.msk.msra.mxu1 %vm3134_vm4, %v3152_v59 }
  0xa4   : > { %845 = vst.msk [vmem:[#allocation2 + $0x1f] sm:$0xfe] %vm839_vm6, %v740_v36 }
  0xa5   : > { %846 = vst.msk [vmem:[#allocation2 + $0x27] sm:$0xff] %vm841_vm9, %v742_v37  ;;  %653 = vrot.lane.b32.xlu0 %v3198_v6, %s2945_s30 }
  0xa6   : > { %655 = vrot.lane.b32.xlu1 %v529_v35, %s2945_s30 }
  0xa7   : > { %v598_v38 = vpop.permute.xlu0 %597  ;;  %v600_v39 = vpop.permute.xlu1 %599 }
  0xa8   : > { %v896_v40 = vld [vmem:[#allocation2] sm:$0xff]  ;;  %v897_v41 = vld [vmem:[#allocation2 + $0x8] sm:$0xff]  ;;  %701 = vst.msk [vmem:[#allocation2 + $0x31] sm:$0xff] %vm693_vm5, %v598_v38 }
  0xa9   : > { %702 = vst.msk [vmem:[#allocation2 + $0x39] sm:$0x7f] %vm695_vm7, %v600_v39  ;;  %2707 = vmatprep.mubr.msk.f32.mxu0 %vm965_vm10, %v896_v40  ;;  %799 = vrot.lane.b32.xlu0 %v3198_v6, %s2943_s29 }
  0xaa   : > { %881 = vst.msk [vmem:[#allocation2 + $0x3f] sm:$0x1] %vm877_vm8, %v2944_v28  ;;  %2708 = vmatmul.mubr.msk.f32.vlgmr.msra.gmra.mrb[0].mxu0 %vm965_vm10, %v897_v41  ;;  %801 = vrot.lane.b32.xlu1 %v529_v35, %s2943_s29  ;;  %s3606_s29 = scalar_lea.vmem %s3986_s4, %s2998_s22  ;;  %s2437_s22 = sshll.u32 %s3995_s18, 1 }
  0xab   : > { %2710 = vmatprep.mubr.msk.f32.mxu0 %vm965_vm10, %v930_v33  ;;  %v744_v42 = vpop.permute.xlu0 %743  ;;  %v746_v43 = vpop.permute.xlu1 %745  ;;  %2824 = vmatpush3.bf16.msk.msra.mxu0 %vm3134_vm4, %v3226_v12  ;;  %s3813_s7 = scalar_lea.vmem %s3987_s5, %s2437_s22 }
  0xac   : > { %v3327_v44 = vld [vmem:[#allocation2 + $0x20] sm:$0xff]  ;;  %v3329_v45 = vld [vmem:[#allocation2 + $0x28] sm:$0xff]  ;;  %847 = vst.msk [vmem:[#allocation2 + $0x2f] sm:$0xfe] %vm839_vm6, %v744_v42 }
  0xad   : > { %848 = vst.msk [vmem:[#allocation2 + $0x37] sm:$0xff] %vm841_vm9, %v746_v43  ;;  %2658 = vmatprep.mubr.msk.f32.mxu1 %vm965_vm10, %v3327_v44 }
  0xae   : > { %2659 = vmatmul.mubr.msk.f32.gmra.mrb[2].mxu1 %vm965_vm10, %v3329_v45  ;;  %2711 = vmatmul.mubr.msk.f32.gmra.mrb[2].mxu0 %vm965_vm10, %v931_v34 }
  0xaf   : > { %2713 = vmatprep.mubr.msk.f32.mxu0 %vm965_vm10, %v3327_v44  ;;  %v602_v46 = vpop.permute.xlu0 %601  ;;  %v604_v47 = vpop.permute.xlu1 %603 }
  0xb0   : > { %703 = vst.msk [vmem:[#allocation2 + $0x41] sm:$0xff] %vm693_vm5, %v602_v46 }
  0xb1   : > { %704 = vst.msk [vmem:[#allocation2 + $0x49] sm:$0x7f] %vm695_vm7, %v604_v47 }
  0xb2   : > { %882 = vst.msk [vmem:[#allocation2 + $0x4f] sm:$0x1] %vm877_vm8, %v2944_v28  ;;  %2714 = vmatmul.mubr.msk.f32.gmra.mrb[4].mxu0 %vm965_vm10, %v3329_v45 }
  0xb3   : > { %v748_v48 = vpop.permute.xlu0 %747  ;;  %v750_v49 = vpop.permute.xlu1 %749 }
  0xb4   : > { %v3349_v50 = vld [vmem:[#allocation2 + $0x30] sm:$0xff]  ;;  %v3351_v51 = vld [vmem:[#allocation2 + $0x38] sm:$0xff]  ;;  %849 = vst.msk [vmem:[#allocation2 + $0x3f] sm:$0xfe] %vm839_vm6, %v748_v48 }
  0xb5   : > { %850 = vst.msk [vmem:[#allocation2 + $0x47] sm:$0xff] %vm841_vm9, %v750_v49  ;;  %2661 = vmatprep.mubr.msk.f32.mxu1 %vm965_vm10, %v3349_v50  ;;  %2716 = vmatprep.mubr.msk.f32.mxu0 %vm965_vm10, %v3349_v50 }
  0xb6   : > { %2662 = vmatmul.mubr.msk.f32.gmra.mrb[4].mxu1 %vm965_vm10, %v3351_v51  ;;  %2717 = vmatmul.mubr.msk.f32.gmra.mrb[6].mxu0 %vm965_vm10, %v3351_v51 }
  0xb7   : > { %v606_v52 = vpop.permute.xlu0 %605  ;;  %v608_v53 = vpop.permute.xlu1 %607 }
  0xb8   : > { %705 = vst.msk [vmem:[#allocation2 + $0x51] sm:$0xff] %vm693_vm5, %v606_v52 }
  0xb9   : > { %706 = vst.msk [vmem:[#allocation2 + $0x59] sm:$0x7f] %vm695_vm7, %v608_v53 }
  0xba   : > { %883 = vst.msk [vmem:[#allocation2 + $0x5f] sm:$0x1] %vm877_vm8, %v2944_v28 }
  0xbb   : > { %v752_v54 = vpop.permute.xlu0 %751  ;;  %v754_v55 = vpop.permute.xlu1 %753 }
  0xbc   : > { %v3367_v56 = vld [vmem:[#allocation2 + $0x40] sm:$0xff]  ;;  %v3369_v57 = vld [vmem:[#allocation2 + $0x48] sm:$0xff]  ;;  %851 = vst.msk [vmem:[#allocation2 + $0x4f] sm:$0xfe] %vm839_vm6, %v752_v54 }
  0xbd   : > { %852 = vst.msk [vmem:[#allocation2 + $0x57] sm:$0xff] %vm841_vm9, %v754_v55  ;;  %2664 = vmatprep.mubr.msk.f32.mxu1 %vm965_vm10, %v3367_v56  ;;  %2719 = vmatprep.mubr.msk.f32.mxu0 %vm965_vm10, %v3367_v56 }
  0xbe   : > { %2665 = vmatmul.mubr.msk.f32.gmra.mrb[6].mxu1 %vm965_vm10, %v3369_v57  ;;  %2720 = vmatmul.mubr.msk.f32.gmra.mrb[8].mxu0 %vm965_vm10, %v3369_v57 }
  0xbf   : > { %v610_v58 = vpop.permute.xlu0 %609  ;;  %v612_v59 = vpop.permute.xlu1 %611 }
  0xc0   : > { %707 = vst.msk [vmem:[#allocation2 + $0x61] sm:$0xff] %vm693_vm5, %v610_v58 }
  0xc1   : > { %708 = vst.msk [vmem:[#allocation2 + $0x69] sm:$0x7f] %vm695_vm7, %v612_v59 }
  0xc2   : > { %884 = vst.msk [vmem:[#allocation2 + $0x6f] sm:$0x1] %vm877_vm8, %v2944_v28 }
  0xc3   : > { %v756_v60 = vpop.permute.xlu0 %755  ;;  %v758_v61 = vpop.permute.xlu1 %757 }
  0xc4   : > { %v938_v62 = vld [vmem:[#allocation2 + $0x50] sm:$0xff]  ;;  %v3385_v63 = vld [vmem:[#allocation2 + $0x58] sm:$0xff]  ;;  %853 = vst.msk [vmem:[#allocation2 + $0x5f] sm:$0xfe] %vm839_vm6, %v756_v60 }
  0xc5   : > { %854 = vst.msk [vmem:[#allocation2 + $0x67] sm:$0xff] %vm841_vm9, %v758_v61  ;;  %2667 = vmatprep.mubr.msk.f32.mxu1 %vm965_vm10, %v938_v62  ;;  %2722 = vmatprep.mubr.msk.f32.mxu0 %vm965_vm10, %v938_v62 }
  0xc6   : > { %2668 = vmatmul.mubr.msk.f32.gmra.mrb[8].mxu1 %vm965_vm10, %v3385_v63  ;;  %2723 = vmatmul.mubr.msk.f32.gmra.mrb[10].mxu0 %vm965_vm10, %v3385_v63 }
  0xc7   : > { %v614_v0 = vpop.permute.xlu0 %613  ;;  %v616_v1 = vpop.permute.xlu1 %615 }
  0xc8   : > { %709 = vst.msk [vmem:[#allocation2 + $0x71] sm:$0xff] %vm693_vm5, %v614_v0 }
  0xc9   : > { %710 = vst.msk [vmem:[#allocation2 + $0x79] sm:$0x7f] %vm695_vm7, %v616_v1 }
  0xca   : > { %885 = vst.msk [vmem:[#allocation2 + $0x7f] sm:$0x1] %vm877_vm8, %v2944_v28 }
  0xcb   : > { %v760_v2 = vpop.permute.xlu0 %759  ;;  %v762_v3 = vpop.permute.xlu1 %761 }
  0xcc   : > { %v940_v4 = vld [vmem:[#allocation2 + $0x60] sm:$0xff]  ;;  %v941_v5 = vld [vmem:[#allocation2 + $0x68] sm:$0xff]  ;;  %855 = vst.msk [vmem:[#allocation2 + $0x6f] sm:$0xfe] %vm839_vm6, %v760_v2 }
  0xcd   : > { %856 = vst.msk [vmem:[#allocation2 + $0x77] sm:$0xff] %vm841_vm9, %v762_v3  ;;  %2670 = vmatprep.mubr.msk.f32.mxu1 %vm965_vm10, %v940_v4  ;;  %2725 = vmatprep.mubr.msk.f32.mxu0 %vm965_vm10, %v940_v4 }
  0xce   : > { %2671 = vmatmul.mubr.msk.f32.gmra.mrb[10].mxu1 %vm965_vm10, %v941_v5  ;;  %2726 = vmatmul.mubr.msk.f32.gmra.mrb[12].mxu0 %vm965_vm10, %v941_v5 }
  0xcf   : > { %v618_v6 = vpop.permute.xlu0 %617  ;;  %v620_v7 = vpop.permute.xlu1 %619 }
  0xd0   : > { %711 = vst.msk [vmem:[#allocation2 + $0x81] sm:$0xff] %vm693_vm5, %v618_v6 }
  0xd1   : > { %712 = vst.msk [vmem:[#allocation2 + $0x89] sm:$0x7f] %vm695_vm7, %v620_v7 }
  0xd2   : > { %886 = vst.msk [vmem:[#allocation2 + $0x8f] sm:$0x1] %vm877_vm8, %v2944_v28 }
  0xd3   : > { %v764_v8 = vpop.permute.xlu0 %763  ;;  %v766_v9 = vpop.permute.xlu1 %765 }
  0xd4   : > { %v942_v10 = vld [vmem:[#allocation2 + $0x70] sm:$0xff]  ;;  %v943_v11 = vld [vmem:[#allocation2 + $0x78] sm:$0xff]  ;;  %857 = vst.msk [vmem:[#allocation2 + $0x7f] sm:$0xfe] %vm839_vm6, %v764_v8 }
  0xd5   : > { %858 = vst.msk [vmem:[#allocation2 + $0x87] sm:$0xff] %vm841_vm9, %v766_v9  ;;  %2673 = vmatprep.mubr.msk.f32.mxu1 %vm965_vm10, %v942_v10  ;;  %2728 = vmatprep.mubr.msk.f32.mxu0 %vm965_vm10, %v942_v10 }
  0xd6   : > { %2674 = vmatmul.mubr.msk.f32.gmra.mrb[12].mxu1 %vm965_vm10, %v943_v11  ;;  %2729 = vmatmul.mubr.msk.f32.gmra.mrb[14].mxu0 %vm965_vm10, %v943_v11 }
  0xd7   : > { %2759 = vmatprep.mubr.msk.f32.mxu0 %vm965_vm10, %v3327_v44  ;;  %v622_v12 = vpop.permute.xlu0 %621  ;;  %v624_v13 = vpop.permute.xlu1 %623 }
  0xd8   : > { %713 = vst.msk [vmem:[#allocation2 + $0x91] sm:$0xff] %vm693_vm5, %v622_v12 }
  0xd9   : > { %714 = vst.msk [vmem:[#allocation2 + $0x99] sm:$0x7f] %vm695_vm7, %v624_v13 }
  0xda   : > { %887 = vst.msk [vmem:[#allocation2 + $0x9f] sm:$0x1] %vm877_vm8, %v2944_v28  ;;  %2760 = vmatmul.mubr.msk.f32.vlgmr.msra.gmra.mrb[0].mxu0 %vm965_vm10, %v3329_v45 }
  0xdb   : > { %2762 = vmatprep.mubr.msk.f32.mxu0 %vm965_vm10, %v3349_v50  ;;  %v768_v14 = vpop.permute.xlu0 %767  ;;  %v770_v15 = vpop.permute.xlu1 %769 }
  0xdc   : > { %v3425_v16 = vld [vmem:[#allocation2 + $0x80] sm:$0xff]  ;;  %v3427_v17 = vld [vmem:[#allocation2 + $0x88] sm:$0xff]  ;;  %859 = vst.msk [vmem:[#allocation2 + $0x8f] sm:$0xfe] %vm839_vm6, %v768_v14 }
  0xdd   : > { %860 = vst.msk [vmem:[#allocation2 + $0x97] sm:$0xff] %vm841_vm9, %v770_v15  ;;  %2676 = vmatprep.mubr.msk.f32.mxu1 %vm965_vm10, %v3425_v16 }
  0xde   : > { %2677 = vmatmul.mubr.msk.f32.gmra.mrb[14].mxu1 %vm965_vm10, %v3427_v17  ;;  %2763 = vmatmul.mubr.msk.f32.gmra.mrb[2].mxu0 %vm965_vm10, %v3351_v51 }
  0xdf   : > { %2765 = vmatprep.mubr.msk.f32.mxu0 %vm965_vm10, %v3367_v56  ;;  %v626_v18 = vpop.permute.xlu0 %625  ;;  %v628_v19 = vpop.permute.xlu1 %627 }
  0xe0   : > { %715 = vst.msk [vmem:[#allocation2 + $0xa1] sm:$0xff] %vm693_vm5, %v626_v18 }
  0xe1   : > { %716 = vst.msk [vmem:[#allocation2 + $0xa9] sm:$0x7f] %vm695_vm7, %v628_v19 }
  0xe2   : > { %888 = vst.msk [vmem:[#allocation2 + $0xaf] sm:$0x1] %vm877_vm8, %v2944_v28  ;;  %2766 = vmatmul.mubr.msk.f32.gmra.mrb[4].mxu0 %vm965_vm10, %v3369_v57 }
  0xe3   : > { %2768 = vmatprep.mubr.msk.f32.mxu0 %vm965_vm10, %v938_v62  ;;  %v772_v20 = vpop.permute.xlu0 %771  ;;  %v774_v21 = vpop.permute.xlu1 %773 }
  0xe4   : > { %v3446_v22 = vld [vmem:[#allocation2 + $0x90] sm:$0xff]  ;;  %v3448_v23 = vld [vmem:[#allocation2 + $0x98] sm:$0xff]  ;;  %861 = vst.msk [vmem:[#allocation2 + $0x9f] sm:$0xfe] %vm839_vm6, %v772_v20 }
  0xe5   : > { %862 = vst.msk [vmem:[#allocation2 + $0xa7] sm:$0xff] %vm841_vm9, %v774_v21  ;;  %2679 = vmatprep.mubr.msk.f32.mxu1 %vm965_vm10, %v3446_v22 }
  0xe6   : > { %2680 = vmatmul.mubr.msk.f32.gmra.mrb[16].mxu1 %vm965_vm10, %v3448_v23  ;;  %2769 = vmatmul.mubr.msk.f32.gmra.mrb[6].mxu0 %vm965_vm10, %v3385_v63 }
  0xe7   : > { %2771 = vmatprep.mubr.msk.f32.mxu0 %vm965_vm10, %v940_v4  ;;  %v630_v24 = vpop.permute.xlu0 %629  ;;  %v632_v25 = vpop.permute.xlu1 %631 }
  0xe8   : > { %717 = vst.msk [vmem:[#allocation2 + $0xb1] sm:$0xff] %vm693_vm5, %v630_v24 }
  0xe9   : > { %718 = vst.msk [vmem:[#allocation2 + $0xb9] sm:$0x7f] %vm695_vm7, %v632_v25 }
  0xea   : > { %889 = vst.msk [vmem:[#allocation2 + $0xbf] sm:$0x1] %vm877_vm8, %v2944_v28  ;;  %2772 = vmatmul.mubr.msk.f32.gmra.mrb[8].mxu0 %vm965_vm10, %v941_v5 }
  0xeb   : > { %2774 = vmatprep.mubr.msk.f32.mxu0 %vm965_vm10, %v942_v10  ;;  %v776_v26 = vpop.permute.xlu0 %775  ;;  %v778_v27 = vpop.permute.xlu1 %777 }
  0xec   : > { %v3465_v29 = vld [vmem:[#allocation2 + $0xa0] sm:$0xff]  ;;  %v3467_v30 = vld [vmem:[#allocation2 + $0xa8] sm:$0xff]  ;;  %863 = vst.msk [vmem:[#allocation2 + $0xaf] sm:$0xfe] %vm839_vm6, %v776_v26 }
  0xed   : > { %864 = vst.msk [vmem:[#allocation2 + $0xb7] sm:$0xff] %vm841_vm9, %v778_v27  ;;  %2682 = vmatprep.mubr.msk.f32.mxu1 %vm965_vm10, %v3465_v29 }
  0xee   : > { %2683 = vmatmul.mubr.msk.f32.gmra.mrb[18].mxu1 %vm965_vm10, %v3467_v30  ;;  %2775 = vmatmul.mubr.msk.f32.gmra.mrb[10].mxu0 %vm965_vm10, %v943_v11 }
  0xef   : > { %2777 = vmatprep.mubr.msk.f32.mxu0 %vm965_vm10, %v3425_v16  ;;  %v634_v31 = vpop.permute.xlu0 %633  ;;  %v636_v32 = vpop.permute.xlu1 %635 }
  0xf0   : > { %719 = vst.msk [vmem:[#allocation2 + $0xc1] sm:$0xff] %vm693_vm5, %v634_v31 }
  0xf1   : > { %720 = vst.msk [vmem:[#allocation2 + $0xc9] sm:$0x7f] %vm695_vm7, %v636_v32 }
  0xf2   : > { %890 = vst.msk [vmem:[#allocation2 + $0xcf] sm:$0x1] %vm877_vm8, %v2944_v28  ;;  %2778 = vmatmul.mubr.msk.f32.gmra.mrb[12].mxu0 %vm965_vm10, %v3427_v17 }
  0xf3   : > { %2780 = vmatprep.mubr.msk.f32.mxu0 %vm965_vm10, %v3446_v22  ;;  %v780_v33 = vpop.permute.xlu0 %779  ;;  %v782_v34 = vpop.permute.xlu1 %781 }
  0xf4   : > { %v3486_v35 = vld [vmem:[#allocation2 + $0xb0] sm:$0xff]  ;;  %v3488_v36 = vld [vmem:[#allocation2 + $0xb8] sm:$0xff]  ;;  %865 = vst.msk [vmem:[#allocation2 + $0xbf] sm:$0xfe] %vm839_vm6, %v780_v33 }
  0xf5   : > { %866 = vst.msk [vmem:[#allocation2 + $0xc7] sm:$0xff] %vm841_vm9, %v782_v34  ;;  %2685 = vmatprep.mubr.msk.f32.mxu1 %vm965_vm10, %v3486_v35 }
  0xf6   : > { %2686 = vmatmul.mubr.msk.f32.gmra.mrb[20].mxu1 %vm965_vm10, %v3488_v36  ;;  %2781 = vmatmul.mubr.msk.f32.gmra.mrb[14].mxu0 %vm965_vm10, %v3448_v23 }
  0xf7   : > { %2783 = vmatprep.mubr.msk.f32.mxu0 %vm965_vm10, %v3465_v29  ;;  %v638_v37 = vpop.permute.xlu0 %637  ;;  %v640_v38 = vpop.permute.xlu1 %639 }
  0xf8   : > { %721 = vst.msk [vmem:[#allocation2 + $0xd1] sm:$0xff] %vm693_vm5, %v638_v37 }
  0xf9   : > { %722 = vst.msk [vmem:[#allocation2 + $0xd9] sm:$0x7f] %vm695_vm7, %v640_v38 }
  0xfa   : > { %891 = vst.msk [vmem:[#allocation2 + $0xdf] sm:$0x1] %vm877_vm8, %v2944_v28  ;;  %2784 = vmatmul.mubr.msk.f32.gmra.mrb[16].mxu0 %vm965_vm10, %v3467_v30 }
  0xfb   : > { %2786 = vmatprep.mubr.msk.f32.mxu0 %vm965_vm10, %v3486_v35  ;;  %v784_v39 = vpop.permute.xlu0 %783  ;;  %v786_v40 = vpop.permute.xlu1 %785 }
  0xfc   : > { %v3508_v41 = vld [vmem:[#allocation2 + $0xc0] sm:$0xff]  ;;  %v3510_v42 = vld [vmem:[#allocation2 + $0xc8] sm:$0xff]  ;;  %867 = vst.msk [vmem:[#allocation2 + $0xcf] sm:$0xfe] %vm839_vm6, %v784_v39 }
  0xfd   : > { %868 = vst.msk [vmem:[#allocation2 + $0xd7] sm:$0xff] %vm841_vm9, %v786_v40  ;;  %2688 = vmatprep.mubr.msk.f32.mxu1 %vm965_vm10, %v3508_v41 }
  0xfe   : > { %2689 = vmatmul.mubr.msk.f32.gmra.mrb[22].mxu1 %vm965_vm10, %v3510_v42  ;;  %2787 = vmatmul.mubr.msk.f32.gmra.mrb[18].mxu0 %vm965_vm10, %v3488_v36 }
  0xff   : > { %2789 = vmatprep.mubr.msk.f32.mxu0 %vm965_vm10, %v3508_v41  ;;  %v642_v43 = vpop.permute.xlu0 %641  ;;  %v644_v44 = vpop.permute.xlu1 %643 }
 0x100   : > { %723 = vst.msk [vmem:[#allocation2 + $0xe1] sm:$0xff] %vm693_vm5, %v642_v43 }
 0x101   : > { %724 = vst.msk [vmem:[#allocation2 + $0xe9] sm:$0x7f] %vm695_vm7, %v644_v44 }
 0x102   : > { %892 = vst.msk [vmem:[#allocation2 + $0xef] sm:$0x1] %vm877_vm8, %v2944_v28  ;;  %2790 = vmatmul.mubr.msk.f32.gmra.mrb[20].mxu0 %vm965_vm10, %v3510_v42 }
 0x103   : > { %v788_v45 = vpop.permute.xlu0 %787  ;;  %v790_v46 = vpop.permute.xlu1 %789 }
 0x104   : > { %v3528_v47 = vld [vmem:[#allocation2 + $0xd0] sm:$0xff]  ;;  %v3530_v48 = vld [vmem:[#allocation2 + $0xd8] sm:$0xff]  ;;  %869 = vst.msk [vmem:[#allocation2 + $0xdf] sm:$0xfe] %vm839_vm6, %v788_v45 }
 0x105   : > { %870 = vst.msk [vmem:[#allocation2 + $0xe7] sm:$0xff] %vm841_vm9, %v790_v46  ;;  %2691 = vmatprep.mubr.msk.f32.mxu1 %vm965_vm10, %v3528_v47  ;;  %2792 = vmatprep.mubr.msk.f32.mxu0 %vm965_vm10, %v3528_v47 }
 0x106   : > { %2692 = vmatmul.mubr.msk.f32.gmra.mrb[24].mxu1 %vm965_vm10, %v3530_v48  ;;  %2793 = vmatmul.mubr.msk.f32.gmra.mrb[22].mxu0 %vm965_vm10, %v3530_v48 }
 0x107   : > { %v646_v49 = vpop.permute.xlu0 %645  ;;  %v648_v50 = vpop.permute.xlu1 %647 }
 0x108   : > { %725 = vst.msk [vmem:[#allocation2 + $0xf1] sm:$0xff] %vm693_vm5, %v646_v49 }
 0x109   : > { %726 = vst.msk [vmem:[#allocation2 + $0xf9] sm:$0x7f] %vm695_vm7, %v648_v50 }
 0x10a   : > { %893 = vst.msk [vmem:[#allocation2 + $0xff] sm:$0x1] %vm877_vm8, %v2944_v28 }
 0x10b   : > { %v792_v51 = vpop.permute.xlu0 %791  ;;  %v794_v52 = vpop.permute.xlu1 %793 }
 0x10c   : > { %v956_v53 = vld [vmem:[#allocation2 + $0xe0] sm:$0xff]  ;;  %v957_v54 = vld [vmem:[#allocation2 + $0xe8] sm:$0xff]  ;;  %871 = vst.msk [vmem:[#allocation2 + $0xef] sm:$0xfe] %vm839_vm6, %v792_v51 }
 0x10d   : > { %872 = vst.msk [vmem:[#allocation2 + $0xf7] sm:$0xff] %vm841_vm9, %v794_v52  ;;  %2694 = vmatprep.mubr.msk.f32.mxu1 %vm965_vm10, %v956_v53  ;;  %2795 = vmatprep.mubr.msk.f32.mxu0 %vm965_vm10, %v956_v53 }
 0x10e   : > { %2695 = vmatmul.mubr.msk.f32.gmra.mrb[26].mxu1 %vm965_vm10, %v957_v54  ;;  %2796 = vmatmul.mubr.msk.f32.gmra.mrb[24].mxu0 %vm965_vm10, %v957_v54 }
 0x10f   : > { %v650_v55 = vpop.permute.xlu0 %649  ;;  %v652_v56 = vpop.permute.xlu1 %651 }
 0x110   : > { %727 = vst.msk [vmem:[#allocation2 + $0x101] sm:$0xff] %vm693_vm5, %v650_v55 }
 0x111   : > { %728 = vst.msk [vmem:[#allocation2 + $0x109] sm:$0x7f] %vm695_vm7, %v652_v56 }
 0x112   : > { %894 = vst.msk [vmem:[#allocation2 + $0x10f] sm:$0x1] %vm877_vm8, %v2944_v28 }
 0x113   : > { %v796_v57 = vpop.permute.xlu0 %795 }
 0x114   : > { %v798_v58 = vpop.permute.xlu1 %797  ;;  %v958_v59 = vld [vmem:[#allocation2 + $0xf0] sm:$0xff]  ;;  %v959_v60 = vld [vmem:[#allocation2 + $0xf8] sm:$0xff]  ;;  %873 = vst.msk [vmem:[#allocation2 + $0xff] sm:$0xfe] %vm839_vm6, %v796_v57 }
 0x115   : > { %874 = vst.msk [vmem:[#allocation2 + $0x107] sm:$0xff] %vm841_vm9, %v798_v58  ;;  %2697 = vmatprep.mubr.msk.f32.mxu1 %vm965_vm10, %v958_v59  ;;  %2798 = vmatprep.mubr.msk.f32.mxu0 %vm965_vm10, %v958_v59 }
 0x116   : > { %2698 = vmatmul.mubr.msk.f32.gmra.mrb[28].mxu1 %vm965_vm10, %v959_v60  ;;  %2799 = vmatmul.mubr.msk.f32.gmra.mrb[26].mxu0 %vm965_vm10, %v959_v60 }
 0x117   : > { %v654_v61 = vpop.permute.xlu0 %653 }
 0x118   : > { %v656_v62 = vpop.permute.xlu1 %655  ;;  %729 = vst.msk [vmem:[#allocation2 + $0x111] sm:$0xff] %vm693_vm5, %v654_v61 }
 0x119   : > { %730 = vst.msk [vmem:[#allocation2 + $0x119] sm:$0x7f] %vm695_vm7, %v656_v62 }
 0x11a   : > { %895 = vst.msk [vmem:[#allocation2 + $0x11f] sm:$0x1] %vm877_vm8, %v2944_v28 }
 0x11b   : > { %v800_v1 = vpop.permute.xlu0 %799 }
 0x11c   : > { %v960_v63 = vld [vmem:[#allocation2 + $0x100] sm:$0xff]  ;;  %v961_v0 = vld [vmem:[#allocation2 + $0x108] sm:$0xff]  ;;  %875 = vst.msk [vmem:[#allocation2 + $0x10f] sm:$0xfe] %vm839_vm6, %v800_v1  ;;  %v802_v2 = vpop.permute.xlu1 %801 }
 0x11d   : > { %2700 = vmatprep.mubr.msk.f32.mxu1 %vm965_vm10, %v960_v63  ;;  %2801 = vmatprep.mubr.msk.f32.mxu0 %vm965_vm10, %v960_v63  ;;  %876 = vst.msk [vmem:[#allocation2 + $0x117] sm:$0xff] %vm841_vm9, %v802_v2 }
 0x11e   : > { %2701 = vmatmul.mubr.msk.f32.gmra.mrb[30].mxu1 %vm965_vm10, %v961_v0  ;;  %2802 = vmatmul.mubr.msk.f32.gmra.mrb[28].mxu0 %vm965_vm10, %v961_v0 }
 0x11f   : > { %2731 = vmatprep.mubr.msk.f32.mxu1 %vm965_vm10, %v3425_v16 }
 0x122   : > { %2732 = vmatmul.mubr.msk.f32.vlgmr.msra.gmra.mrb[16].mxu1 %vm965_vm10, %v3427_v17 }
 0x123   : > { %2734 = vmatprep.mubr.msk.f32.mxu1 %vm965_vm10, %v3446_v22 }
 0x124   : > { %v1646_v28 = vld [vmem:[#allocation2 + $0x110] sm:$0xff]  ;;  %v1647_v3 = vld [vmem:[#allocation2 + $0x118] sm:$0xff] }
 0x125   : > { %2804 = vmatprep.mubr.msk.f32.mxu0 %vm965_vm10, %v1646_v28 }
 0x126   : > { %2735 = vmatmul.mubr.msk.f32.gmra.mrb[18].mxu1 %vm965_vm10, %v3448_v23  ;;  %2805 = vmatmul.mubr.msk.f32.gmra.mrb[30].mxu0 %vm965_vm10, %v1647_v3 }
 0x127   : > { %2737 = vmatprep.mubr.msk.f32.mxu1 %vm965_vm10, %v3465_v29 }
 0x12a   : > { %2738 = vmatmul.mubr.msk.f32.gmra.mrb[20].mxu1 %vm965_vm10, %v3467_v30 }
 0x12b   : > { %2740 = vmatprep.mubr.msk.f32.mxu1 %vm965_vm10, %v3486_v35 }
 0x12e   : > { %2741 = vmatmul.mubr.msk.f32.gmra.mrb[22].mxu1 %vm965_vm10, %v3488_v36 }
 0x12f   : > { %2743 = vmatprep.mubr.msk.f32.mxu1 %vm965_vm10, %v3508_v41 }
 0x132   : > { %2744 = vmatmul.mubr.msk.f32.gmra.mrb[24].mxu1 %vm965_vm10, %v3510_v42 }
 0x133   : > { %2746 = vmatprep.mubr.msk.f32.mxu1 %vm965_vm10, %v3528_v47 }
 0x136   : > { %2747 = vmatmul.mubr.msk.f32.gmra.mrb[26].mxu1 %vm965_vm10, %v3530_v48 }
 0x137   : > { %2749 = vmatprep.mubr.msk.f32.mxu1 %vm965_vm10, %v956_v53 }
 0x13a   : > { %2750 = vmatmul.mubr.msk.f32.gmra.mrb[28].mxu1 %vm965_vm10, %v957_v54 }
 0x13b   : > { %2752 = vmatprep.mubr.msk.f32.mxu1 %vm965_vm10, %v958_v59 }
 0x13e   : > { %2753 = vmatmul.mubr.msk.f32.gmra.mrb[30].mxu1 %vm965_vm10, %v959_v60 }
 0x175   : > { %v2657_v4 = vpop.f32.mrb[0].mxu1 }
 0x176   : > { %v1132_v5 = vpop.f32.mrb[1].mxu1 }
 0x181   : > { %v2660_v6 = vpop.f32.mrb[2].mxu1 }
 0x182   : > { %v1142_v7 = vpop.f32.mrb[3].mxu1 }
 0x189   : > { %v2663_v8 = vpop.f32.mrb[4].mxu1 }
 0x18a   : > { %v1152_v9 = vpop.f32.mrb[5].mxu1 }
 0x191   : > { %v2666_v10 = vpop.f32.mrb[6].mxu1 }
 0x192   : > { %v1162_v11 = vpop.f32.mrb[7].mxu1 }
 0x199   : > { %v2669_v12 = vpop.f32.mrb[8].mxu1 }
 0x19a   : > { %v1172_v13 = vpop.f32.mrb[9].mxu1 }
 0x1a1   : > { %v2672_v14 = vpop.f32.mrb[10].mxu1 }
 0x1a2   : > { %v1182_v15 = vpop.f32.mrb[11].mxu1 }
 0x1a9   : > { %v2675_v16 = vpop.f32.mrb[12].mxu1 }
 0x1aa   : > { %v1192_v17 = vpop.f32.mrb[13].mxu1 }
 0x1ad   : > { %v2761_v18 = vpop.f32.mrb[0].mxu0 }
 0x1ae   : > { %v3608_v19 = vadd.f32 %v2761_v18, %v2657_v4  ;;  %v1816_v20 = vpop.f32.mrb[1].mxu0 }
 0x1af   : > { %v3610_v21 = vadd.f32 %v1816_v20, %v1132_v5 }
 0x1b0   : > { %2008 = vst.msk [vmem:[%s3606_s29 + $0x8] sm:$0xff] %vm455_vm0, %v3608_v19  ;;  %v2040_v40 = vsel %vm455_vm0, %v3608_v19, 0.0 }
 0x1b1   : > { %2007 = vst.msk [vmem:[%s3606_s29] sm:$0xff] %vm455_vm0, %v3610_v21  ;;  %v2678_v22 = vpop.f32.mrb[14].mxu1  ;;  %v2764_v23 = vpop.f32.mrb[2].mxu0  ;;  %v2039_v41 = vsel %vm455_vm0, %v3610_v21, 0.0 }
 0x1b2   : > { %v3618_v24 = vadd.f32 %v2764_v23, %v2660_v6  ;;  %v1202_v25 = vpop.f32.mrb[15].mxu1  ;;  %v1826_v26 = vpop.f32.mrb[3].mxu0  ;;  %v2041_v45 = vadd.f32 %v2040_v40, %v2039_v41 }
 0x1b3   : > { %v3620_v27 = vadd.f32 %v1826_v26, %v1142_v7 }
 0x1b4   : > { %2010 = vst.msk [vmem:[%s3606_s29 + $0x18] sm:$0xff] %vm455_vm0, %v3618_v24  ;;  %v2044_v53 = vsel %vm455_vm0, %v3618_v24, 0.0 }
 0x1b5   : > { %2009 = vst.msk [vmem:[%s3606_s29 + $0x10] sm:$0xff] %vm455_vm0, %v3620_v27  ;;  %v2767_v29 = vpop.f32.mrb[4].mxu0  ;;  %v2042_v43 = vsel %vm455_vm0, %v3620_v27, 0.0 }
 0x1b6   : > { %v3628_v30 = vadd.f32 %v2767_v29, %v2663_v8  ;;  %v1836_v31 = vpop.f32.mrb[5].mxu0  ;;  %v2043_v49 = vadd.f32 %v2042_v43, %v2041_v45 }
 0x1b7   : > { %v3630_v32 = vadd.f32 %v1836_v31, %v1152_v9 }
 0x1b8   : > { %2012 = vst.msk [vmem:[%s3606_s29 + $0x28] sm:$0xff] %vm455_vm0, %v3628_v30  ;;  %v2045_v55 = vadd.f32 %v2044_v53, %v2043_v49  ;;  %v2048_v0 = vsel %vm455_vm0, %v3628_v30, 0.0 }
 0x1b9   : > { %2011 = vst.msk [vmem:[%s3606_s29 + $0x20] sm:$0xff] %vm455_vm0, %v3630_v32  ;;  %v2770_v33 = vpop.f32.mrb[6].mxu0  ;;  %v2046_v56 = vsel %vm455_vm0, %v3630_v32, 0.0 }
 0x1ba   : > { %v3638_v34 = vadd.f32 %v2770_v33, %v2666_v10  ;;  %v1846_v35 = vpop.f32.mrb[7].mxu0  ;;  %v2047_v61 = vadd.f32 %v2046_v56, %v2045_v55 }
 0x1bb   : > { %v3640_v36 = vadd.f32 %v1846_v35, %v1162_v11 }
 0x1bc   : > { %2014 = vst.msk [vmem:[%s3606_s29 + $0x38] sm:$0xff] %vm455_vm0, %v3638_v34  ;;  %v2049_v1 = vadd.f32 %v2048_v0, %v2047_v61  ;;  %v2052_v7 = vsel %vm455_vm0, %v3638_v34, 0.0 }
 0x1bd   : > { %2013 = vst.msk [vmem:[%s3606_s29 + $0x30] sm:$0xff] %vm455_vm0, %v3640_v36  ;;  %v2773_v37 = vpop.f32.mrb[8].mxu0  ;;  %v2050_v2 = vsel %vm455_vm0, %v3640_v36, 0.0 }
 0x1be   : > { %v3648_v38 = vadd.f32 %v2773_v37, %v2669_v12  ;;  %v1856_v39 = vpop.f32.mrb[9].mxu0  ;;  %v2051_v4 = vadd.f32 %v2050_v2, %v2049_v1 }
 0x1bf   : > { %v3654_v42 = vadd.f32 %v1856_v39, %v1172_v13 }
 0x1c0   : > { %2016 = vst.msk [vmem:[%s3606_s29 + $0x48] sm:$0xff] %vm455_vm0, %v3648_v38  ;;  %v2053_v8 = vadd.f32 %v2052_v7, %v2051_v4  ;;  %v2056_v13 = vsel %vm455_vm0, %v3648_v38, 0.0 }
 0x1c1   : > { %2015 = vst.msk [vmem:[%s3606_s29 + $0x40] sm:$0xff] %vm455_vm0, %v3654_v42  ;;  %v2776_v44 = vpop.f32.mrb[10].mxu0  ;;  %v2054_v9 = vsel %vm455_vm0, %v3654_v42, 0.0 }
 0x1c2   : > { %v3664_v46 = vadd.f32 %v2776_v44, %v2672_v14  ;;  %v1866_v47 = vpop.f32.mrb[11].mxu0  ;;  %v2055_v12 = vadd.f32 %v2054_v9, %v2053_v8 }
 0x1c3   : > { %v3666_v48 = vadd.f32 %v1866_v47, %v1182_v15 }
 0x1c4   : > { %2018 = vst.msk [vmem:[%s3606_s29 + $0x58] sm:$0xff] %vm455_vm0, %v3664_v46  ;;  %v2057_v14 = vadd.f32 %v2056_v13, %v2055_v12  ;;  %v2060_v20 = vsel %vm455_vm0, %v3664_v46, 0.0 }
 0x1c5   : > { %2017 = vst.msk [vmem:[%s3606_s29 + $0x50] sm:$0xff] %vm455_vm0, %v3666_v48  ;;  %v2779_v50 = vpop.f32.mrb[12].mxu0  ;;  %v2058_v15 = vsel %vm455_vm0, %v3666_v48, 0.0 }
 0x1c6   : > { %v3674_v51 = vadd.f32 %v2779_v50, %v2675_v16  ;;  %v1876_v52 = vpop.f32.mrb[13].mxu0  ;;  %v2059_v18 = vadd.f32 %v2058_v15, %v2057_v14 }
 0x1c7   : > { %v3678_v54 = vadd.f32 %v1876_v52, %v1192_v17 }
 0x1c8   : > { %2020 = vst.msk [vmem:[%s3606_s29 + $0x68] sm:$0xff] %vm455_vm0, %v3674_v51  ;;  %v2064_v31 = vsel %vm455_vm0, %v3674_v51, 0.0 }
 0x1c9   : > { %2019 = vst.msk [vmem:[%s3606_s29 + $0x60] sm:$0xff] %vm455_vm0, %v3678_v54  ;;  %v2782_v57 = vpop.f32.mrb[14].mxu0  ;;  %v2062_v23 = vsel %vm455_vm0, %v3678_v54, 0.0 }
 0x1ca   : > { %v3688_v58 = vadd.f32 %v2782_v57, %v2678_v22  ;;  %v1886_v59 = vpop.f32.mrb[15].mxu0  ;;  %v2061_v22 = vadd.f32 %v2060_v20, %v2059_v18 }
 0x1cb   : > { %v3690_v60 = vadd.f32 %v1886_v59, %v1202_v25 }
 0x1cc   : > { %2022 = vst.msk [vmem:[%s3606_s29 + $0x78] sm:$0xff] %vm455_vm0, %v3688_v58  ;;  %v2063_v29 = vadd.f32 %v2062_v23, %v2061_v22  ;;  %v2068_v45 = vsel %vm455_vm0, %v3688_v58, 0.0 }
 0x1cd   : > { %2021 = vst.msk [vmem:[%s3606_s29 + $0x70] sm:$0xff] %vm455_vm0, %v3690_v60  ;;  %v2785_v62 = vpop.f32.mrb[16].mxu0  ;;  %v2066_v35 = vsel %vm455_vm0, %v3690_v60, 0.0 }
 0x1ce   : > { %v1896_v63 = vpop.f32.mrb[17].mxu0  ;;  %v2065_v33 = vadd.f32 %v2064_v31, %v2063_v29 }
 0x1d0   : > { %v2067_v40 = vadd.f32 %v2066_v35, %v2065_v33 }
 0x1d1   : > { %v2788_v28 = vpop.f32.mrb[18].mxu0 }
 0x1d2   : > { %v1906_v3 = vpop.f32.mrb[19].mxu0  ;;  %v2069_v49 = vadd.f32 %v2068_v45, %v2067_v40 }
 0x1d5   : > { %v2791_v5 = vpop.f32.mrb[20].mxu0 }
 0x1d6   : > { %v1916_v6 = vpop.f32.mrb[21].mxu0 }
 0x1d9   : > { %v2794_v10 = vpop.f32.mrb[22].mxu0 }
 0x1da   : > { %v1926_v11 = vpop.f32.mrb[23].mxu0 }
 0x1e1   : > { %v2797_v16 = vpop.f32.mrb[24].mxu0 }
 0x1e2   : > { %v1936_v17 = vpop.f32.mrb[25].mxu0 }
 0x1e9   : > { %v2800_v25 = vpop.f32.mrb[26].mxu0 }
 0x1ea   : > { %v3714_v26 = vpop.f32.mrb[27].mxu0 }
 0x1f1   : > { %v3720_v37 = vpop.f32.mrb[28].mxu0 }
 0x1f2   : > { %v3722_v39 = vpop.f32.mrb[29].mxu0 }
 0x1f5   : > { %v2733_v41 = vpop.f32.mrb[16].mxu1 }
 0x1f6   : > { %v3724_v43 = vadd.f32 %v2785_v62, %v2733_v41  ;;  %v1536_v44 = vpop.f32.mrb[17].mxu1 }
 0x1f7   : > { %v3728_v47 = vadd.f32 %v1896_v63, %v1536_v44 }
 0x1f8   : > { %2024 = vst.msk [vmem:[%s3606_s29 + $0x88] sm:$0xff] %vm455_vm0, %v3724_v43  ;;  %v2072_v59 = vsel %vm455_vm0, %v3724_v43, 0.0 }
 0x1f9   : > { %2023 = vst.msk [vmem:[%s3606_s29 + $0x80] sm:$0xff] %vm455_vm0, %v3728_v47  ;;  %v2070_v50 = vsel %vm455_vm0, %v3728_v47, 0.0  ;;  %v2736_v52 = vpop.f32.mrb[18].mxu1  ;;  %v2806_v57 = vpop.f32.mrb[30].mxu0 }
 0x1fa   : > { %v2071_v53 = vadd.f32 %v2070_v50, %v2069_v49  ;;  %v3738_v55 = vadd.f32 %v2788_v28, %v2736_v52  ;;  %v1546_v56 = vpop.f32.mrb[19].mxu1  ;;  %v1966_v62 = vpop.f32.mrb[31].mxu0 }
 0x1fb   : > { %v3742_v61 = vadd.f32 %v1906_v3, %v1546_v56 }
 0x1fc   : > { %2026 = vst.msk [vmem:[%s3606_s29 + $0x98] sm:$0xff] %vm455_vm0, %v3738_v55  ;;  %v2073_v63 = vadd.f32 %v2072_v59, %v2071_v53  ;;  %v2076_v3 = vsel %vm455_vm0, %v3738_v55, 0.0 }
 0x1fd   : > { %2025 = vst.msk [vmem:[%s3606_s29 + $0x90] sm:$0xff] %vm455_vm0, %v3742_v61  ;;  %v2074_v0 = vsel %vm455_vm0, %v3742_v61, 0.0  ;;  %v2739_v1 = vpop.f32.mrb[20].mxu1 }
 0x1fe   : > { %v2075_v2 = vadd.f32 %v2074_v0, %v2073_v63  ;;  %v3752_v28 = vadd.f32 %v2791_v5, %v2739_v1  ;;  %v1556_v4 = vpop.f32.mrb[21].mxu1 }
 0x1ff   : > { %v3756_v7 = vadd.f32 %v1916_v6, %v1556_v4 }
 0x200   : > { %2028 = vst.msk [vmem:[%s3606_s29 + $0xa8] sm:$0xff] %vm455_vm0, %v3752_v28  ;;  %v2077_v8 = vadd.f32 %v2076_v3, %v2075_v2  ;;  %v2080_v6 = vsel %vm455_vm0, %v3752_v28, 0.0 }
 0x201   : > { %2027 = vst.msk [vmem:[%s3606_s29 + $0xa0] sm:$0xff] %vm455_vm0, %v3756_v7  ;;  %v2078_v9 = vsel %vm455_vm0, %v3756_v7, 0.0  ;;  %v2742_v12 = vpop.f32.mrb[22].mxu1 }
 0x202   : > { %v2079_v5 = vadd.f32 %v2078_v9, %v2077_v8  ;;  %v3766_v13 = vadd.f32 %v2794_v10, %v2742_v12  ;;  %v1566_v14 = vpop.f32.mrb[23].mxu1 }
 0x203   : > { %v3770_v15 = vadd.f32 %v1926_v11, %v1566_v14 }
 0x204   : > { %2030 = vst.msk [vmem:[%s3606_s29 + $0xb8] sm:$0xff] %vm455_vm0, %v3766_v13  ;;  %v2081_v18 = vadd.f32 %v2080_v6, %v2079_v5  ;;  %v2084_v11 = vsel %vm455_vm0, %v3766_v13, 0.0 }
 0x205   : > { %2029 = vst.msk [vmem:[%s3606_s29 + $0xb0] sm:$0xff] %vm455_vm0, %v3770_v15  ;;  %v2082_v20 = vsel %vm455_vm0, %v3770_v15, 0.0  ;;  %v2745_v22 = vpop.f32.mrb[24].mxu1 }
 0x206   : > { %v2083_v10 = vadd.f32 %v2082_v20, %v2081_v18  ;;  %v2851_v23 = vadd.f32 %v2797_v16, %v2745_v22  ;;  %v1576_v29 = vpop.f32.mrb[25].mxu1 }
 0x207   : > { %v2852_v31 = vadd.f32 %v1936_v17, %v1576_v29 }
 0x208   : > { %2032 = vst.msk [vmem:[%s3606_s29 + $0xc8] sm:$0xff] %vm455_vm0, %v2851_v23  ;;  %v2085_v33 = vadd.f32 %v2084_v11, %v2083_v10  ;;  %v2088_v16 = vsel %vm455_vm0, %v2851_v23, 0.0 }
 0x209   : > { %2031 = vst.msk [vmem:[%s3606_s29 + $0xc0] sm:$0xff] %vm455_vm0, %v2852_v31  ;;  %v2086_v35 = vsel %vm455_vm0, %v2852_v31, 0.0  ;;  %v2748_v40 = vpop.f32.mrb[26].mxu1 }
 0x20a   : > { %v2087_v41 = vadd.f32 %v2086_v35, %v2085_v33  ;;  %v2853_v44 = vadd.f32 %v2800_v25, %v2748_v40  ;;  %v1586_v45 = vpop.f32.mrb[27].mxu1 }
 0x20b   : > { %v2854_v49 = vadd.f32 %v3714_v26, %v1586_v45 }
 0x20c   : > { %2034 = vst.msk [vmem:[%s3606_s29 + $0xd8] sm:$0xff] %vm455_vm0, %v2853_v44  ;;  %v2089_v17 = vadd.f32 %v2088_v16, %v2087_v41  ;;  %v2092_v59 = vsel %vm455_vm0, %v2853_v44, 0.0 }
 0x20d   : > { %2033 = vst.msk [vmem:[%s3606_s29 + $0xd0] sm:$0xff] %vm455_vm0, %v2854_v49  ;;  %v2090_v50 = vsel %vm455_vm0, %v2854_v49, 0.0  ;;  %v2751_v52 = vpop.f32.mrb[28].mxu1 }
 0x20e   : > { %v2091_v53 = vadd.f32 %v2090_v50, %v2089_v17  ;;  %v2855_v56 = vadd.f32 %v3720_v37, %v2751_v52  ;;  %v1596_v25 = vpop.f32.mrb[29].mxu1 }
 0x20f   : > { %v2856_v63 = vadd.f32 %v3722_v39, %v1596_v25 }
 0x210   : > { %2036 = vst.msk [vmem:[%s3606_s29 + $0xe8] sm:$0xff] %vm455_vm0, %v2855_v56  ;;  %v2093_v26 = vadd.f32 %v2092_v59, %v2091_v53  ;;  %v2096_v37 = vsel %vm455_vm0, %v2855_v56, 0.0 }
 0x211   : > { %2035 = vst.msk [vmem:[%s3606_s29 + $0xe0] sm:$0xff] %vm455_vm0, %v2856_v63  ;;  %v2094_v0 = vsel %vm455_vm0, %v2856_v63, 0.0  ;;  %v2754_v1 = vpop.f32.mrb[30].mxu1 }
 0x212   : > { %v2095_v2 = vadd.f32 %v2094_v0, %v2093_v26  ;;  %v2857_v4 = vadd.f32 %v2806_v57, %v2754_v1  ;;  %v1606_v3 = vpop.f32.mrb[31].mxu1 }
 0x213   : > { %v2858_v8 = vadd.f32 %v1966_v62, %v1606_v3 }
 0x214   : > { %2038 = vst.msk [vmem:[%s3606_s29 + $0xf8] sm:$0xff] %vm455_vm0, %v2857_v4  ;;  %v2097_v9 = vadd.f32 %v2096_v37, %v2095_v2  ;;  %v2100_v5 = vsel %vm455_vm0, %v2857_v4, 0.0 }
 0x215   : > { %2037 = vst.msk [vmem:[%s3606_s29 + $0xf0] sm:$0xff] %vm455_vm0, %v2858_v8  ;;  %v2098_v39 = vsel %vm455_vm0, %v2858_v8, 0.0 }
 0x216   : > { %v2099_v12 = vadd.f32 %v2098_v39, %v2097_v9 }
 0x218   : > { %v2101_v14 = vadd.f32 %v2100_v5, %v2099_v12 }
 0x21a   : > { %v2102_v6 = vrot.slane %v2101_v14, 4 }
 0x21c   : > { %v2103_v18 = vadd.f32 %v2102_v6, %v2101_v14 }
 0x21e   : > { %v2104_v20 = vrot.slane %v2103_v18, 2 }
 0x220   : > { %v2105_v57 = vadd.f32 %v2104_v20, %v2103_v18 }
 0x222   : > { %v2106_v22 = vrot.slane %v2105_v57, 1 }
 0x224   : > { %v2107_v62 = vadd.f32 %v2106_v22, %v2105_v57 }
 0x226   : > { %2243 = vst.msk [vmem:[%s3813_s7] sm:$0x1] %vm2242_vm11, %v2107_v62  ;;  %v3817_v10 = vmul.f32 0.00390625, %v2107_v62 }
 0x228   : > { %v3821_v29 = vsub.f32 %v3728_v47, %v3817_v10  ;;  %v3825_v11 = vsub.f32 %v3724_v43, %v3817_v10  ;;  %v3829_v33 = vsub.f32 %v3742_v61, %v3817_v10  ;;  %v3833_v35 = vsub.f32 %v3738_v55, %v3817_v10 }
 0x229   : > { %v3837_v40 = vsub.f32 %v3756_v7, %v3817_v10  ;;  %v3841_v47 = vsub.f32 %v3752_v28, %v3817_v10  ;;  %v3845_v43 = vsub.f32 %v3770_v15, %v3817_v10  ;;  %v3849_v61 = vsub.f32 %v3766_v13, %v3817_v10 }
 0x22a   : > { %v3852_v41 = vsub.f32 %v2852_v31, %v3817_v10  ;;  %v3855_v55 = vsub.f32 %v2851_v23, %v3817_v10  ;;  %v3858_v7 = vsub.f32 %v2854_v49, %v3817_v10  ;;  %v3861_v28 = vsub.f32 %v2853_v44, %v3817_v10 }
 0x22b   : > { %v3864_v45 = vsub.f32 %v2856_v63, %v3817_v10  ;;  %v3867_v15 = vsub.f32 %v2855_v56, %v3817_v10  ;;  %v3870_v13 = vsub.f32 %v2858_v8, %v3817_v10  ;;  %v3873_v31 = vsub.f32 %v2857_v4, %v3817_v10 }
 0x22c   : > { %v2109_v23 = vsub.f32 %v3610_v21, %v3817_v10  ;;  %v2110_v16 = vsub.f32 %v3608_v19, %v3817_v10  ;;  %v2111_v44 = vsub.f32 %v3620_v27, %v3817_v10  ;;  %v2112_v49 = vsub.f32 %v3618_v24, %v3817_v10 }
 0x22d   : > { %v2113_v52 = vsub.f32 %v3630_v32, %v3817_v10  ;;  %v2114_v56 = vsub.f32 %v3628_v30, %v3817_v10  ;;  %v2115_v27 = vsub.f32 %v3640_v36, %v3817_v10  ;;  %v2116_v32 = vsub.f32 %v3638_v34, %v3817_v10 }
 0x22e   : > { %v2141_v17 = vmul.f32 %v2109_v23, %v2109_v23  ;;  %v2142_v50 = vmul.f32 %v2110_v16, %v2110_v16  ;;  %v2143_v53 = vmul.f32 %v2111_v44, %v2111_v44  ;;  %v2144_v25 = vmul.f32 %v2112_v49, %v2112_v49 }
 0x22f   : > { %v2145_v63 = vmul.f32 %v2113_v52, %v2113_v52  ;;  %v2146_v0 = vmul.f32 %v2114_v56, %v2114_v56  ;;  %v2117_v2 = vsub.f32 %v3654_v42, %v3817_v10  ;;  %v2147_v4 = vmul.f32 %v2115_v27, %v2115_v27 }
 0x230   : > { %v2173_v21 = vsel %vm455_vm0, %v2141_v17, 0.0  ;;  %v2174_v19 = vsel %vm455_vm0, %v2142_v50, 0.0  ;;  %v2176_v24 = vsel %vm455_vm0, %v2143_v53, 0.0  ;;  %v2178_v1 = vsel %vm455_vm0, %v2144_v25, 0.0 }
 0x231   : > { %v2175_v59 = vadd.f32 %v2174_v19, %v2173_v21  ;;  %v2180_v3 = vsel %vm455_vm0, %v2145_v63, 0.0  ;;  %v2118_v36 = vsub.f32 %v3648_v38, %v3817_v10  ;;  %v2148_v8 = vmul.f32 %v2116_v32, %v2116_v32 }
 0x232   : > { %v2182_v9 = vsel %vm455_vm0, %v2146_v0, 0.0  ;;  %v2119_v34 = vsub.f32 %v3666_v48, %v3817_v10  ;;  %v2149_v12 = vmul.f32 %v2117_v2, %v2117_v2  ;;  %v2184_v5 = vsel %vm455_vm0, %v2147_v4, 0.0 }
 0x233   : > { %v2177_v26 = vadd.f32 %v2176_v24, %v2175_v59  ;;  %v2120_v42 = vsub.f32 %v3664_v46, %v3817_v10  ;;  %v2150_v6 = vmul.f32 %v2118_v36, %v2118_v36  ;;  %v2186_v18 = vsel %vm455_vm0, %v2148_v8, 0.0 }
 0x234   : > { %v2121_v38 = vsub.f32 %v3678_v54, %v3817_v10  ;;  %v2151_v57 = vmul.f32 %v2119_v34, %v2119_v34  ;;  %v2188_v22 = vsel %vm455_vm0, %v2149_v12, 0.0  ;;  %v2122_v48 = vsub.f32 %v3674_v51, %v3817_v10 }
 0x235   : > { %v2179_v30 = vadd.f32 %v2178_v1, %v2177_v26  ;;  %v2152_v23 = vmul.f32 %v2120_v42, %v2120_v42  ;;  %v2190_v16 = vsel %vm455_vm0, %v2150_v6, 0.0  ;;  %v2123_v46 = vsub.f32 %v3690_v60, %v3817_v10 }
 0x236   : > { %v2153_v49 = vmul.f32 %v2121_v38, %v2121_v38  ;;  %v2192_v17 = vsel %vm455_vm0, %v2151_v57, 0.0  ;;  %v2124_v54 = vsub.f32 %v3688_v58, %v3817_v10  ;;  %v2154_v52 = vmul.f32 %v2122_v48, %v2122_v48 }
 0x237   : > { %v2181_v37 = vadd.f32 %v2180_v3, %v2179_v30  ;;  %v2194_v53 = vsel %vm455_vm0, %v2152_v23, 0.0  ;;  %v2155_v25 = vmul.f32 %v2123_v46, %v2123_v46  ;;  %v2157_v60 = vmul.f32 %v3821_v29, %v3821_v29 }
 0x238   : > { %v2196_v51 = vsel %vm455_vm0, %v2153_v49, 0.0  ;;  %v2156_v19 = vmul.f32 %v2124_v54, %v2124_v54  ;;  %v2198_v59 = vsel %vm455_vm0, %v2154_v52, 0.0  ;;  %v2158_v58 = vmul.f32 %v3825_v11, %v3825_v11 }
 0x239   : > { %v2183_v39 = vadd.f32 %v2182_v9, %v2181_v37  ;;  %v2200_v63 = vsel %vm455_vm0, %v2155_v25, 0.0  ;;  %v2159_v32 = vmul.f32 %v3829_v33, %v3829_v33  ;;  %v2204_v0 = vsel %vm455_vm0, %v2157_v60, 0.0 }
 0x23a   : > { %v2202_v10 = vsel %vm455_vm0, %v2156_v19, 0.0  ;;  %v2160_v30 = vmul.f32 %v3833_v35, %v3833_v35  ;;  %v2206_v29 = vsel %vm455_vm0, %v2158_v58, 0.0  ;;  %v2161_v4 = vmul.f32 %v3837_v40, %v3837_v40 }
 0x23b   : > { %v2185_v14 = vadd.f32 %v2184_v5, %v2183_v39  ;;  %v2208_v11 = vsel %vm455_vm0, %v2159_v32, 0.0  ;;  %v2162_v37 = vmul.f32 %v3841_v47, %v3841_v47  ;;  %v2163_v8 = vmul.f32 %v3845_v43, %v3845_v43 }
 0x23c   : > { %v2210_v33 = vsel %vm455_vm0, %v2160_v30, 0.0  ;;  %v2212_v35 = vsel %vm455_vm0, %v2161_v4, 0.0  ;;  %v2164_v39 = vmul.f32 %v3849_v61, %v3849_v61  ;;  %v2165_v12 = vmul.f32 %v3852_v41, %v3852_v41 }
 0x23d   : > { %v2187_v20 = vadd.f32 %v2186_v18, %v2185_v14  ;;  %v2214_v40 = vsel %vm455_vm0, %v2162_v37, 0.0  ;;  %v2216_v47 = vsel %vm455_vm0, %v2163_v8, 0.0  ;;  %v2166_v14 = vmul.f32 %v3855_v55, %v3855_v55 }
 0x23e   : > { %v2218_v43 = vsel %vm455_vm0, %v2164_v39, 0.0  ;;  %v2167_v6 = vmul.f32 %v3858_v7, %v3858_v7  ;;  %v2220_v61 = vsel %vm455_vm0, %v2165_v12, 0.0  ;;  %v2169_v57 = vmul.f32 %v3864_v45, %v3864_v45 }
 0x23f   : > { %v2189_v62 = vadd.f32 %v2188_v22, %v2187_v20  ;;  %v2168_v20 = vmul.f32 %v3861_v28, %v3861_v28  ;;  %v2222_v41 = vsel %vm455_vm0, %v2166_v14, 0.0  ;;  %v2171_v23 = vmul.f32 %v3870_v13, %v3870_v13 }
 0x240   : > { %v2224_v55 = vsel %vm455_vm0, %v2167_v6, 0.0  ;;  %v2228_v28 = vsel %vm455_vm0, %v2169_v57, 0.0 }
 0x241   : > { %v2191_v44 = vadd.f32 %v2190_v16, %v2189_v62  ;;  %v2170_v62 = vmul.f32 %v3867_v15, %v3867_v15  ;;  %v2226_v7 = vsel %vm455_vm0, %v2168_v20, 0.0  ;;  %v2232_v49 = vsel %vm455_vm0, %v2171_v23, 0.0 }
 0x243   : > { %v2193_v50 = vadd.f32 %v2192_v17, %v2191_v44  ;;  %v2172_v44 = vmul.f32 %v3873_v31, %v3873_v31  ;;  %v2230_v45 = vsel %vm455_vm0, %v2170_v62, 0.0 }
 0x245   : > { %v2195_v56 = vadd.f32 %v2194_v53, %v2193_v50  ;;  %v2234_v15 = vsel %vm455_vm0, %v2172_v44, 0.0 }
 0x247   : > { %v2197_v21 = vadd.f32 %v2196_v51, %v2195_v56 }
 0x249   : > { %v2199_v27 = vadd.f32 %v2198_v59, %v2197_v21 }
 0x24b   : > { %v2201_v24 = vadd.f32 %v2200_v63, %v2199_v27 }
 0x24d   : > { %v2203_v26 = vadd.f32 %v2202_v10, %v2201_v24 }
 0x24f   : > { %v2205_v1 = vadd.f32 %v2204_v0, %v2203_v26 }
 0x251   : > { %v2207_v2 = vadd.f32 %v2206_v29, %v2205_v1 }
 0x253   : > { %v2209_v3 = vadd.f32 %v2208_v11, %v2207_v2 }
 0x255   : > { %v2211_v36 = vadd.f32 %v2210_v33, %v2209_v3 }
 0x257   : > { %v2213_v9 = vadd.f32 %v2212_v35, %v2211_v36 }
 0x259   : > { %v2215_v34 = vadd.f32 %v2214_v40, %v2213_v9 }
 0x25b   : > { %v2217_v5 = vadd.f32 %v2216_v47, %v2215_v34 }
 0x25d   : > { %v2219_v42 = vadd.f32 %v2218_v43, %v2217_v5 }
 0x25f   : > { %v2221_v18 = vadd.f32 %v2220_v61, %v2219_v42 }
 0x261   : > { %v2223_v38 = vadd.f32 %v2222_v41, %v2221_v18 }
 0x263   : > { %v2225_v22 = vadd.f32 %v2224_v55, %v2223_v38 }
 0x265   : > { %v2227_v48 = vadd.f32 %v2226_v7, %v2225_v22 }
 0x267   : > { %v2229_v16 = vadd.f32 %v2228_v28, %v2227_v48 }
 0x269   : > { %v2231_v46 = vadd.f32 %v2230_v45, %v2229_v16 }
 0x26b   : > { %v2233_v17 = vadd.f32 %v2232_v49, %v2231_v46 }
 0x26d   : > { %v2235_v50 = vadd.f32 %v2234_v15, %v2233_v17 }
 0x26f   : > { %v2236_v54 = vrot.slane %v2235_v50, 4 }
 0x271   : > { %v2237_v52 = vadd.f32 %v2236_v54, %v2235_v50 }
 0x273   : > { %v2238_v53 = vrot.slane %v2237_v52, 2 }
 0x275   : > { %v2239_v13 = vadd.f32 %v2238_v53, %v2237_v52 }
 0x277   : > { %v2240_v56 = vrot.slane %v2239_v13, 1 }
 0x279   : > { %v2241_v25 = vadd.f32 %v2240_v56, %v2239_v13 }
 0x27b   : > { %2244 = vst.msk [vmem:[%s3813_s7 + $0x1] sm:$0x1] %vm2242_vm11, %v2241_v25 }
 0x27c PF: > { %s16_s20 = sadd.s32 1, %s2941_s20   ;;  %s3990_s18 = smov %s2937_s19 }
 0x27d   : > { %p13_p5 = scmp.ge.s32.totalorder %s16_s20, 4   ;;  %s3991_s19 = smov %s3993_s21 }
 0x27f   :  { %15 = sbr.rel (!%p13_p5) target bundleno = 2 (0x2), region = 89 }

// kernel: straight_basic_block.4
= control target key start
LH: loop header
LB: loop body
LE: loop exit
PB: predicated region body
PF: predicated region fallthrough
CT: control target
= control target key end

     0   :  { %s3165_s24 = smov 0   ;;  %s3167_s25 = smov 0   ;;  %s4256_s0 = inlined_call_operand.vmem [shape: f32[2,16,16,4], index: 0, kind: input, shape index: {}, may-alias: {0,1,2}]   ;;  %s4257_s1 = inlined_call_operand.vmem [shape: f32[2,16,16,4], index: 1, kind: input, shape index: {}, may-alias: {0,1,2}]   ;;  %s4258_s2 = inlined_call_operand.vmem [shape: f32[2,16,16,4], index: 2, kind: input, shape index: {}, may-alias: {0,1,2}]   ;;  %s4259_s3 = inlined_call_operand.vmem [shape: f32[3,12,4], index: 3, kind: input, shape index: {}]   ;;  %s4260_s4 = inlined_call_operand.vmem [shape: f32[1,4], index: 4, kind: input, shape index: {}]   ;;  %s4261_s5 = inlined_call_operand.vmem [shape: f32[1,4], index: 5, kind: input, shape index: {}]   ;;  %s4262_s6 = inlined_call_operand.vmem [shape: f32[2,16,16,4], index: 6, kind: output, shape index: {0}]   ;;  %s4263_s7 = inlined_call_operand.vmem [shape: f32[2,1,2,4], index: 7, kind: output, shape index: {1}]  }
   0x1   :  { %s3169_s26 = smov 0  }
   0x2 LB: > { %s30_s27 = sadd.s32 1, %s3115_s25  ;;  %p2604_p0 = scmp.ge.s32.totalorder %s3119_s26, 1  ;;  %s3119_s26 = sphi %s3169_s26, %s18_s26   ;;  %s3115_s25 = sphi %s3167_s25, %s4267_s25   ;;  %s3111_s24 = sphi %s3165_s24, %s4266_s24  }
   0x3   : > { %p32_p1 = scmp.ge.s32.totalorder %s30_s27, 2  ;;  %p328_p2 = scmp.lt.s32.totalorder %s3119_s26, 3 }
   0x5   : > { %s4269_s27 = smov (%p32_p1, %s30_s27), 0  ;;  %p329_p3 = pnand %p2604_p0, %p328_p2 }
   0x6   : > { %p404_p4 = scmp.lt.s32.totalorder (!%p329_p3), %s3111_s24, 1  ;;  %v3191_v0 = vld [vmem:[%s4260_s4] ss:$0 sm:$0xff] (!%p329_p3)  ;;  %vm631_vm0 = vcmask (!%p329_p3), 31744   ;;  %vm706_vm1 = vcmask (!%p329_p3), 57376   ;;  %s3121_s16 = smov (!%p329_p3), 8  }
   0x7   : > { %332 = sbr.rel (%p329_p3) target bundleno = 639 (0x27f), region = 44  ;;  %v3202_v1 = vld [vmem:[%s4261_s5] ss:$0 sm:$0xff] (!%p329_p3)  ;;  %s3123_s17 = smov (!%p329_p3), 4   ;;  %vm1238_vm2 = vcmask (!%p329_p3), 1043456   ;;  %vm3124_vm3 = vmmov (!%p329_p3), 1  }
   0x8   : > { %vm3400_vm4 = vmpackc.low (!%p329_p3), %vm1238_vm2, %vm3124_vm3  ;;  %vm869_vm5 = vcmask (!%p329_p3), 64544   ;;  %vm1015_vm6 = vcmask (!%p329_p3), 97345   ;;  %vm871_vm7 = vcmask (!%p329_p3), 63520   ;;  %vm1053_vm8 = vcmask (!%p329_p3), 90176  }
   0x9   : > { %vm1017_vm9 = vcmask (!%p329_p3), 97344   ;;  %vm1141_vm10 = vcmask (!%p329_p3), 97280   ;;  %vm2418_vm11 = vcmask (!%p329_p3), 24576  }
   0xe   : > { %s4271_s24 = smov (!%p404_p4, %s3111_s24), 1 }
   0xf   : > { %s3186_s28 = sshll.u32 %s4271_s24, 8 }
  0x10   : > { %s3197_s10 = scalar_lea.vmem %s4256_s0, %s3186_s28  ;;  %s426_s15 = scalar_lea.vmem %s4257_s1, %s3186_s28 }
  0x11   : > { %v503_v2 = vld [vmem:[%s3197_s10] sm:$0xff]  ;;  %v505_v3 = vld [vmem:[%s3197_s10 + $0x10] sm:$0xff]  ;;  %v504_v4 = vld [vmem:[%s3197_s10 + $0x8] sm:$0xff]  ;;  %s2724_s8 = sadd.s32 240, %s3186_s28  ;;  %s3880_s18 = scalar_lea.vmem %s4262_s6, %s3186_s28 }
  0x12   : > { %v535_v5 = vmul.f32 %v3191_v0, %v503_v2  ;;  %v537_v6 = vmul.f32 %v3191_v0, %v505_v3  ;;  %v536_v7 = vmul.f32 %v3191_v0, %v504_v4  ;;  %v468_v8 = vld [vmem:[%s426_s15] sm:$0xff]  ;;  %v506_v9 = vld [vmem:[%s3197_s10 + $0x18] sm:$0xff]  ;;  %v469_v10 = vld [vmem:[%s426_s15 + $0x8] sm:$0xff]  ;;  %s443_s11 = scalar_lea.vmem %s4258_s2, %s2724_s8  ;;  %s2613_s28 = sshll.u32 %s4271_s24, 1 }
  0x13   : > { %v477_v11 = vmul.f32 %v3191_v0, %v468_v8  ;;  %v538_v12 = vmul.f32 %v3191_v0, %v506_v9  ;;  %v478_v13 = vmul.f32 %v3191_v0, %v469_v10  ;;  %v507_v14 = vld [vmem:[%s3197_s10 + $0x20] sm:$0xff]  ;;  %v508_v15 = vld [vmem:[%s3197_s10 + $0x28] sm:$0xff]  ;;  %v509_v24 = vld [vmem:[%s3197_s10 + $0x30] sm:$0xff]  ;;  %s4087_s21 = scalar_lea.vmem %s4263_s7, %s2613_s28 }
  0x14   : > { %v567_v16 = vadd.f32 %v3202_v1, %v535_v5  ;;  %v569_v17 = vadd.f32 %v3202_v1, %v537_v6  ;;  %v568_v18 = vadd.f32 %v3202_v1, %v536_v7  ;;  %v539_v19 = vmul.f32 %v3191_v0, %v507_v14  ;;  %v510_v25 = vld [vmem:[%s3197_s10 + $0x38] sm:$0xff]  ;;  %v511_v26 = vld [vmem:[%s3197_s10 + $0x40] sm:$0xff]  ;;  %v512_v31 = vld [vmem:[%s3197_s10 + $0x48] sm:$0xff] }
  0x15   : > { %v486_v20 = vadd.f32 %v3202_v1, %v477_v11  ;;  %v570_v21 = vadd.f32 %v3202_v1, %v538_v12  ;;  %v487_v22 = vadd.f32 %v3202_v1, %v478_v13  ;;  %v540_v23 = vmul.f32 %v3191_v0, %v508_v15  ;;  %v513_v36 = vld [vmem:[%s3197_s10 + $0x50] sm:$0xff]  ;;  %v514_v41 = vld [vmem:[%s3197_s10 + $0x58] sm:$0xff]  ;;  %v515_v42 = vld [vmem:[%s3197_s10 + $0x60] sm:$0xff] }
  0x16   : > { %v599_v27 = vmax.f32 %v567_v16, 0.0  ;;  %v601_v28 = vmax.f32 %v569_v17, 0.0  ;;  %v600_v29 = vmax.f32 %v568_v18, 0.0  ;;  %v571_v30 = vadd.f32 %v3202_v1, %v539_v19  ;;  %v516_v43 = vld [vmem:[%s3197_s10 + $0x68] sm:$0xff]  ;;  %v517_v56 = vld [vmem:[%s3197_s10 + $0x70] sm:$0xff]  ;;  %v518_v57 = vld [vmem:[%s3197_s10 + $0x78] sm:$0xff] }
  0x17   : > { %v488_v32 = vmax.f32 %v486_v20, 0.0  ;;  %v602_v33 = vmax.f32 %v570_v21, 0.0  ;;  %v489_v34 = vmax.f32 %v487_v22, 0.0  ;;  %v572_v35 = vadd.f32 %v3202_v1, %v540_v23  ;;  %v519_v58 = vld [vmem:[%s3197_s10 + $0x80] sm:$0xff]  ;;  %v520_v63 = vld [vmem:[%s3197_s10 + $0x88] sm:$0xff]  ;;  %v521_v10 = vld [vmem:[%s3197_s10 + $0x90] sm:$0xff] }
  0x18   : > { %635 = vst.msk [vmem:[#allocation2 + $0x10] sm:$0xff] %vm631_vm0, %v599_v27  ;;  %637 = vst.msk [vmem:[#allocation2 + $0x20] sm:$0xff] %vm631_vm0, %v601_v28  ;;  %v603_v37 = vmax.f32 %v571_v30, 0.0  ;;  %v541_v38 = vmul.f32 %v3191_v0, %v509_v24  ;;  %v542_v39 = vmul.f32 %v3191_v0, %v510_v25  ;;  %v543_v40 = vmul.f32 %v3191_v0, %v511_v26  ;;  %v522_v11 = vld [vmem:[%s3197_s10 + $0x98] sm:$0xff]  ;;  %v523_v12 = vld [vmem:[%s3197_s10 + $0xa0] sm:$0xff] }
  0x19   : > { %636 = vst.msk [vmem:[#allocation2 + $0x18] sm:$0xff] %vm631_vm0, %v600_v29  ;;  %v491_v44 = vmul.f32 0.0, %v488_v32  ;;  %638 = vst.msk [vmem:[#allocation2 + $0x28] sm:$0xff] %vm631_vm0, %v602_v33  ;;  %v492_v45 = vmul.f32 0.0, %v489_v34  ;;  %v604_v46 = vmax.f32 %v572_v35, 0.0  ;;  %v544_v47 = vmul.f32 %v3191_v0, %v512_v31  ;;  %v524_v19 = vld [vmem:[%s3197_s10 + $0xa8] sm:$0xff] }
  0x1a   : > { %639 = vst.msk [vmem:[#allocation2 + $0x30] sm:$0xff] %vm631_vm0, %v603_v37  ;;  %v573_v48 = vadd.f32 %v3202_v1, %v541_v38  ;;  %v574_v49 = vadd.f32 %v3202_v1, %v542_v39  ;;  %v575_v50 = vadd.f32 %v3202_v1, %v543_v40  ;;  %v545_v51 = vmul.f32 %v3191_v0, %v513_v36  ;;  %v525_v24 = vld [vmem:[%s3197_s10 + $0xb0] sm:$0xff]  ;;  %v526_v31 = vld [vmem:[%s3197_s10 + $0xb8] sm:$0xff]  ;;  %v527_v37 = vld [vmem:[%s3197_s10 + $0xc0] sm:$0xff] }
  0x1b   : > { %632 = vst.msk [vmem:[#allocation2] sm:$0xff] %vm631_vm0, %v491_v44  ;;  %633 = vst.msk [vmem:[#allocation2 + $0x8] sm:$0xff] %vm631_vm0, %v492_v45  ;;  %v576_v52 = vadd.f32 %v3202_v1, %v544_v47  ;;  %v546_v53 = vmul.f32 %v3191_v0, %v514_v41  ;;  %v547_v54 = vmul.f32 %v3191_v0, %v515_v42  ;;  %v3122_v20 = vmov 0.0   ;;  %v528_v42 = vld [vmem:[%s3197_s10 + $0xc8] sm:$0xff]  ;;  %v530_v47 = vld [vmem:[%s3197_s10 + $0xd8] sm:$0xff] }
  0x1c   : > { %640 = vst.msk [vmem:[#allocation2 + $0x38] sm:$0xff] %vm631_vm0, %v604_v46  ;;  %v548_v55 = vmul.f32 %v3191_v0, %v516_v43  ;;  %v605_v59 = vmax.f32 %v573_v48, 0.0  ;;  %v606_v60 = vmax.f32 %v574_v49, 0.0  ;;  %v607_v61 = vmax.f32 %v575_v50, 0.0  ;;  %v529_v43 = vld [vmem:[%s3197_s10 + $0xd0] sm:$0xff]  ;;  %v531_v48 = vld [vmem:[%s3197_s10 + $0xe0] sm:$0xff] }
  0x1d   : > { %v577_v62 = vadd.f32 %v3202_v1, %v545_v51  ;;  %v608_v2 = vmax.f32 %v576_v52, 0.0  ;;  %v578_v3 = vadd.f32 %v3202_v1, %v546_v53  ;;  %v579_v4 = vadd.f32 %v3202_v1, %v547_v54 }
  0x1e   : > { %v580_v5 = vadd.f32 %v3202_v1, %v548_v55  ;;  %641 = vst.msk [vmem:[#allocation2 + $0x40] sm:$0xff] %vm631_vm0, %v605_v59  ;;  %642 = vst.msk [vmem:[#allocation2 + $0x48] sm:$0xff] %vm631_vm0, %v606_v60  ;;  %v549_v7 = vmul.f32 %v3191_v0, %v517_v56  ;;  %v550_v8 = vmul.f32 %v3191_v0, %v518_v57  ;;  %v532_v55 = vld [vmem:[%s3197_s10 + $0xe8] sm:$0xff] }
  0x1f   : > { %643 = vst.msk [vmem:[#allocation2 + $0x50] sm:$0xff] %vm631_vm0, %v607_v61  ;;  %v609_v6 = vmax.f32 %v577_v62, 0.0  ;;  %v551_v9 = vmul.f32 %v3191_v0, %v519_v58  ;;  %v672_v13 = vld [vmem:[#allocation2 + $0x10] sm:$0xff]  ;;  %v3275_v14 = vld [vmem:[#allocation2 + $0x20] sm:$0xff]  ;;  %644 = vst.msk [vmem:[#allocation2 + $0x58] sm:$0xff] %vm631_vm0, %v608_v2  ;;  %v610_v15 = vmax.f32 %v578_v3, 0.0  ;;  %v552_v18 = vmul.f32 %v3191_v0, %v520_v63 }
  0x20   : > { %v611_v16 = vmax.f32 %v579_v4, 0.0  ;;  %v612_v17 = vmax.f32 %v580_v5, 0.0  ;;  %911 = vrot.lane.b32.xlu0 %v672_v13, %s3121_s16  ;;  %708 = vst.msk [vmem:[#allocation2 + $0x10] sm:$0x1] %vm706_vm1, %v3122_v20  ;;  %765 = vrot.lane.b32.xlu1 %v672_v13, %s3123_s17  ;;  %709 = vst.msk [vmem:[#allocation2 + $0x20] sm:$0x1] %vm706_vm1, %v3122_v20  ;;  %v581_v21 = vadd.f32 %v3202_v1, %v549_v7 }
  0x21   : > { %645 = vst.msk [vmem:[#allocation2 + $0x60] sm:$0xff] %vm631_vm0, %v609_v6  ;;  %v582_v22 = vadd.f32 %v3202_v1, %v550_v8  ;;  %v583_v23 = vadd.f32 %v3202_v1, %v551_v9  ;;  %v673_v25 = vld [vmem:[#allocation2 + $0x18] sm:$0xff]  ;;  %v3291_v26 = vld [vmem:[#allocation2 + $0x30] sm:$0xff]  ;;  %646 = vst.msk [vmem:[#allocation2 + $0x68] sm:$0xff] %vm631_vm0, %v610_v15  ;;  %v584_v27 = vadd.f32 %v3202_v1, %v552_v18 }
  0x22   : > { %647 = vst.msk [vmem:[#allocation2 + $0x70] sm:$0xff] %vm631_vm0, %v611_v16  ;;  %648 = vst.msk [vmem:[#allocation2 + $0x78] sm:$0xff] %vm631_vm0, %v612_v17  ;;  %v553_v28 = vmul.f32 %v3191_v0, %v521_v10  ;;  %v554_v29 = vmul.f32 %v3191_v0, %v522_v11  ;;  %v555_v30 = vmul.f32 %v3191_v0, %v523_v12  ;;  %v3301_v32 = vld [vmem:[#allocation2] sm:$0xff]  ;;  %v613_v33 = vmax.f32 %v581_v21, 0.0  ;;  %v2616_v8 = vld [vmem:[%s4259_s3 + $0x10] sm:$0xff] }
  0x23   : > { %710 = vst.msk [vmem:[#allocation2 + $0x30] sm:$0x1] %vm706_vm1, %v3122_v20  ;;  %v614_v34 = vmax.f32 %v582_v22, 0.0  ;;  %v615_v35 = vmax.f32 %v583_v23, 0.0  ;;  %v556_v36 = vmul.f32 %v3191_v0, %v524_v19  ;;  %707 = vst.msk [vmem:[#allocation2] sm:$0x1] %vm706_vm1, %v3122_v20  ;;  %v557_v45 = vmul.f32 %v3191_v0, %v525_v24 }
  0x24   : > { %v616_v38 = vmax.f32 %v584_v27, 0.0  ;;  %v585_v39 = vadd.f32 %v3202_v1, %v553_v28  ;;  %v586_v40 = vadd.f32 %v3202_v1, %v554_v29  ;;  %v587_v41 = vadd.f32 %v3202_v1, %v555_v30  ;;  %769 = vrot.lane.b32.xlu0 %v3275_v14, %s3123_s17  ;;  %767 = vrot.lane.b32.xlu1 %v673_v25, %s3123_s17  ;;  %v2617_v9 = vld [vmem:[%s4259_s3 + $0x18] sm:$0xf]  ;;  %v675_v10 = vld [vmem:[#allocation2 + $0x28] sm:$0xff]  ;;  %v533_v15 = vld [vmem:[%s3197_s10 + $0xf0] sm:$0xff] }
  0x25   : > { %649 = vst.msk [vmem:[#allocation2 + $0x80] sm:$0xff] %vm631_vm0, %v613_v33  ;;  %650 = vst.msk [vmem:[#allocation2 + $0x88] sm:$0xff] %vm631_vm0, %v614_v34  ;;  %v588_v44 = vadd.f32 %v3202_v1, %v556_v36  ;;  %v558_v46 = vmul.f32 %v3191_v0, %v526_v31  ;;  %v3325_v49 = vld [vmem:[#allocation2 + $0x40] sm:$0xff]  ;;  %v559_v54 = vmul.f32 %v3191_v0, %v527_v37  ;;  %v534_v16 = vld [vmem:[%s3197_s10 + $0xf8] sm:$0xff] }
  0x26   : > { %651 = vst.msk [vmem:[#allocation2 + $0x90] sm:$0xff] %vm631_vm0, %v615_v35  ;;  %v3327_v50 = vld [vmem:[#allocation2 + $0x50] sm:$0xff]  ;;  %652 = vst.msk [vmem:[#allocation2 + $0x98] sm:$0xff] %vm631_vm0, %v616_v38  ;;  %v617_v51 = vmax.f32 %v585_v39, 0.0  ;;  %v618_v52 = vmax.f32 %v586_v40, 0.0  ;;  %v619_v53 = vmax.f32 %v587_v41, 0.0  ;;  %v589_v57 = vadd.f32 %v3202_v1, %v557_v45 }
  0x27   : > { %711 = vst.msk [vmem:[#allocation2 + $0x40] sm:$0x1] %vm706_vm1, %v3122_v20  ;;  %712 = vst.msk [vmem:[#allocation2 + $0x50] sm:$0x1] %vm706_vm1, %v3122_v20  ;;  %v620_v56 = vmax.f32 %v588_v44, 0.0  ;;  %v590_v58 = vadd.f32 %v3202_v1, %v558_v46  ;;  %v560_v59 = vmul.f32 %v3191_v0, %v528_v42  ;;  %v591_v61 = vadd.f32 %v3202_v1, %v559_v54  ;;  %v1104_v19 = vld [vmem:[%s4259_s3] sm:$0xff] }
  0x28   : > { %v3339_v60 = vld [vmem:[#allocation2 + $0x60] sm:$0xff]  ;;  %653 = vst.msk [vmem:[#allocation2 + $0xa0] sm:$0xff] %vm631_vm0, %v617_v51  ;;  %654 = vst.msk [vmem:[#allocation2 + $0xa8] sm:$0xff] %vm631_vm0, %v618_v52  ;;  %v561_v62 = vmul.f32 %v3191_v0, %v529_v43  ;;  %v562_v63 = vmul.f32 %v3191_v0, %v530_v47  ;;  %v563_v2 = vmul.f32 %v3191_v0, %v531_v48  ;;  %915 = vrot.lane.b32.xlu0 %v3275_v14, %s3121_s16  ;;  %v1105_v21 = vld [vmem:[%s4259_s3 + $0x8] sm:$0xf] }
  0x29   : > { %655 = vst.msk [vmem:[#allocation2 + $0xb0] sm:$0xff] %vm631_vm0, %v619_v53  ;;  %913 = vrot.lane.b32.xlu1 %v673_v25, %s3121_s16  ;;  %v3353_v3 = vld [vmem:[#allocation2 + $0x70] sm:$0xff]  ;;  %656 = vst.msk [vmem:[#allocation2 + $0xb8] sm:$0xff] %vm631_vm0, %v620_v56  ;;  %v621_v4 = vmax.f32 %v589_v57, 0.0  ;;  %v622_v5 = vmax.f32 %v590_v58, 0.0  ;;  %v592_v6 = vadd.f32 %v3202_v1, %v560_v59  ;;  %v564_v7 = vmul.f32 %v3191_v0, %v532_v55  ;;  %v671_v33 = vld [vmem:[#allocation2 + $0x8] sm:$0xff] }
  0x2a   : > { %713 = vst.msk [vmem:[#allocation2 + $0x60] sm:$0x1] %vm706_vm1, %v3122_v20  ;;  %714 = vst.msk [vmem:[#allocation2 + $0x70] sm:$0x1] %vm706_vm1, %v3122_v20  ;;  %v623_v11 = vmax.f32 %v591_v61, 0.0  ;;  %v593_v12 = vadd.f32 %v3202_v1, %v561_v62  ;;  %v594_v13 = vadd.f32 %v3202_v1, %v562_v63  ;;  %v595_v14 = vadd.f32 %v3202_v1, %v563_v2  ;;  %v493_v40 = vld [vmem:[%s443_s11] sm:$0xff] }
  0x2b   : > { %657 = vst.msk [vmem:[#allocation2 + $0xc0] sm:$0xff] %vm631_vm0, %v621_v4  ;;  %658 = vst.msk [vmem:[#allocation2 + $0xc8] sm:$0xff] %vm631_vm0, %v622_v5  ;;  %v624_v17 = vmax.f32 %v592_v6, 0.0  ;;  %v596_v18 = vadd.f32 %v3202_v1, %v564_v7  ;;  %v2985_v28 = vpack.c.bf16 %v2617_v9, %v2616_v8  ;;  %v565_v30 = vmul.f32 %v3191_v0, %v533_v15  ;;  %v494_v41 = vld [vmem:[%s443_s11 + $0x8] sm:$0xff]  ;;  %v677_v55 = vld [vmem:[#allocation2 + $0x38] sm:$0xff] }
  0x2c   : > { %v3380_v22 = vld [vmem:[#allocation2 + $0x80] sm:$0xff]  ;;  %659 = vst.msk [vmem:[#allocation2 + $0xd0] sm:$0xff] %vm631_vm0, %v623_v11  ;;  %v625_v24 = vmax.f32 %v593_v12, 0.0  ;;  %v626_v25 = vmax.f32 %v594_v13, 0.0  ;;  %v627_v27 = vmax.f32 %v595_v14, 0.0  ;;  %761 = vrot.lane.b32.xlu0 %v3301_v32, %s3123_s17  ;;  %v566_v31 = vmul.f32 %v3191_v0, %v534_v16  ;;  %v679_v57 = vld [vmem:[#allocation2 + $0x48] sm:$0xff] }
  0x2d   : > { %v3382_v23 = vld [vmem:[#allocation2 + $0x90] sm:$0xff]  ;;  %771 = vrot.lane.b32.xlu1 %v675_v10, %s3123_s17  ;;  %715 = vst.msk [vmem:[#allocation2 + $0x80] sm:$0x1] %vm706_vm1, %v3122_v20  ;;  %v628_v29 = vmax.f32 %v596_v18, 0.0  ;;  %v3404_v35 = vpack.c.bf16 %v1105_v21, %v1104_v19  ;;  %2987 = vmatprep.subr.msk.bf16.mxu1 %vm3400_vm4, %v2985_v28  ;;  %v597_v38 = vadd.f32 %v3202_v1, %v565_v30  ;;  %v681_v59 = vld [vmem:[#allocation2 + $0x58] sm:$0xff]  ;;  %v2684_v61 = vld [vmem:[%s4259_s3 + $0x20] sm:$0xff] }
  0x2e   : > { %716 = vst.msk [vmem:[#allocation2 + $0x90] sm:$0x1] %vm706_vm1, %v3122_v20  ;;  %v598_v39 = vadd.f32 %v3202_v1, %v566_v31  ;;  %2990 = vmatpush3.bf16.msk.msra.mxu1 %vm3400_vm4, %v2985_v28  ;;  %v495_v44 = vmul.f32 %v3191_v0, %v493_v40  ;;  %v496_v45 = vmul.f32 %v3191_v0, %v494_v41  ;;  %v689_v63 = vld [vmem:[#allocation2 + $0x98] sm:$0xff] }
  0x2f   : > { %660 = vst.msk [vmem:[#allocation2 + $0xd8] sm:$0xff] %vm631_vm0, %v624_v17  ;;  %661 = vst.msk [vmem:[#allocation2 + $0xe0] sm:$0xff] %vm631_vm0, %v625_v24  ;;  %v3409_v36 = vld [vmem:[#allocation2 + $0xa0] sm:$0xff]  ;;  %2993 = vmatprep.subr.msk.bf16.mxu0 %vm3400_vm4, %v3404_v35  ;;  %v629_v42 = vmax.f32 %v597_v38, 0.0  ;;  %3003 = vmatprep.subr.msk.bf16.mxu1 %vm3400_vm4, %v3404_v35  ;;  %v691_v2 = vld [vmem:[#allocation2 + $0xa8] sm:$0xff] }
  0x30   : > { %662 = vst.msk [vmem:[#allocation2 + $0xe8] sm:$0xff] %vm631_vm0, %v626_v25  ;;  %663 = vst.msk [vmem:[#allocation2 + $0xf0] sm:$0xff] %vm631_vm0, %v627_v27  ;;  %v3411_v37 = vld [vmem:[#allocation2 + $0xb0] sm:$0xff]  ;;  %763 = vrot.lane.b32.xlu0 %v671_v33, %s3123_s17  ;;  %v630_v43 = vmax.f32 %v598_v39, 0.0  ;;  %2996 = vmatpush3.bf16.msk.msra.mxu0 %vm3400_vm4, %v3404_v35  ;;  %v497_v0 = vadd.f32 %v3202_v1, %v495_v44  ;;  %v498_v48 = vadd.f32 %v3202_v1, %v496_v45 }
  0x31   : > { %664 = vst.msk [vmem:[#allocation2 + $0xf8] sm:$0xff] %vm631_vm0, %v628_v29  ;;  %917 = vrot.lane.b32.xlu1 %v675_v10, %s3121_s16  ;;  %665 = vst.msk [vmem:[#allocation2 + $0x100] sm:$0xff] %vm631_vm0, %v629_v42 }
  0x32   : > { %717 = vst.msk [vmem:[#allocation2 + $0xa0] sm:$0x1] %vm706_vm1, %v3122_v20  ;;  %718 = vst.msk [vmem:[#allocation2 + $0xb0] sm:$0x1] %vm706_vm1, %v3122_v20  ;;  %v3431_v46 = vld [vmem:[#allocation2 + $0xc0] sm:$0xff]  ;;  %v499_v53 = vmax.f32 %v497_v0, 0.0 }
  0x33   : > { %719 = vst.msk [vmem:[#allocation2 + $0xc0] sm:$0x1] %vm706_vm1, %v3122_v20  ;;  %v3441_v47 = vld [vmem:[#allocation2 + $0xd0] sm:$0xff]  ;;  %v500_v54 = vmax.f32 %v498_v48, 0.0  ;;  %v695_v4 = vld [vmem:[#allocation2 + $0xc8] sm:$0xff] }
  0x34   : > { %666 = vst.msk [vmem:[#allocation2 + $0x108] sm:$0xff] %vm631_vm0, %v630_v43  ;;  %907 = vrot.lane.b32.xlu0 %v3301_v32, %s3121_s16  ;;  %v501_v1 = vmul.f32 0.0, %v499_v53 }
  0x35   : > { %720 = vst.msk [vmem:[#allocation2 + $0xd0] sm:$0x1] %vm706_vm1, %v3122_v20  ;;  %909 = vrot.lane.b32.xlu1 %v671_v33, %s3121_s16  ;;  %v502_v56 = vmul.f32 0.0, %v500_v54 }
  0x36   : > { %v3452_v51 = vld [vmem:[#allocation2 + $0xe0] sm:$0xff]  ;;  %668 = vst.msk [vmem:[#allocation2 + $0x110] sm:$0xff] %vm631_vm0, %v501_v1  ;;  %v697_v5 = vld [vmem:[#allocation2 + $0xd8] sm:$0xff] }
  0x37   : > { %v3454_v52 = vld [vmem:[#allocation2 + $0xf0] sm:$0xff]  ;;  %721 = vst.msk [vmem:[#allocation2 + $0xe0] sm:$0x1] %vm706_vm1, %v3122_v20  ;;  %v699_v6 = vld [vmem:[#allocation2 + $0xe8] sm:$0xff] }
  0x38   : > { %722 = vst.msk [vmem:[#allocation2 + $0xf0] sm:$0x1] %vm706_vm1, %v3122_v20  ;;  %773 = vrot.lane.b32.xlu0 %v3291_v26, %s3123_s17  ;;  %v3465_v32 = vld [vmem:[#allocation2 + $0x100] sm:$0xff]  ;;  %v701_v9 = vld [vmem:[#allocation2 + $0xf8] sm:$0xff] }
  0x39   : > { %775 = vrot.lane.b32.xlu1 %v677_v55, %s3123_s17  ;;  %669 = vst.msk [vmem:[#allocation2 + $0x118] sm:$0xff] %vm631_vm0, %v502_v56 }
  0x3a   : > { %723 = vst.msk [vmem:[#allocation2 + $0x100] sm:$0x1] %vm706_vm1, %v3122_v20 }
  0x3b   : > { %v703_v14 = vld [vmem:[#allocation2 + $0x108] sm:$0xff] }
  0x3c   : > { %919 = vrot.lane.b32.xlu0 %v3291_v26, %s3121_s16  ;;  %v683_v26 = vld [vmem:[#allocation2 + $0x68] sm:$0xff] }
  0x3d   : > { %921 = vrot.lane.b32.xlu1 %v677_v55, %s3121_s16  ;;  %v3472_v58 = vld [vmem:[#allocation2 + $0x110] sm:$0xff] }
  0x3e   : > { %724 = vst.msk [vmem:[#allocation2 + $0x110] sm:$0x1] %vm706_vm1, %v3122_v20 }
  0x40   : > { %777 = vrot.lane.b32.xlu0 %v3325_v49, %s3123_s17 }
  0x41   : > { %779 = vrot.lane.b32.xlu1 %v679_v57, %s3123_s17 }
  0x44   : > { %923 = vrot.lane.b32.xlu0 %v3325_v49, %s3121_s16  ;;  %v685_v49 = vld [vmem:[#allocation2 + $0x78] sm:$0xff] }
  0x45   : > { %925 = vrot.lane.b32.xlu1 %v679_v57, %s3121_s16 }
  0x48   : > { %781 = vrot.lane.b32.xlu0 %v3327_v50, %s3123_s17 }
  0x49   : > { %783 = vrot.lane.b32.xlu1 %v681_v59, %s3123_s17 }
  0x4c   : > { %927 = vrot.lane.b32.xlu0 %v3327_v50, %s3121_s16  ;;  %v2685_v50 = vld [vmem:[%s4259_s3 + $0x28] sm:$0xf] }
  0x4d   : > { %929 = vrot.lane.b32.xlu1 %v681_v59, %s3121_s16  ;;  %v3500_v62 = vpack.c.bf16 %v2685_v50, %v2684_v61 }
  0x4f   : > { %2999 = vmatprep.subr.msk.bf16.mxu0 %vm3400_vm4, %v3500_v62 }
  0x50   : > { %785 = vrot.lane.b32.xlu0 %v3339_v60, %s3123_s17 }
  0x51   : > { %787 = vrot.lane.b32.xlu1 %v683_v26, %s3123_s17 }
  0x54   : > { %931 = vrot.lane.b32.xlu0 %v3339_v60, %s3121_s16  ;;  %v687_v60 = vld [vmem:[#allocation2 + $0x88] sm:$0xff] }
  0x55   : > { %933 = vrot.lane.b32.xlu1 %v683_v26, %s3121_s16 }
  0x58   : > { %789 = vrot.lane.b32.xlu0 %v3353_v3, %s3123_s17 }
  0x59   : > { %791 = vrot.lane.b32.xlu1 %v685_v49, %s3123_s17 }
  0x5c   : > { %935 = vrot.lane.b32.xlu0 %v3353_v3, %s3121_s16  ;;  %v693_v3 = vld [vmem:[#allocation2 + $0xb8] sm:$0xff] }
  0x5d   : > { %937 = vrot.lane.b32.xlu1 %v685_v49, %s3121_s16 }
  0x60   : > { %793 = vrot.lane.b32.xlu0 %v3380_v22, %s3123_s17 }
  0x61   : > { %795 = vrot.lane.b32.xlu1 %v687_v60, %s3123_s17 }
  0x64   : > { %939 = vrot.lane.b32.xlu0 %v3380_v22, %s3121_s16  ;;  %v705_v22 = vld [vmem:[#allocation2 + $0x118] sm:$0xff] }
  0x65   : > { %941 = vrot.lane.b32.xlu1 %v687_v60, %s3121_s16 }
  0x68   : > { %797 = vrot.lane.b32.xlu0 %v3382_v23, %s3123_s17 }
  0x69   : > { %799 = vrot.lane.b32.xlu1 %v689_v63, %s3123_s17 }
  0x6c   : > { %943 = vrot.lane.b32.xlu0 %v3382_v23, %s3121_s16 }
  0x6d   : > { %945 = vrot.lane.b32.xlu1 %v689_v63, %s3121_s16 }
  0x70   : > { %801 = vrot.lane.b32.xlu0 %v3409_v36, %s3123_s17 }
  0x71   : > { %803 = vrot.lane.b32.xlu1 %v691_v2, %s3123_s17 }
  0x74   : > { %947 = vrot.lane.b32.xlu0 %v3409_v36, %s3121_s16 }
  0x75   : > { %949 = vrot.lane.b32.xlu1 %v691_v2, %s3121_s16 }
  0x78   : > { %805 = vrot.lane.b32.xlu0 %v3411_v37, %s3123_s17 }
  0x79   : > { %807 = vrot.lane.b32.xlu1 %v693_v3, %s3123_s17 }
  0x7c   : > { %951 = vrot.lane.b32.xlu0 %v3411_v37, %s3121_s16 }
  0x7d   : > { %953 = vrot.lane.b32.xlu1 %v693_v3, %s3121_s16 }
  0x80   : > { %809 = vrot.lane.b32.xlu0 %v3431_v46, %s3123_s17 }
  0x81   : > { %811 = vrot.lane.b32.xlu1 %v695_v4, %s3123_s17 }
  0x84   : > { %955 = vrot.lane.b32.xlu0 %v3431_v46, %s3121_s16 }
  0x85   : > { %957 = vrot.lane.b32.xlu1 %v695_v4, %s3121_s16 }
  0x88   : > { %813 = vrot.lane.b32.xlu0 %v3441_v47, %s3123_s17 }
  0x89   : > { %815 = vrot.lane.b32.xlu1 %v697_v5, %s3123_s17 }
  0x8c   : > { %959 = vrot.lane.b32.xlu0 %v3441_v47, %s3121_s16 }
  0x8d   : > { %961 = vrot.lane.b32.xlu1 %v697_v5, %s3121_s16 }
  0x90   : > { %817 = vrot.lane.b32.xlu0 %v3452_v51, %s3123_s17 }
  0x91   : > { %819 = vrot.lane.b32.xlu1 %v699_v6, %s3123_s17 }
  0x92   : > { %v912_v7 = vpop.permute.xlu0 %911  ;;  %v766_v8 = vpop.permute.xlu1 %765 }
  0x93   : > { %873 = vst.msk [vmem:[#allocation2 + $0x11] sm:$0xff] %vm869_vm5, %v766_v8 }
  0x94   : > { %1019 = vst.msk [vmem:[#allocation2 + $0xf] sm:$0xfe] %vm1015_vm6, %v912_v7  ;;  %963 = vrot.lane.b32.xlu0 %v3452_v51, %s3121_s16 }
  0x95   : > { %965 = vrot.lane.b32.xlu1 %v699_v6, %s3121_s16 }
  0x96   : > { %v770_v10 = vpop.permute.xlu0 %769  ;;  %v768_v11 = vpop.permute.xlu1 %767 }
  0x97   : > { %875 = vst.msk [vmem:[#allocation2 + $0x21] sm:$0xff] %vm869_vm5, %v770_v10 }
  0x98   : > { %874 = vst.msk [vmem:[#allocation2 + $0x19] sm:$0x7f] %vm871_vm7, %v768_v11  ;;  %821 = vrot.lane.b32.xlu0 %v3454_v52, %s3123_s17 }
  0x99   : > { %1055 = vst.msk [vmem:[#allocation2 + $0x1f] sm:$0x1] %vm1053_vm8, %v3122_v20  ;;  %823 = vrot.lane.b32.xlu1 %v701_v9, %s3123_s17 }
  0x9a   : > { %v916_v12 = vpop.permute.xlu0 %915 }
  0x9b   : > { %v914_v13 = vpop.permute.xlu1 %913  ;;  %1021 = vst.msk [vmem:[#allocation2 + $0x1f] sm:$0xfe] %vm1015_vm6, %v916_v12 }
  0x9c   : > { %1020 = vst.msk [vmem:[#allocation2 + $0x17] sm:$0xff] %vm1017_vm9, %v914_v13  ;;  %967 = vrot.lane.b32.xlu0 %v3454_v52, %s3121_s16 }
  0x9d   : > { %969 = vrot.lane.b32.xlu1 %v701_v9, %s3121_s16 }
  0x9e   : > { %v762_v15 = vpop.permute.xlu0 %761 }
  0x9f   : > { %v772_v16 = vpop.permute.xlu1 %771  ;;  %870 = vst.msk [vmem:[#allocation2 + $0x1] sm:$0xff] %vm869_vm5, %v762_v15 }
  0xa0   : > { %876 = vst.msk [vmem:[#allocation2 + $0x29] sm:$0x7f] %vm871_vm7, %v772_v16  ;;  %825 = vrot.lane.b32.xlu0 %v3465_v32, %s3123_s17 }
  0xa1   : > { %1056 = vst.msk [vmem:[#allocation2 + $0x2f] sm:$0x1] %vm1053_vm8, %v3122_v20  ;;  %827 = vrot.lane.b32.xlu1 %v703_v14, %s3123_s17 }
  0xa2   : > { %v764_v17 = vpop.permute.xlu0 %763 }
  0xa3   : > { %v918_v18 = vpop.permute.xlu1 %917  ;;  %v1106_v19 = vld [vmem:[#allocation2 + $0x10] sm:$0xff]  ;;  %v1107_v21 = vld [vmem:[#allocation2 + $0x18] sm:$0xff]  ;;  %872 = vst.msk [vmem:[#allocation2 + $0x9] sm:$0x7f] %vm871_vm7, %v764_v17 }
  0xa4   : > { %1022 = vst.msk [vmem:[#allocation2 + $0x27] sm:$0xff] %vm1017_vm9, %v918_v18  ;;  %2833 = vmatprep.mubr.msk.f32.mxu1 %vm1141_vm10, %v1106_v19  ;;  %971 = vrot.lane.b32.xlu0 %v3465_v32, %s3121_s16 }
  0xa5   : > { %1054 = vst.msk [vmem:[#allocation2 + $0xf] sm:$0x1] %vm1053_vm8, %v3122_v20  ;;  %973 = vrot.lane.b32.xlu1 %v703_v14, %s3121_s16  ;;  %2834 = vmatmul.mubr.msk.f32.vlgmr.msra.gmra.mrb[0].mxu1 %vm1141_vm10, %v1107_v21 }
  0xa6   : > { %v908_v23 = vpop.permute.xlu0 %907  ;;  %3004 = vmatpush3.bf16.msk.msra.mxu1 %vm3400_vm4, %v3404_v35 }
  0xa7   : > { %v910_v24 = vpop.permute.xlu1 %909  ;;  %1016 = vst.msk [vmem:[#allocation2 - $0x1] sm:$0xfe] %vm1015_vm6, %v908_v23 }
  0xa8   : > { %1018 = vst.msk [vmem:[#allocation2 + $0x7] sm:$0xff] %vm1017_vm9, %v910_v24  ;;  %829 = vrot.lane.b32.xlu0 %v3472_v58, %s3123_s17 }
  0xa9   : > { %831 = vrot.lane.b32.xlu1 %v705_v22, %s3123_s17 }
  0xaa   : > { %v774_v25 = vpop.permute.xlu0 %773 }
  0xab   : > { %v776_v27 = vpop.permute.xlu1 %775  ;;  %v3591_v28 = vld [vmem:[#allocation2 + $0x20] sm:$0xff]  ;;  %v3593_v29 = vld [vmem:[#allocation2 + $0x28] sm:$0xff]  ;;  %877 = vst.msk [vmem:[#allocation2 + $0x31] sm:$0xff] %vm869_vm5, %v774_v25 }
  0xac   : > { %878 = vst.msk [vmem:[#allocation2 + $0x39] sm:$0x7f] %vm871_vm7, %v776_v27  ;;  %2836 = vmatprep.mubr.msk.f32.mxu1 %vm1141_vm10, %v3591_v28  ;;  %975 = vrot.lane.b32.xlu0 %v3472_v58, %s3121_s16 }
  0xad   : > { %1057 = vst.msk [vmem:[#allocation2 + $0x3f] sm:$0x1] %vm1053_vm8, %v3122_v20  ;;  %2837 = vmatmul.mubr.msk.f32.gmra.mrb[2].mxu1 %vm1141_vm10, %v3593_v29  ;;  %977 = vrot.lane.b32.xlu1 %v705_v22, %s3121_s16 }
  0xae   : > { %v920_v30 = vpop.permute.xlu0 %919 }
  0xaf   : > { %v922_v31 = vpop.permute.xlu1 %921  ;;  %v1072_v33 = vld [vmem:[#allocation2] sm:$0xff]  ;;  %v1073_v35 = vld [vmem:[#allocation2 + $0x8] sm:$0xff]  ;;  %1023 = vst.msk [vmem:[#allocation2 + $0x2f] sm:$0xfe] %vm1015_vm6, %v920_v30 }
  0xb0   : > { %1024 = vst.msk [vmem:[#allocation2 + $0x37] sm:$0xff] %vm1017_vm9, %v922_v31  ;;  %2885 = vmatprep.mubr.msk.f32.mxu0 %vm1141_vm10, %v1072_v33 }
  0xb1   : > { %2886 = vmatmul.mubr.msk.f32.vlgmr.msra.gmra.mrb[0].mxu0 %vm1141_vm10, %v1073_v35 }
  0xb2   : > { %2888 = vmatprep.mubr.msk.f32.mxu0 %vm1141_vm10, %v1106_v19  ;;  %3002 = vmatpush3.bf16.msk.msra.mxu0 %vm3400_vm4, %v3500_v62  ;;  %v778_v36 = vpop.permute.xlu0 %777 }
  0xb3   : > { %v780_v37 = vpop.permute.xlu1 %779  ;;  %879 = vst.msk [vmem:[#allocation2 + $0x41] sm:$0xff] %vm869_vm5, %v778_v36 }
  0xb4   : > { %880 = vst.msk [vmem:[#allocation2 + $0x49] sm:$0x7f] %vm871_vm7, %v780_v37 }
  0xb5   : > { %1058 = vst.msk [vmem:[#allocation2 + $0x4f] sm:$0x1] %vm1053_vm8, %v3122_v20  ;;  %2889 = vmatmul.mubr.msk.f32.gmra.mrb[2].mxu0 %vm1141_vm10, %v1107_v21 }
  0xb6   : > { %2891 = vmatprep.mubr.msk.f32.mxu0 %vm1141_vm10, %v3591_v28  ;;  %v924_v38 = vpop.permute.xlu0 %923 }
  0xb7   : > { %v926_v39 = vpop.permute.xlu1 %925  ;;  %v3621_v40 = vld [vmem:[#allocation2 + $0x30] sm:$0xff]  ;;  %v3623_v34 = vld [vmem:[#allocation2 + $0x38] sm:$0xff]  ;;  %1025 = vst.msk [vmem:[#allocation2 + $0x3f] sm:$0xfe] %vm1015_vm6, %v924_v38 }
  0xb8   : > { %1026 = vst.msk [vmem:[#allocation2 + $0x47] sm:$0xff] %vm1017_vm9, %v926_v39  ;;  %2839 = vmatprep.mubr.msk.f32.mxu1 %vm1141_vm10, %v3621_v40 }
  0xb9   : > { %2840 = vmatmul.mubr.msk.f32.gmra.mrb[4].mxu1 %vm1141_vm10, %v3623_v34  ;;  %2892 = vmatmul.mubr.msk.f32.gmra.mrb[4].mxu0 %vm1141_vm10, %v3593_v29 }
  0xba   : > { %2894 = vmatprep.mubr.msk.f32.mxu0 %vm1141_vm10, %v3621_v40  ;;  %v782_v41 = vpop.permute.xlu0 %781 }
  0xbb   : > { %v784_v42 = vpop.permute.xlu1 %783  ;;  %881 = vst.msk [vmem:[#allocation2 + $0x51] sm:$0xff] %vm869_vm5, %v782_v41 }
  0xbc   : > { %882 = vst.msk [vmem:[#allocation2 + $0x59] sm:$0x7f] %vm871_vm7, %v784_v42 }
  0xbd   : > { %1059 = vst.msk [vmem:[#allocation2 + $0x5f] sm:$0x1] %vm1053_vm8, %v3122_v20  ;;  %2895 = vmatmul.mubr.msk.f32.gmra.mrb[6].mxu0 %vm1141_vm10, %v3623_v34 }
  0xbe   : > { %v928_v43 = vpop.permute.xlu0 %927 }
  0xbf   : > { %v930_v44 = vpop.permute.xlu1 %929  ;;  %v3641_v45 = vld [vmem:[#allocation2 + $0x40] sm:$0xff]  ;;  %v3643_v46 = vld [vmem:[#allocation2 + $0x48] sm:$0xff]  ;;  %1027 = vst.msk [vmem:[#allocation2 + $0x4f] sm:$0xfe] %vm1015_vm6, %v928_v43 }
  0xc0   : > { %1028 = vst.msk [vmem:[#allocation2 + $0x57] sm:$0xff] %vm1017_vm9, %v930_v44  ;;  %2842 = vmatprep.mubr.msk.f32.mxu1 %vm1141_vm10, %v3641_v45  ;;  %2897 = vmatprep.mubr.msk.f32.mxu0 %vm1141_vm10, %v3641_v45 }
  0xc1   : > { %2843 = vmatmul.mubr.msk.f32.gmra.mrb[6].mxu1 %vm1141_vm10, %v3643_v46  ;;  %2898 = vmatmul.mubr.msk.f32.gmra.mrb[8].mxu0 %vm1141_vm10, %v3643_v46 }
  0xc2   : > { %v786_v47 = vpop.permute.xlu0 %785 }
  0xc3   : > { %v788_v0 = vpop.permute.xlu1 %787  ;;  %883 = vst.msk [vmem:[#allocation2 + $0x61] sm:$0xff] %vm869_vm5, %v786_v47 }
  0xc4   : > { %884 = vst.msk [vmem:[#allocation2 + $0x69] sm:$0x7f] %vm871_vm7, %v788_v0 }
  0xc5   : > { %1060 = vst.msk [vmem:[#allocation2 + $0x6f] sm:$0x1] %vm1053_vm8, %v3122_v20 }
  0xc6   : > { %v932_v48 = vpop.permute.xlu0 %931 }
  0xc7   : > { %v934_v51 = vpop.permute.xlu1 %933  ;;  %v1114_v52 = vld [vmem:[#allocation2 + $0x50] sm:$0xff]  ;;  %v3659_v53 = vld [vmem:[#allocation2 + $0x58] sm:$0xff]  ;;  %1029 = vst.msk [vmem:[#allocation2 + $0x5f] sm:$0xfe] %vm1015_vm6, %v932_v48 }
  0xc8   : > { %1030 = vst.msk [vmem:[#allocation2 + $0x67] sm:$0xff] %vm1017_vm9, %v934_v51  ;;  %2845 = vmatprep.mubr.msk.f32.mxu1 %vm1141_vm10, %v1114_v52  ;;  %2900 = vmatprep.mubr.msk.f32.mxu0 %vm1141_vm10, %v1114_v52 }
  0xc9   : > { %2846 = vmatmul.mubr.msk.f32.gmra.mrb[8].mxu1 %vm1141_vm10, %v3659_v53  ;;  %2901 = vmatmul.mubr.msk.f32.gmra.mrb[10].mxu0 %vm1141_vm10, %v3659_v53 }
  0xca   : > { %v790_v54 = vpop.permute.xlu0 %789 }
  0xcb   : > { %v792_v55 = vpop.permute.xlu1 %791  ;;  %885 = vst.msk [vmem:[#allocation2 + $0x71] sm:$0xff] %vm869_vm5, %v790_v54 }
  0xcc   : > { %886 = vst.msk [vmem:[#allocation2 + $0x79] sm:$0x7f] %vm871_vm7, %v792_v55 }
  0xcd   : > { %1061 = vst.msk [vmem:[#allocation2 + $0x7f] sm:$0x1] %vm1053_vm8, %v3122_v20 }
  0xce   : > { %v936_v1 = vpop.permute.xlu0 %935 }
  0xcf   : > { %v938_v56 = vpop.permute.xlu1 %937  ;;  %v1116_v32 = vld [vmem:[#allocation2 + $0x60] sm:$0xff]  ;;  %v1117_v57 = vld [vmem:[#allocation2 + $0x68] sm:$0xff]  ;;  %1031 = vst.msk [vmem:[#allocation2 + $0x6f] sm:$0xfe] %vm1015_vm6, %v936_v1 }
  0xd0   : > { %1032 = vst.msk [vmem:[#allocation2 + $0x77] sm:$0xff] %vm1017_vm9, %v938_v56  ;;  %2848 = vmatprep.mubr.msk.f32.mxu1 %vm1141_vm10, %v1116_v32  ;;  %2903 = vmatprep.mubr.msk.f32.mxu0 %vm1141_vm10, %v1116_v32 }
  0xd1   : > { %2849 = vmatmul.mubr.msk.f32.gmra.mrb[10].mxu1 %vm1141_vm10, %v1117_v57  ;;  %2904 = vmatmul.mubr.msk.f32.gmra.mrb[12].mxu0 %vm1141_vm10, %v1117_v57 }
  0xd2   : > { %v794_v58 = vpop.permute.xlu0 %793 }
  0xd3   : > { %v796_v59 = vpop.permute.xlu1 %795  ;;  %887 = vst.msk [vmem:[#allocation2 + $0x81] sm:$0xff] %vm869_vm5, %v794_v58 }
  0xd4   : > { %888 = vst.msk [vmem:[#allocation2 + $0x89] sm:$0x7f] %vm871_vm7, %v796_v59 }
  0xd5   : > { %1062 = vst.msk [vmem:[#allocation2 + $0x8f] sm:$0x1] %vm1053_vm8, %v3122_v20 }
  0xd6   : > { %v940_v26 = vpop.permute.xlu0 %939 }
  0xd7   : > { %v942_v49 = vpop.permute.xlu1 %941  ;;  %v1118_v61 = vld [vmem:[#allocation2 + $0x70] sm:$0xff]  ;;  %v1119_v50 = vld [vmem:[#allocation2 + $0x78] sm:$0xff]  ;;  %1033 = vst.msk [vmem:[#allocation2 + $0x7f] sm:$0xfe] %vm1015_vm6, %v940_v26 }
  0xd8   : > { %1034 = vst.msk [vmem:[#allocation2 + $0x87] sm:$0xff] %vm1017_vm9, %v942_v49  ;;  %2851 = vmatprep.mubr.msk.f32.mxu1 %vm1141_vm10, %v1118_v61  ;;  %2906 = vmatprep.mubr.msk.f32.mxu0 %vm1141_vm10, %v1118_v61 }
  0xd9   : > { %2852 = vmatmul.mubr.msk.f32.gmra.mrb[12].mxu1 %vm1141_vm10, %v1119_v50  ;;  %2907 = vmatmul.mubr.msk.f32.gmra.mrb[14].mxu0 %vm1141_vm10, %v1119_v50 }
  0xda   : > { %2937 = vmatprep.mubr.msk.f32.mxu0 %vm1141_vm10, %v3591_v28  ;;  %v798_v62 = vpop.permute.xlu0 %797 }
  0xdb   : > { %v800_v60 = vpop.permute.xlu1 %799  ;;  %889 = vst.msk [vmem:[#allocation2 + $0x91] sm:$0xff] %vm869_vm5, %v798_v62 }
  0xdc   : > { %890 = vst.msk [vmem:[#allocation2 + $0x99] sm:$0x7f] %vm871_vm7, %v800_v60 }
  0xdd   : > { %1063 = vst.msk [vmem:[#allocation2 + $0x9f] sm:$0x1] %vm1053_vm8, %v3122_v20  ;;  %2938 = vmatmul.mubr.msk.f32.vlgmr.msra.gmra.mrb[0].mxu0 %vm1141_vm10, %v3593_v29 }
  0xde   : > { %2940 = vmatprep.mubr.msk.f32.mxu0 %vm1141_vm10, %v3621_v40  ;;  %v944_v63 = vpop.permute.xlu0 %943 }
  0xdf   : > { %v946_v2 = vpop.permute.xlu1 %945  ;;  %v3699_v3 = vld [vmem:[#allocation2 + $0x80] sm:$0xff]  ;;  %v3701_v4 = vld [vmem:[#allocation2 + $0x88] sm:$0xff]  ;;  %1035 = vst.msk [vmem:[#allocation2 + $0x8f] sm:$0xfe] %vm1015_vm6, %v944_v63 }
  0xe0   : > { %1036 = vst.msk [vmem:[#allocation2 + $0x97] sm:$0xff] %vm1017_vm9, %v946_v2  ;;  %2854 = vmatprep.mubr.msk.f32.mxu1 %vm1141_vm10, %v3699_v3 }
  0xe1   : > { %2855 = vmatmul.mubr.msk.f32.gmra.mrb[14].mxu1 %vm1141_vm10, %v3701_v4  ;;  %2941 = vmatmul.mubr.msk.f32.gmra.mrb[2].mxu0 %vm1141_vm10, %v3623_v34 }
  0xe2   : > { %2943 = vmatprep.mubr.msk.f32.mxu0 %vm1141_vm10, %v3641_v45  ;;  %v802_v5 = vpop.permute.xlu0 %801 }
  0xe3   : > { %v804_v6 = vpop.permute.xlu1 %803  ;;  %891 = vst.msk [vmem:[#allocation2 + $0xa1] sm:$0xff] %vm869_vm5, %v802_v5 }
  0xe4   : > { %892 = vst.msk [vmem:[#allocation2 + $0xa9] sm:$0x7f] %vm871_vm7, %v804_v6 }
  0xe5   : > { %1064 = vst.msk [vmem:[#allocation2 + $0xaf] sm:$0x1] %vm1053_vm8, %v3122_v20  ;;  %2944 = vmatmul.mubr.msk.f32.gmra.mrb[4].mxu0 %vm1141_vm10, %v3643_v46 }
  0xe6   : > { %2946 = vmatprep.mubr.msk.f32.mxu0 %vm1141_vm10, %v1114_v52  ;;  %v948_v7 = vpop.permute.xlu0 %947 }
  0xe7   : > { %v950_v8 = vpop.permute.xlu1 %949  ;;  %v3720_v9 = vld [vmem:[#allocation2 + $0x90] sm:$0xff]  ;;  %v3722_v10 = vld [vmem:[#allocation2 + $0x98] sm:$0xff]  ;;  %1037 = vst.msk [vmem:[#allocation2 + $0x9f] sm:$0xfe] %vm1015_vm6, %v948_v7 }
  0xe8   : > { %1038 = vst.msk [vmem:[#allocation2 + $0xa7] sm:$0xff] %vm1017_vm9, %v950_v8  ;;  %2857 = vmatprep.mubr.msk.f32.mxu1 %vm1141_vm10, %v3720_v9 }
  0xe9   : > { %2858 = vmatmul.mubr.msk.f32.gmra.mrb[16].mxu1 %vm1141_vm10, %v3722_v10  ;;  %2947 = vmatmul.mubr.msk.f32.gmra.mrb[6].mxu0 %vm1141_vm10, %v3659_v53 }
  0xea   : > { %2949 = vmatprep.mubr.msk.f32.mxu0 %vm1141_vm10, %v1116_v32  ;;  %v806_v11 = vpop.permute.xlu0 %805 }
  0xeb   : > { %v808_v12 = vpop.permute.xlu1 %807  ;;  %893 = vst.msk [vmem:[#allocation2 + $0xb1] sm:$0xff] %vm869_vm5, %v806_v11 }
  0xec   : > { %894 = vst.msk [vmem:[#allocation2 + $0xb9] sm:$0x7f] %vm871_vm7, %v808_v12 }
  0xed   : > { %1065 = vst.msk [vmem:[#allocation2 + $0xbf] sm:$0x1] %vm1053_vm8, %v3122_v20  ;;  %2950 = vmatmul.mubr.msk.f32.gmra.mrb[8].mxu0 %vm1141_vm10, %v1117_v57 }
  0xee   : > { %2952 = vmatprep.mubr.msk.f32.mxu0 %vm1141_vm10, %v1118_v61  ;;  %v952_v13 = vpop.permute.xlu0 %951 }
  0xef   : > { %v954_v14 = vpop.permute.xlu1 %953  ;;  %v3739_v15 = vld [vmem:[#allocation2 + $0xa0] sm:$0xff]  ;;  %v3741_v16 = vld [vmem:[#allocation2 + $0xa8] sm:$0xff]  ;;  %1039 = vst.msk [vmem:[#allocation2 + $0xaf] sm:$0xfe] %vm1015_vm6, %v952_v13 }
  0xf0   : > { %1040 = vst.msk [vmem:[#allocation2 + $0xb7] sm:$0xff] %vm1017_vm9, %v954_v14  ;;  %2860 = vmatprep.mubr.msk.f32.mxu1 %vm1141_vm10, %v3739_v15 }
  0xf1   : > { %2861 = vmatmul.mubr.msk.f32.gmra.mrb[18].mxu1 %vm1141_vm10, %v3741_v16  ;;  %2953 = vmatmul.mubr.msk.f32.gmra.mrb[10].mxu0 %vm1141_vm10, %v1119_v50 }
  0xf2   : > { %2955 = vmatprep.mubr.msk.f32.mxu0 %vm1141_vm10, %v3699_v3  ;;  %v810_v17 = vpop.permute.xlu0 %809 }
  0xf3   : > { %v812_v18 = vpop.permute.xlu1 %811  ;;  %895 = vst.msk [vmem:[#allocation2 + $0xc1] sm:$0xff] %vm869_vm5, %v810_v17 }
  0xf4   : > { %896 = vst.msk [vmem:[#allocation2 + $0xc9] sm:$0x7f] %vm871_vm7, %v812_v18 }
  0xf5   : > { %1066 = vst.msk [vmem:[#allocation2 + $0xcf] sm:$0x1] %vm1053_vm8, %v3122_v20  ;;  %2956 = vmatmul.mubr.msk.f32.gmra.mrb[12].mxu0 %vm1141_vm10, %v3701_v4 }
  0xf6   : > { %2958 = vmatprep.mubr.msk.f32.mxu0 %vm1141_vm10, %v3720_v9  ;;  %v956_v19 = vpop.permute.xlu0 %955 }
  0xf7   : > { %v958_v21 = vpop.permute.xlu1 %957  ;;  %v3760_v22 = vld [vmem:[#allocation2 + $0xb0] sm:$0xff]  ;;  %v3762_v23 = vld [vmem:[#allocation2 + $0xb8] sm:$0xff]  ;;  %1041 = vst.msk [vmem:[#allocation2 + $0xbf] sm:$0xfe] %vm1015_vm6, %v956_v19 }
  0xf8   : > { %1042 = vst.msk [vmem:[#allocation2 + $0xc7] sm:$0xff] %vm1017_vm9, %v958_v21  ;;  %2863 = vmatprep.mubr.msk.f32.mxu1 %vm1141_vm10, %v3760_v22 }
  0xf9   : > { %2864 = vmatmul.mubr.msk.f32.gmra.mrb[20].mxu1 %vm1141_vm10, %v3762_v23  ;;  %2959 = vmatmul.mubr.msk.f32.gmra.mrb[14].mxu0 %vm1141_vm10, %v3722_v10 }
  0xfa   : > { %2961 = vmatprep.mubr.msk.f32.mxu0 %vm1141_vm10, %v3739_v15  ;;  %v814_v24 = vpop.permute.xlu0 %813 }
  0xfb   : > { %v816_v25 = vpop.permute.xlu1 %815  ;;  %897 = vst.msk [vmem:[#allocation2 + $0xd1] sm:$0xff] %vm869_vm5, %v814_v24 }
  0xfc   : > { %898 = vst.msk [vmem:[#allocation2 + $0xd9] sm:$0x7f] %vm871_vm7, %v816_v25 }
  0xfd   : > { %1067 = vst.msk [vmem:[#allocation2 + $0xdf] sm:$0x1] %vm1053_vm8, %v3122_v20  ;;  %2962 = vmatmul.mubr.msk.f32.gmra.mrb[16].mxu0 %vm1141_vm10, %v3741_v16 }
  0xfe   : > { %2964 = vmatprep.mubr.msk.f32.mxu0 %vm1141_vm10, %v3760_v22  ;;  %v960_v27 = vpop.permute.xlu0 %959 }
  0xff   : > { %v962_v28 = vpop.permute.xlu1 %961  ;;  %v3782_v29 = vld [vmem:[#allocation2 + $0xc0] sm:$0xff]  ;;  %v3784_v30 = vld [vmem:[#allocation2 + $0xc8] sm:$0xff]  ;;  %1043 = vst.msk [vmem:[#allocation2 + $0xcf] sm:$0xfe] %vm1015_vm6, %v960_v27 }
 0x100   : > { %1044 = vst.msk [vmem:[#allocation2 + $0xd7] sm:$0xff] %vm1017_vm9, %v962_v28  ;;  %2866 = vmatprep.mubr.msk.f32.mxu1 %vm1141_vm10, %v3782_v29 }
 0x101   : > { %2867 = vmatmul.mubr.msk.f32.gmra.mrb[22].mxu1 %vm1141_vm10, %v3784_v30  ;;  %2965 = vmatmul.mubr.msk.f32.gmra.mrb[18].mxu0 %vm1141_vm10, %v3762_v23 }
 0x102   : > { %2967 = vmatprep.mubr.msk.f32.mxu0 %vm1141_vm10, %v3782_v29  ;;  %v818_v31 = vpop.permute.xlu0 %817 }
 0x103   : > { %v820_v33 = vpop.permute.xlu1 %819  ;;  %899 = vst.msk [vmem:[#allocation2 + $0xe1] sm:$0xff] %vm869_vm5, %v818_v31 }
 0x104   : > { %900 = vst.msk [vmem:[#allocation2 + $0xe9] sm:$0x7f] %vm871_vm7, %v820_v33 }
 0x105   : > { %1068 = vst.msk [vmem:[#allocation2 + $0xef] sm:$0x1] %vm1053_vm8, %v3122_v20  ;;  %2968 = vmatmul.mubr.msk.f32.gmra.mrb[20].mxu0 %vm1141_vm10, %v3784_v30 }
 0x106   : > { %v964_v35 = vpop.permute.xlu0 %963 }
 0x107   : > { %v966_v36 = vpop.permute.xlu1 %965  ;;  %v3802_v37 = vld [vmem:[#allocation2 + $0xd0] sm:$0xff]  ;;  %v3804_v38 = vld [vmem:[#allocation2 + $0xd8] sm:$0xff]  ;;  %1045 = vst.msk [vmem:[#allocation2 + $0xdf] sm:$0xfe] %vm1015_vm6, %v964_v35 }
 0x108   : > { %1046 = vst.msk [vmem:[#allocation2 + $0xe7] sm:$0xff] %vm1017_vm9, %v966_v36  ;;  %2869 = vmatprep.mubr.msk.f32.mxu1 %vm1141_vm10, %v3802_v37  ;;  %2970 = vmatprep.mubr.msk.f32.mxu0 %vm1141_vm10, %v3802_v37 }
 0x109   : > { %2870 = vmatmul.mubr.msk.f32.gmra.mrb[24].mxu1 %vm1141_vm10, %v3804_v38  ;;  %2971 = vmatmul.mubr.msk.f32.gmra.mrb[22].mxu0 %vm1141_vm10, %v3804_v38 }
 0x10a   : > { %v822_v39 = vpop.permute.xlu0 %821 }
 0x10b   : > { %v824_v40 = vpop.permute.xlu1 %823  ;;  %901 = vst.msk [vmem:[#allocation2 + $0xf1] sm:$0xff] %vm869_vm5, %v822_v39 }
 0x10c   : > { %902 = vst.msk [vmem:[#allocation2 + $0xf9] sm:$0x7f] %vm871_vm7, %v824_v40 }
 0x10d   : > { %1069 = vst.msk [vmem:[#allocation2 + $0xff] sm:$0x1] %vm1053_vm8, %v3122_v20 }
 0x10e   : > { %v968_v34 = vpop.permute.xlu0 %967 }
 0x10f   : > { %v970_v41 = vpop.permute.xlu1 %969  ;;  %v1132_v42 = vld [vmem:[#allocation2 + $0xe0] sm:$0xff]  ;;  %v1133_v43 = vld [vmem:[#allocation2 + $0xe8] sm:$0xff]  ;;  %1047 = vst.msk [vmem:[#allocation2 + $0xef] sm:$0xfe] %vm1015_vm6, %v968_v34 }
 0x110   : > { %1048 = vst.msk [vmem:[#allocation2 + $0xf7] sm:$0xff] %vm1017_vm9, %v970_v41  ;;  %2872 = vmatprep.mubr.msk.f32.mxu1 %vm1141_vm10, %v1132_v42  ;;  %2973 = vmatprep.mubr.msk.f32.mxu0 %vm1141_vm10, %v1132_v42 }
 0x111   : > { %2873 = vmatmul.mubr.msk.f32.gmra.mrb[26].mxu1 %vm1141_vm10, %v1133_v43  ;;  %2974 = vmatmul.mubr.msk.f32.gmra.mrb[24].mxu0 %vm1141_vm10, %v1133_v43 }
 0x112   : > { %v826_v44 = vpop.permute.xlu0 %825 }
 0x113   : > { %v828_v45 = vpop.permute.xlu1 %827  ;;  %903 = vst.msk [vmem:[#allocation2 + $0x101] sm:$0xff] %vm869_vm5, %v826_v44 }
 0x114   : > { %904 = vst.msk [vmem:[#allocation2 + $0x109] sm:$0x7f] %vm871_vm7, %v828_v45 }
 0x115   : > { %1070 = vst.msk [vmem:[#allocation2 + $0x10f] sm:$0x1] %vm1053_vm8, %v3122_v20 }
 0x116   : > { %v972_v46 = vpop.permute.xlu0 %971 }
 0x117   : > { %v974_v47 = vpop.permute.xlu1 %973  ;;  %v1134_v0 = vld [vmem:[#allocation2 + $0xf0] sm:$0xff]  ;;  %v1135_v48 = vld [vmem:[#allocation2 + $0xf8] sm:$0xff]  ;;  %1049 = vst.msk [vmem:[#allocation2 + $0xff] sm:$0xfe] %vm1015_vm6, %v972_v46 }
 0x118   : > { %1050 = vst.msk [vmem:[#allocation2 + $0x107] sm:$0xff] %vm1017_vm9, %v974_v47  ;;  %2875 = vmatprep.mubr.msk.f32.mxu1 %vm1141_vm10, %v1134_v0  ;;  %2976 = vmatprep.mubr.msk.f32.mxu0 %vm1141_vm10, %v1134_v0 }
 0x119   : > { %2876 = vmatmul.mubr.msk.f32.gmra.mrb[28].mxu1 %vm1141_vm10, %v1135_v48  ;;  %2977 = vmatmul.mubr.msk.f32.gmra.mrb[26].mxu0 %vm1141_vm10, %v1135_v48 }
 0x11a   : > { %v830_v51 = vpop.permute.xlu0 %829 }
 0x11b   : > { %v832_v52 = vpop.permute.xlu1 %831  ;;  %905 = vst.msk [vmem:[#allocation2 + $0x111] sm:$0xff] %vm869_vm5, %v830_v51 }
 0x11c   : > { %906 = vst.msk [vmem:[#allocation2 + $0x119] sm:$0x7f] %vm871_vm7, %v832_v52 }
 0x11d   : > { %1071 = vst.msk [vmem:[#allocation2 + $0x11f] sm:$0x1] %vm1053_vm8, %v3122_v20 }
 0x11e   : > { %v976_v55 = vpop.permute.xlu0 %975 }
 0x11f   : > { %v1136_v53 = vld [vmem:[#allocation2 + $0x100] sm:$0xff]  ;;  %v1137_v54 = vld [vmem:[#allocation2 + $0x108] sm:$0xff]  ;;  %1051 = vst.msk [vmem:[#allocation2 + $0x10f] sm:$0xfe] %vm1015_vm6, %v976_v55  ;;  %v978_v1 = vpop.permute.xlu1 %977 }
 0x120   : > { %2878 = vmatprep.mubr.msk.f32.mxu1 %vm1141_vm10, %v1136_v53  ;;  %2979 = vmatprep.mubr.msk.f32.mxu0 %vm1141_vm10, %v1136_v53  ;;  %1052 = vst.msk [vmem:[#allocation2 + $0x117] sm:$0xff] %vm1017_vm9, %v978_v1 }
 0x121   : > { %2879 = vmatmul.mubr.msk.f32.gmra.mrb[30].mxu1 %vm1141_vm10, %v1137_v54  ;;  %2980 = vmatmul.mubr.msk.f32.gmra.mrb[28].mxu0 %vm1141_vm10, %v1137_v54 }
 0x122   : > { %2909 = vmatprep.mubr.msk.f32.mxu1 %vm1141_vm10, %v3699_v3 }
 0x125   : > { %2910 = vmatmul.mubr.msk.f32.vlgmr.msra.gmra.mrb[16].mxu1 %vm1141_vm10, %v3701_v4 }
 0x126   : > { %2912 = vmatprep.mubr.msk.f32.mxu1 %vm1141_vm10, %v3720_v9 }
 0x127   : > { %v1822_v20 = vld [vmem:[#allocation2 + $0x110] sm:$0xff]  ;;  %v1823_v56 = vld [vmem:[#allocation2 + $0x118] sm:$0xff] }
 0x128   : > { %2982 = vmatprep.mubr.msk.f32.mxu0 %vm1141_vm10, %v1822_v20 }
 0x129   : > { %2913 = vmatmul.mubr.msk.f32.gmra.mrb[18].mxu1 %vm1141_vm10, %v3722_v10  ;;  %2983 = vmatmul.mubr.msk.f32.gmra.mrb[30].mxu0 %vm1141_vm10, %v1823_v56 }
 0x12a   : > { %2915 = vmatprep.mubr.msk.f32.mxu1 %vm1141_vm10, %v3739_v15 }
 0x12d   : > { %2916 = vmatmul.mubr.msk.f32.gmra.mrb[20].mxu1 %vm1141_vm10, %v3741_v16 }
 0x12e   : > { %2918 = vmatprep.mubr.msk.f32.mxu1 %vm1141_vm10, %v3760_v22 }
 0x131   : > { %2919 = vmatmul.mubr.msk.f32.gmra.mrb[22].mxu1 %vm1141_vm10, %v3762_v23 }
 0x132   : > { %2921 = vmatprep.mubr.msk.f32.mxu1 %vm1141_vm10, %v3782_v29 }
 0x135   : > { %2922 = vmatmul.mubr.msk.f32.gmra.mrb[24].mxu1 %vm1141_vm10, %v3784_v30 }
 0x136   : > { %2924 = vmatprep.mubr.msk.f32.mxu1 %vm1141_vm10, %v3802_v37 }
 0x139   : > { %2925 = vmatmul.mubr.msk.f32.gmra.mrb[26].mxu1 %vm1141_vm10, %v3804_v38 }
 0x13a   : > { %2927 = vmatprep.mubr.msk.f32.mxu1 %vm1141_vm10, %v1132_v42 }
 0x13d   : > { %2928 = vmatmul.mubr.msk.f32.gmra.mrb[28].mxu1 %vm1141_vm10, %v1133_v43 }
 0x13e   : > { %2930 = vmatprep.mubr.msk.f32.mxu1 %vm1141_vm10, %v1134_v0 }
 0x141   : > { %2931 = vmatmul.mubr.msk.f32.gmra.mrb[30].mxu1 %vm1141_vm10, %v1135_v48 }
 0x178   : > { %v2835_v32 = vpop.f32.mrb[0].mxu1 }
 0x179   : > { %v1308_v57 = vpop.f32.mrb[1].mxu1 }
 0x180   : > { %v2838_v58 = vpop.f32.mrb[2].mxu1 }
 0x181   : > { %v1318_v59 = vpop.f32.mrb[3].mxu1 }
 0x18c   : > { %v2841_v26 = vpop.f32.mrb[4].mxu1 }
 0x18d   : > { %v1328_v49 = vpop.f32.mrb[5].mxu1 }
 0x194   : > { %v2844_v61 = vpop.f32.mrb[6].mxu1 }
 0x195   : > { %v1338_v50 = vpop.f32.mrb[7].mxu1 }
 0x19c   : > { %v2847_v62 = vpop.f32.mrb[8].mxu1 }
 0x19d   : > { %v1348_v60 = vpop.f32.mrb[9].mxu1 }
 0x1a4   : > { %v2850_v63 = vpop.f32.mrb[10].mxu1 }
 0x1a5   : > { %v1358_v2 = vpop.f32.mrb[11].mxu1 }
 0x1ac   : > { %v2853_v3 = vpop.f32.mrb[12].mxu1 }
 0x1ad   : > { %v1368_v4 = vpop.f32.mrb[13].mxu1 }
 0x1b0   : > { %v2939_v5 = vpop.f32.mrb[0].mxu0 }
 0x1b1   : > { %v3882_v6 = vadd.f32 %v2939_v5, %v2835_v32  ;;  %v1992_v7 = vpop.f32.mrb[1].mxu0 }
 0x1b2   : > { %v3884_v8 = vadd.f32 %v1992_v7, %v1308_v57 }
 0x1b3   : > { %2184 = vst.msk [vmem:[%s3880_s18 + $0x8] sm:$0xff] %vm631_vm0, %v3882_v6  ;;  %v2216_v28 = vsel %vm631_vm0, %v3882_v6, 0.0 }
 0x1b4   : > { %2183 = vst.msk [vmem:[%s3880_s18] sm:$0xff] %vm631_vm0, %v3884_v8  ;;  %v2856_v9 = vpop.f32.mrb[14].mxu1  ;;  %v2942_v10 = vpop.f32.mrb[2].mxu0  ;;  %v2215_v29 = vsel %vm631_vm0, %v3884_v8, 0.0 }
 0x1b5   : > { %v3892_v11 = vadd.f32 %v2942_v10, %v2838_v58  ;;  %v1378_v12 = vpop.f32.mrb[15].mxu1  ;;  %v2002_v13 = vpop.f32.mrb[3].mxu0  ;;  %v2217_v35 = vadd.f32 %v2216_v28, %v2215_v29 }
 0x1b6   : > { %v3894_v14 = vadd.f32 %v2002_v13, %v1318_v59 }
 0x1b7   : > { %2186 = vst.msk [vmem:[%s3880_s18 + $0x18] sm:$0xff] %vm631_vm0, %v3892_v11  ;;  %v2220_v42 = vsel %vm631_vm0, %v3892_v11, 0.0 }
 0x1b8   : > { %2185 = vst.msk [vmem:[%s3880_s18 + $0x10] sm:$0xff] %vm631_vm0, %v3894_v14  ;;  %v2945_v15 = vpop.f32.mrb[4].mxu0  ;;  %v2218_v31 = vsel %vm631_vm0, %v3894_v14, 0.0 }
 0x1b9   : > { %v3902_v16 = vadd.f32 %v2945_v15, %v2841_v26  ;;  %v2012_v17 = vpop.f32.mrb[5].mxu0  ;;  %v2219_v39 = vadd.f32 %v2218_v31, %v2217_v35 }
 0x1ba   : > { %v3904_v18 = vadd.f32 %v2012_v17, %v1328_v49 }
 0x1bb   : > { %2188 = vst.msk [vmem:[%s3880_s18 + $0x28] sm:$0xff] %vm631_vm0, %v3902_v16  ;;  %v2221_v44 = vadd.f32 %v2220_v42, %v2219_v39  ;;  %v2224_v54 = vsel %vm631_vm0, %v3902_v16, 0.0 }
 0x1bc   : > { %2187 = vst.msk [vmem:[%s3880_s18 + $0x20] sm:$0xff] %vm631_vm0, %v3904_v18  ;;  %v2948_v19 = vpop.f32.mrb[6].mxu0  ;;  %v2222_v45 = vsel %vm631_vm0, %v3904_v18, 0.0 }
 0x1bd   : > { %v3912_v21 = vadd.f32 %v2948_v19, %v2844_v61  ;;  %v2022_v22 = vpop.f32.mrb[7].mxu0  ;;  %v2223_v51 = vadd.f32 %v2222_v45, %v2221_v44 }
 0x1be   : > { %v3914_v23 = vadd.f32 %v2022_v22, %v1338_v50 }
 0x1bf   : > { %2190 = vst.msk [vmem:[%s3880_s18 + $0x38] sm:$0xff] %vm631_vm0, %v3912_v21  ;;  %v2225_v55 = vadd.f32 %v2224_v54, %v2223_v51  ;;  %v2228_v59 = vsel %vm631_vm0, %v3912_v21, 0.0 }
 0x1c0   : > { %2189 = vst.msk [vmem:[%s3880_s18 + $0x30] sm:$0xff] %vm631_vm0, %v3914_v23  ;;  %v2951_v24 = vpop.f32.mrb[8].mxu0  ;;  %v2226_v1 = vsel %vm631_vm0, %v3914_v23, 0.0 }
 0x1c1   : > { %v3922_v25 = vadd.f32 %v2951_v24, %v2847_v62  ;;  %v2032_v27 = vpop.f32.mrb[9].mxu0  ;;  %v2227_v32 = vadd.f32 %v2226_v1, %v2225_v55 }
 0x1c2   : > { %v3928_v30 = vadd.f32 %v2032_v27, %v1348_v60 }
 0x1c3   : > { %2192 = vst.msk [vmem:[%s3880_s18 + $0x48] sm:$0xff] %vm631_vm0, %v3922_v25  ;;  %v2229_v26 = vadd.f32 %v2228_v59, %v2227_v32  ;;  %v2232_v60 = vsel %vm631_vm0, %v3922_v25, 0.0 }
 0x1c4   : > { %2191 = vst.msk [vmem:[%s3880_s18 + $0x40] sm:$0xff] %vm631_vm0, %v3928_v30  ;;  %v2954_v33 = vpop.f32.mrb[10].mxu0  ;;  %v2230_v49 = vsel %vm631_vm0, %v3928_v30, 0.0 }
 0x1c5   : > { %v3938_v36 = vadd.f32 %v2954_v33, %v2850_v63  ;;  %v2042_v37 = vpop.f32.mrb[11].mxu0  ;;  %v2231_v62 = vadd.f32 %v2230_v49, %v2229_v26 }
 0x1c6   : > { %v3940_v38 = vadd.f32 %v2042_v37, %v1358_v2 }
 0x1c7   : > { %2194 = vst.msk [vmem:[%s3880_s18 + $0x58] sm:$0xff] %vm631_vm0, %v3938_v36  ;;  %v2233_v63 = vadd.f32 %v2232_v60, %v2231_v62  ;;  %v2236_v7 = vsel %vm631_vm0, %v3938_v36, 0.0 }
 0x1c8   : > { %2193 = vst.msk [vmem:[%s3880_s18 + $0x50] sm:$0xff] %vm631_vm0, %v3940_v38  ;;  %v2957_v40 = vpop.f32.mrb[12].mxu0  ;;  %v2234_v2 = vsel %vm631_vm0, %v3940_v38, 0.0 }
 0x1c9   : > { %v3948_v34 = vadd.f32 %v2957_v40, %v2853_v3  ;;  %v2052_v41 = vpop.f32.mrb[13].mxu0  ;;  %v2235_v5 = vadd.f32 %v2234_v2, %v2233_v63 }
 0x1ca   : > { %v3952_v43 = vadd.f32 %v2052_v41, %v1368_v4 }
 0x1cb   : > { %2196 = vst.msk [vmem:[%s3880_s18 + $0x68] sm:$0xff] %vm631_vm0, %v3948_v34  ;;  %v2240_v17 = vsel %vm631_vm0, %v3948_v34, 0.0 }
 0x1cc   : > { %2195 = vst.msk [vmem:[%s3880_s18 + $0x60] sm:$0xff] %vm631_vm0, %v3952_v43  ;;  %v2960_v46 = vpop.f32.mrb[14].mxu0  ;;  %v2238_v10 = vsel %vm631_vm0, %v3952_v43, 0.0 }
 0x1cd   : > { %v3962_v47 = vadd.f32 %v2960_v46, %v2856_v9  ;;  %v2062_v0 = vpop.f32.mrb[15].mxu0  ;;  %v2237_v9 = vadd.f32 %v2236_v7, %v2235_v5 }
 0x1ce   : > { %v3964_v48 = vadd.f32 %v2062_v0, %v1378_v12 }
 0x1cf   : > { %2198 = vst.msk [vmem:[%s3880_s18 + $0x78] sm:$0xff] %vm631_vm0, %v3962_v47  ;;  %v2239_v15 = vadd.f32 %v2238_v10, %v2237_v9  ;;  %v2244_v35 = vsel %vm631_vm0, %v3962_v47, 0.0 }
 0x1d0   : > { %2197 = vst.msk [vmem:[%s3880_s18 + $0x70] sm:$0xff] %vm631_vm0, %v3964_v48  ;;  %v2963_v52 = vpop.f32.mrb[16].mxu0  ;;  %v2242_v22 = vsel %vm631_vm0, %v3964_v48, 0.0 }
 0x1d1   : > { %v2072_v53 = vpop.f32.mrb[17].mxu0  ;;  %v2241_v19 = vadd.f32 %v2240_v17, %v2239_v15 }
 0x1d3   : > { %v2243_v28 = vadd.f32 %v2242_v22, %v2241_v19 }
 0x1d4   : > { %v2966_v20 = vpop.f32.mrb[18].mxu0 }
 0x1d5   : > { %v2082_v56 = vpop.f32.mrb[19].mxu0  ;;  %v2245_v39 = vadd.f32 %v2244_v35, %v2243_v28 }
 0x1d8   : > { %v2969_v57 = vpop.f32.mrb[20].mxu0 }
 0x1d9   : > { %v2092_v58 = vpop.f32.mrb[21].mxu0 }
 0x1dc   : > { %v2972_v61 = vpop.f32.mrb[22].mxu0 }
 0x1dd   : > { %v2102_v50 = vpop.f32.mrb[23].mxu0 }
 0x1e4   : > { %v2975_v3 = vpop.f32.mrb[24].mxu0 }
 0x1e5   : > { %v2112_v4 = vpop.f32.mrb[25].mxu0 }
 0x1ec   : > { %v2978_v12 = vpop.f32.mrb[26].mxu0 }
 0x1ed   : > { %v3988_v13 = vpop.f32.mrb[27].mxu0 }
 0x1f4   : > { %v3994_v24 = vpop.f32.mrb[28].mxu0 }
 0x1f5   : > { %v3996_v27 = vpop.f32.mrb[29].mxu0 }
 0x1f8   : > { %v2911_v29 = vpop.f32.mrb[16].mxu1 }
 0x1f9   : > { %v3998_v31 = vadd.f32 %v2963_v52, %v2911_v29  ;;  %v1712_v33 = vpop.f32.mrb[17].mxu1 }
 0x1fa   : > { %v4002_v37 = vadd.f32 %v2072_v53, %v1712_v33 }
 0x1fb   : > { %2200 = vst.msk [vmem:[%s3880_s18 + $0x88] sm:$0xff] %vm631_vm0, %v3998_v31  ;;  %v2248_v0 = vsel %vm631_vm0, %v3998_v31, 0.0 }
 0x1fc   : > { %2199 = vst.msk [vmem:[%s3880_s18 + $0x80] sm:$0xff] %vm631_vm0, %v4002_v37  ;;  %v2246_v40 = vsel %vm631_vm0, %v4002_v37, 0.0  ;;  %v2914_v41 = vpop.f32.mrb[18].mxu1  ;;  %v2984_v46 = vpop.f32.mrb[30].mxu0 }
 0x1fd   : > { %v2247_v42 = vadd.f32 %v2246_v40, %v2245_v39  ;;  %v4012_v44 = vadd.f32 %v2966_v20, %v2914_v41  ;;  %v1722_v45 = vpop.f32.mrb[19].mxu1  ;;  %v2142_v52 = vpop.f32.mrb[31].mxu0 }
 0x1fe   : > { %v4016_v51 = vadd.f32 %v2082_v56, %v1722_v45 }
 0x1ff   : > { %2202 = vst.msk [vmem:[%s3880_s18 + $0x98] sm:$0xff] %vm631_vm0, %v4012_v44  ;;  %v2249_v53 = vadd.f32 %v2248_v0, %v2247_v42  ;;  %v2252_v56 = vsel %vm631_vm0, %v4012_v44, 0.0 }
 0x200   : > { %2201 = vst.msk [vmem:[%s3880_s18 + $0x90] sm:$0xff] %vm631_vm0, %v4016_v51  ;;  %v2250_v54 = vsel %vm631_vm0, %v4016_v51, 0.0  ;;  %v2917_v55 = vpop.f32.mrb[20].mxu1 }
 0x201   : > { %v2251_v1 = vadd.f32 %v2250_v54, %v2249_v53  ;;  %v4026_v20 = vadd.f32 %v2969_v57, %v2917_v55  ;;  %v1732_v32 = vpop.f32.mrb[21].mxu1 }
 0x202   : > { %v4030_v59 = vadd.f32 %v2092_v58, %v1732_v32 }
 0x203   : > { %2204 = vst.msk [vmem:[%s3880_s18 + $0xa8] sm:$0xff] %vm631_vm0, %v4026_v20  ;;  %v2253_v26 = vadd.f32 %v2252_v56, %v2251_v1  ;;  %v2256_v58 = vsel %vm631_vm0, %v4026_v20, 0.0 }
 0x204   : > { %2203 = vst.msk [vmem:[%s3880_s18 + $0xa0] sm:$0xff] %vm631_vm0, %v4030_v59  ;;  %v2254_v49 = vsel %vm631_vm0, %v4030_v59, 0.0  ;;  %v2920_v62 = vpop.f32.mrb[22].mxu1 }
 0x205   : > { %v2255_v57 = vadd.f32 %v2254_v49, %v2253_v26  ;;  %v4040_v60 = vadd.f32 %v2972_v61, %v2920_v62  ;;  %v1742_v63 = vpop.f32.mrb[23].mxu1 }
 0x206   : > { %v4044_v2 = vadd.f32 %v2102_v50, %v1742_v63 }
 0x207   : > { %2206 = vst.msk [vmem:[%s3880_s18 + $0xb8] sm:$0xff] %vm631_vm0, %v4040_v60  ;;  %v2257_v5 = vadd.f32 %v2256_v58, %v2255_v57  ;;  %v2260_v50 = vsel %vm631_vm0, %v4040_v60, 0.0 }
 0x208   : > { %2205 = vst.msk [vmem:[%s3880_s18 + $0xb0] sm:$0xff] %vm631_vm0, %v4044_v2  ;;  %v2258_v7 = vsel %vm631_vm0, %v4044_v2, 0.0  ;;  %v2923_v9 = vpop.f32.mrb[24].mxu1 }
 0x209   : > { %v2259_v61 = vadd.f32 %v2258_v7, %v2257_v5  ;;  %v3029_v10 = vadd.f32 %v2975_v3, %v2923_v9  ;;  %v1752_v15 = vpop.f32.mrb[25].mxu1 }
 0x20a   : > { %v3030_v17 = vadd.f32 %v2112_v4, %v1752_v15 }
 0x20b   : > { %2208 = vst.msk [vmem:[%s3880_s18 + $0xc8] sm:$0xff] %vm631_vm0, %v3029_v10  ;;  %v2261_v19 = vadd.f32 %v2260_v50, %v2259_v61  ;;  %v2264_v3 = vsel %vm631_vm0, %v3029_v10, 0.0 }
 0x20c   : > { %2207 = vst.msk [vmem:[%s3880_s18 + $0xc0] sm:$0xff] %vm631_vm0, %v3030_v17  ;;  %v2262_v22 = vsel %vm631_vm0, %v3030_v17, 0.0  ;;  %v2926_v28 = vpop.f32.mrb[26].mxu1 }
 0x20d   : > { %v2263_v29 = vadd.f32 %v2262_v22, %v2261_v19  ;;  %v3031_v33 = vadd.f32 %v2978_v12, %v2926_v28  ;;  %v1762_v35 = vpop.f32.mrb[27].mxu1 }
 0x20e   : > { %v3032_v39 = vadd.f32 %v3988_v13, %v1762_v35 }
 0x20f   : > { %2210 = vst.msk [vmem:[%s3880_s18 + $0xd8] sm:$0xff] %vm631_vm0, %v3031_v33  ;;  %v2265_v4 = vadd.f32 %v2264_v3, %v2263_v29  ;;  %v2268_v0 = vsel %vm631_vm0, %v3031_v33, 0.0 }
 0x210   : > { %2209 = vst.msk [vmem:[%s3880_s18 + $0xd0] sm:$0xff] %vm631_vm0, %v3032_v39  ;;  %v2266_v40 = vsel %vm631_vm0, %v3032_v39, 0.0  ;;  %v2929_v41 = vpop.f32.mrb[28].mxu1 }
 0x211   : > { %v2267_v42 = vadd.f32 %v2266_v40, %v2265_v4  ;;  %v3033_v45 = vadd.f32 %v3994_v24, %v2929_v41  ;;  %v1772_v12 = vpop.f32.mrb[29].mxu1 }
 0x212   : > { %v3034_v53 = vadd.f32 %v3996_v27, %v1772_v12 }
 0x213   : > { %2212 = vst.msk [vmem:[%s3880_s18 + $0xe8] sm:$0xff] %vm631_vm0, %v3033_v45  ;;  %v2269_v13 = vadd.f32 %v2268_v0, %v2267_v42  ;;  %v2272_v24 = vsel %vm631_vm0, %v3033_v45, 0.0 }
 0x214   : > { %2211 = vst.msk [vmem:[%s3880_s18 + $0xe0] sm:$0xff] %vm631_vm0, %v3034_v53  ;;  %v2270_v54 = vsel %vm631_vm0, %v3034_v53, 0.0  ;;  %v2932_v55 = vpop.f32.mrb[30].mxu1 }
 0x215   : > { %v2271_v1 = vadd.f32 %v2270_v54, %v2269_v13  ;;  %v3035_v32 = vadd.f32 %v2984_v46, %v2932_v55  ;;  %v1782_v56 = vpop.f32.mrb[31].mxu1 }
 0x216   : > { %v3036_v26 = vadd.f32 %v2142_v52, %v1782_v56 }
 0x217   : > { %2214 = vst.msk [vmem:[%s3880_s18 + $0xf8] sm:$0xff] %vm631_vm0, %v3035_v32  ;;  %v2273_v49 = vadd.f32 %v2272_v24, %v2271_v1  ;;  %v2276_v57 = vsel %vm631_vm0, %v3035_v32, 0.0 }
 0x218   : > { %2213 = vst.msk [vmem:[%s3880_s18 + $0xf0] sm:$0xff] %vm631_vm0, %v3036_v26  ;;  %v2274_v27 = vsel %vm631_vm0, %v3036_v26, 0.0 }
 0x219   : > { %v2275_v62 = vadd.f32 %v2274_v27, %v2273_v49 }
 0x21b   : > { %v2277_v63 = vadd.f32 %v2276_v57, %v2275_v62 }
 0x21d   : > { %v2278_v58 = vrot.slane %v2277_v63, 4 }
 0x21f   : > { %v2279_v5 = vadd.f32 %v2278_v58, %v2277_v63 }
 0x221   : > { %v2280_v7 = vrot.slane %v2279_v5, 2 }
 0x223   : > { %v2281_v46 = vadd.f32 %v2280_v7, %v2279_v5 }
 0x225   : > { %v2282_v9 = vrot.slane %v2281_v46, 1 }
 0x227   : > { %v2283_v52 = vadd.f32 %v2282_v9, %v2281_v46 }
 0x229   : > { %2419 = vst.msk [vmem:[%s4087_s21] sm:$0x1] %vm2418_vm11, %v2283_v52  ;;  %v4091_v61 = vmul.f32 0.00390625, %v2283_v52 }
 0x22b   : > { %v4095_v15 = vsub.f32 %v4002_v37, %v4091_v61  ;;  %v4099_v50 = vsub.f32 %v3998_v31, %v4091_v61  ;;  %v4103_v19 = vsub.f32 %v4016_v51, %v4091_v61  ;;  %v4107_v22 = vsub.f32 %v4012_v44, %v4091_v61 }
 0x22c   : > { %v4111_v28 = vsub.f32 %v4030_v59, %v4091_v61  ;;  %v4115_v37 = vsub.f32 %v4026_v20, %v4091_v61  ;;  %v4119_v31 = vsub.f32 %v4044_v2, %v4091_v61  ;;  %v4123_v51 = vsub.f32 %v4040_v60, %v4091_v61 }
 0x22d   : > { %v4126_v29 = vsub.f32 %v3030_v17, %v4091_v61  ;;  %v4129_v44 = vsub.f32 %v3029_v10, %v4091_v61  ;;  %v4132_v59 = vsub.f32 %v3032_v39, %v4091_v61  ;;  %v4135_v20 = vsub.f32 %v3031_v33, %v4091_v61 }
 0x22e   : > { %v4138_v35 = vsub.f32 %v3034_v53, %v4091_v61  ;;  %v4141_v2 = vsub.f32 %v3033_v45, %v4091_v61  ;;  %v4144_v60 = vsub.f32 %v3036_v26, %v4091_v61  ;;  %v4147_v17 = vsub.f32 %v3035_v32, %v4091_v61 }
 0x22f   : > { %v2285_v10 = vsub.f32 %v3884_v8, %v4091_v61  ;;  %v2286_v3 = vsub.f32 %v3882_v6, %v4091_v61  ;;  %v2287_v33 = vsub.f32 %v3894_v14, %v4091_v61  ;;  %v2288_v39 = vsub.f32 %v3892_v11, %v4091_v61 }
 0x230   : > { %v2289_v41 = vsub.f32 %v3904_v18, %v4091_v61  ;;  %v2290_v45 = vsub.f32 %v3902_v16, %v4091_v61  ;;  %v2291_v14 = vsub.f32 %v3914_v23, %v4091_v61  ;;  %v2292_v18 = vsub.f32 %v3912_v21, %v4091_v61 }
 0x231   : > { %v2317_v4 = vmul.f32 %v2285_v10, %v2285_v10  ;;  %v2318_v40 = vmul.f32 %v2286_v3, %v2286_v3  ;;  %v2319_v42 = vmul.f32 %v2287_v33, %v2287_v33  ;;  %v2320_v12 = vmul.f32 %v2288_v39, %v2288_v39 }
 0x232   : > { %v2321_v53 = vmul.f32 %v2289_v41, %v2289_v41  ;;  %v2322_v54 = vmul.f32 %v2290_v45, %v2290_v45  ;;  %v2293_v1 = vsub.f32 %v3928_v30, %v4091_v61  ;;  %v2323_v32 = vmul.f32 %v2291_v14, %v2291_v14 }
 0x233   : > { %v2349_v8 = vsel %vm631_vm0, %v2317_v4, 0.0  ;;  %v2350_v6 = vsel %vm631_vm0, %v2318_v40, 0.0  ;;  %v2352_v11 = vsel %vm631_vm0, %v2319_v42, 0.0  ;;  %v2354_v55 = vsel %vm631_vm0, %v2320_v12, 0.0 }
 0x234   : > { %v2351_v0 = vadd.f32 %v2350_v6, %v2349_v8  ;;  %v2356_v56 = vsel %vm631_vm0, %v2321_v53, 0.0  ;;  %v2294_v23 = vsub.f32 %v3922_v25, %v4091_v61  ;;  %v2324_v26 = vmul.f32 %v2292_v18, %v2292_v18 }
 0x235   : > { %v2358_v49 = vsel %vm631_vm0, %v2322_v54, 0.0  ;;  %v2295_v21 = vsub.f32 %v3940_v38, %v4091_v61  ;;  %v2325_v62 = vmul.f32 %v2293_v1, %v2293_v1  ;;  %v2360_v57 = vsel %vm631_vm0, %v2323_v32, 0.0 }
 0x236   : > { %v2353_v13 = vadd.f32 %v2352_v11, %v2351_v0  ;;  %v2296_v30 = vsub.f32 %v3938_v36, %v4091_v61  ;;  %v2326_v58 = vmul.f32 %v2294_v23, %v2294_v23  ;;  %v2362_v5 = vsel %vm631_vm0, %v2324_v26, 0.0 }
 0x237   : > { %v2297_v25 = vsub.f32 %v3952_v43, %v4091_v61  ;;  %v2327_v46 = vmul.f32 %v2295_v21, %v2295_v21  ;;  %v2364_v9 = vsel %vm631_vm0, %v2325_v62, 0.0  ;;  %v2298_v38 = vsub.f32 %v3948_v34, %v4091_v61 }
 0x238   : > { %v2355_v16 = vadd.f32 %v2354_v55, %v2353_v13  ;;  %v2328_v10 = vmul.f32 %v2296_v30, %v2296_v30  ;;  %v2366_v3 = vsel %vm631_vm0, %v2326_v58, 0.0  ;;  %v2299_v36 = vsub.f32 %v3964_v48, %v4091_v61 }
 0x239   : > { %v2329_v39 = vmul.f32 %v2297_v25, %v2297_v25  ;;  %v2368_v4 = vsel %vm631_vm0, %v2327_v46, 0.0  ;;  %v2300_v43 = vsub.f32 %v3962_v47, %v4091_v61  ;;  %v2330_v41 = vmul.f32 %v2298_v38, %v2298_v38 }
 0x23a   : > { %v2357_v24 = vadd.f32 %v2356_v56, %v2355_v16  ;;  %v2370_v42 = vsel %vm631_vm0, %v2328_v10, 0.0  ;;  %v2331_v12 = vmul.f32 %v2299_v36, %v2299_v36  ;;  %v2333_v48 = vmul.f32 %v4095_v15, %v4095_v15 }
 0x23b   : > { %v2372_v34 = vsel %vm631_vm0, %v2329_v39, 0.0  ;;  %v2332_v6 = vmul.f32 %v2300_v43, %v2300_v43  ;;  %v2374_v0 = vsel %vm631_vm0, %v2330_v41, 0.0  ;;  %v2334_v47 = vmul.f32 %v4099_v50, %v4099_v50 }
 0x23c   : > { %v2359_v27 = vadd.f32 %v2358_v49, %v2357_v24  ;;  %v2376_v53 = vsel %vm631_vm0, %v2331_v12, 0.0  ;;  %v2335_v18 = vmul.f32 %v4103_v19, %v4103_v19  ;;  %v2380_v54 = vsel %vm631_vm0, %v2333_v48, 0.0 }
 0x23d   : > { %v2378_v61 = vsel %vm631_vm0, %v2332_v6, 0.0  ;;  %v2336_v16 = vmul.f32 %v4107_v22, %v4107_v22  ;;  %v2382_v15 = vsel %vm631_vm0, %v2334_v47, 0.0  ;;  %v2337_v32 = vmul.f32 %v4111_v28, %v4111_v28 }
 0x23e   : > { %v2361_v63 = vadd.f32 %v2360_v57, %v2359_v27  ;;  %v2384_v50 = vsel %vm631_vm0, %v2335_v18, 0.0  ;;  %v2338_v24 = vmul.f32 %v4115_v37, %v4115_v37  ;;  %v2339_v26 = vmul.f32 %v4119_v31, %v4119_v31 }
 0x23f   : > { %v2386_v19 = vsel %vm631_vm0, %v2336_v16, 0.0  ;;  %v2388_v22 = vsel %vm631_vm0, %v2337_v32, 0.0  ;;  %v2340_v27 = vmul.f32 %v4123_v51, %v4123_v51  ;;  %v2341_v62 = vmul.f32 %v4126_v29, %v4126_v29 }
 0x240   : > { %v2363_v7 = vadd.f32 %v2362_v5, %v2361_v63  ;;  %v2390_v28 = vsel %vm631_vm0, %v2338_v24, 0.0  ;;  %v2392_v37 = vsel %vm631_vm0, %v2339_v26, 0.0  ;;  %v2342_v63 = vmul.f32 %v4129_v44, %v4129_v44 }
 0x241   : > { %v2394_v31 = vsel %vm631_vm0, %v2340_v27, 0.0  ;;  %v2343_v58 = vmul.f32 %v4132_v59, %v4132_v59  ;;  %v2396_v51 = vsel %vm631_vm0, %v2341_v62, 0.0  ;;  %v2345_v46 = vmul.f32 %v4138_v35, %v4138_v35 }
 0x242   : > { %v2365_v52 = vadd.f32 %v2364_v9, %v2363_v7  ;;  %v2344_v7 = vmul.f32 %v4135_v20, %v4135_v20  ;;  %v2398_v29 = vsel %vm631_vm0, %v2342_v63, 0.0  ;;  %v2347_v10 = vmul.f32 %v4144_v60, %v4144_v60 }
 0x243   : > { %v2400_v44 = vsel %vm631_vm0, %v2343_v58, 0.0  ;;  %v2404_v20 = vsel %vm631_vm0, %v2345_v46, 0.0 }
 0x244   : > { %v2367_v33 = vadd.f32 %v2366_v3, %v2365_v52  ;;  %v2346_v52 = vmul.f32 %v4141_v2, %v4141_v2  ;;  %v2402_v59 = vsel %vm631_vm0, %v2344_v7, 0.0  ;;  %v2408_v39 = vsel %vm631_vm0, %v2347_v10, 0.0 }
 0x246   : > { %v2369_v40 = vadd.f32 %v2368_v4, %v2367_v33  ;;  %v2348_v33 = vmul.f32 %v4147_v17, %v4147_v17  ;;  %v2406_v35 = vsel %vm631_vm0, %v2346_v52, 0.0 }
 0x248   : > { %v2371_v45 = vadd.f32 %v2370_v42, %v2369_v40  ;;  %v2410_v2 = vsel %vm631_vm0, %v2348_v33, 0.0 }
 0x24a   : > { %v2373_v8 = vadd.f32 %v2372_v34, %v2371_v45 }
 0x24c   : > { %v2375_v14 = vadd.f32 %v2374_v0, %v2373_v8 }
 0x24e   : > { %v2377_v11 = vadd.f32 %v2376_v53, %v2375_v14 }
 0x250   : > { %v2379_v13 = vadd.f32 %v2378_v61, %v2377_v11 }
 0x252   : > { %v2381_v55 = vadd.f32 %v2380_v54, %v2379_v13 }
 0x254   : > { %v2383_v1 = vadd.f32 %v2382_v15, %v2381_v55 }
 0x256   : > { %v2385_v56 = vadd.f32 %v2384_v50, %v2383_v1 }
 0x258   : > { %v2387_v23 = vadd.f32 %v2386_v19, %v2385_v56 }
 0x25a   : > { %v2389_v49 = vadd.f32 %v2388_v22, %v2387_v23 }
 0x25c   : > { %v2391_v21 = vadd.f32 %v2390_v28, %v2389_v49 }
 0x25e   : > { %v2393_v57 = vadd.f32 %v2392_v37, %v2391_v21 }
 0x260   : > { %v2395_v30 = vadd.f32 %v2394_v31, %v2393_v57 }
 0x262   : > { %v2397_v5 = vadd.f32 %v2396_v51, %v2395_v30 }
 0x264   : > { %v2399_v25 = vadd.f32 %v2398_v29, %v2397_v5 }
 0x266   : > { %v2401_v9 = vadd.f32 %v2400_v44, %v2399_v25 }
 0x268   : > { %v2403_v38 = vadd.f32 %v2402_v59, %v2401_v9 }
 0x26a   : > { %v2405_v3 = vadd.f32 %v2404_v20, %v2403_v38 }
 0x26c   : > { %v2407_v36 = vadd.f32 %v2406_v35, %v2405_v3 }
 0x26e   : > { %v2409_v4 = vadd.f32 %v2408_v39, %v2407_v36 }
 0x270   : > { %v2411_v40 = vadd.f32 %v2410_v2, %v2409_v4 }
 0x272   : > { %v2412_v43 = vrot.slane %v2411_v40, 4 }
 0x274   : > { %v2413_v41 = vadd.f32 %v2412_v43, %v2411_v40 }
 0x276   : > { %v2414_v42 = vrot.slane %v2413_v41, 2 }
 0x278   : > { %v2415_v60 = vadd.f32 %v2414_v42, %v2413_v41 }
 0x27a   : > { %v2416_v45 = vrot.slane %v2415_v60, 1 }
 0x27c   : > { %v2417_v12 = vadd.f32 %v2416_v45, %v2415_v60 }
 0x27e   : > { %2420 = vst.msk [vmem:[%s4087_s21 + $0x1] sm:$0x1] %vm2418_vm11, %v2417_v12 }
 0x27f PF: > { %s18_s26 = sadd.s32 1, %s3119_s26   ;;  %s4266_s24 = smov %s3115_s25 }
 0x280   : > { %p15_p5 = scmp.ge.s32.totalorder %s18_s26, 4   ;;  %s4267_s25 = smov %s4269_s27 }
 0x282   :  { %17 = sbr.rel (!%p15_p5) target bundleno = 2 (0x2), region = 97 }

</bundles_post_ra>
